<compile_context>
chip_gen: v7x
topology: tpu7x:2x2x1
jax: 0.10.0
libtpu: 0.0.40
codegen_flags: <defaults>
</compile_context>

<pallas_src>
import jax
import jax.numpy as jnp
from jax import lax
from jax.experimental import pallas as pl
from jax.experimental.pallas import tpu as pltpu

# ---------------- small synthetic ELMo configuration ----------------
B, S, C = 2, 8, 16            # batch, seq length, max chars per token
CHAR_VOCAB = 64
D_CHAR = 16                   # character embedding dim
FILTERS = ((1, 8), (2, 8), (3, 16))   # (kernel width, num filters)
MAX_W = max(w for w, _ in FILTERS)    # 3
N_FILT = sum(f for _, f in FILTERS)   # 32
N_HIGHWAY = 2
P_DIM = 16                    # biLM projection dim (per direction)
H_LSTM = 16                   # LSTM hidden size per direction
N_LSTM_LAYERS = 2
ELMO_SIZE = 2 * P_DIM         # 32 = output representation size
N_TOK = B * S                 # 16 tokens
assert P_DIM == H_LSTM        # required by the packed LSTM weights / scalar mix


def _full_spec(shape):
    nd = len(shape)
    return pl.BlockSpec(shape, lambda *_a, _nd=nd: (0,) * _nd)


# ---------------- the single fused kernel ----------------
def elmo_kernel(emb_ref, cnn_w_ref, cnn_b_ref,
                hw_wt_ref, hw_bt_ref, hw_wh_ref, hw_bh_ref,
                proj_w_ref, proj_b_ref,
                wih0_ref, wih1_ref, whh_ref, bg_ref, smix_ref,
                o_ref, tok_ref, gih_ref, h1_ref, h2_ref):
    """emb: [C*N, MAX_W*D] (char-major rows, conv offsets packed along K),
    cnn_w: [MAX_W*D, F], cnn_b: [1, F], hw_*: [L_hw, F, F]/[L_hw, 1, F],
    proj: [F, P]/[1, P], wih0: [P, 8H], wih1: [2H, 8H] (block-diag over dir),
    whh: [L, 2H, 8H] (block-diag over dir), bg: [L, 1, 8H], smix (SMEM): [4].
    Gate-axis packing (8H = 128): [i | f | o | g], each 2H wide = [fwd H | bwd H].
    out: [B, S, 2H].  Scratch: tok [N, P], gih [N, 8H], h1/h2 [N, 2H]."""
    H = H_LSTM
    H2 = 2 * H            # combined fwd|bwd hidden width (32)
    G = 8 * H             # combined gate slab width (128)
    N = N_TOK

    # ---- char-CNN: one K-packed matmul over all char positions ----
    y = jnp.dot(emb_ref[...], cnn_w_ref[...],
                preferred_element_type=jnp.float32)            # [C*N, F]
    y3 = y.reshape(C, N, N_FILT)
    # static in-kernel conv-position mask: position c is valid for a width-w
    # filter iff c <= C - w
    cpos = lax.broadcasted_iota(jnp.int32, y3.shape, 0)
    fcol = lax.broadcasted_iota(jnp.int32, y3.shape, 2)
    thr = jnp.full(y3.shape, C - FILTERS[0][0], jnp.int32)
    start = FILTERS[0][1]
    for (w, nf) in FILTERS[1:]:
        thr = jnp.where(fcol >= start, C - w, thr)
        start += nf
    y3 = jnp.where(cpos <= thr, y3, -1e30)
    x = jax.nn.relu(jnp.max(y3, axis=0) + cnn_b_ref[...])      # max-pool -> [N, F]

    # ---- highway layers ----
    # TODO(synk): AllenNLP's Highway gates the carry path (g*x + (1-g)*f(x));
    # this keeps the t*h + (1-t)*x convention (irrelevant for synthetic weights).
    for i in range(N_HIGHWAY):
        tg = jax.nn.sigmoid(
            jnp.dot(x, hw_wt_ref[i], preferred_element_type=jnp.float32)
            + hw_bt_ref[i])
        hc = jax.nn.relu(
            jnp.dot(x, hw_wh_ref[i], preferred_element_type=jnp.float32)
            + hw_bh_ref[i])
        x = tg * hc + (1.0 - tg) * x

    # ---- projection to the biLM input dim ----
    tok = jnp.dot(x, proj_w_ref[...],
                  preferred_element_type=jnp.float32) + proj_b_ref[...]   # [N, P]
    tok_ref[...] = tok

    # ---- static lane masks for the direction-fused recurrence ----
    lane = lax.broadcasted_iota(jnp.int32, (B, G), 1)
    sig_mask = lane < 6 * H                # gates i, f, o -> sigmoid ; g -> tanh
    fwd_mask = (lane % H2) < H             # fwd half of every 2H gate block

    # TODO(synk): real ELMo uses LstmCellWithProjection with state clipping;
    # a vanilla LSTM with synthetic weights stands in for it.
    def run_layer(whh, residual):
        dst = h2_ref if residual else h1_ref
        h = jnp.zeros((B, H2), jnp.float32)    # [fwd h | bwd h]
        c = jnp.zeros((B, H2), jnp.float32)
        for t in range(S):                     # static, fully unrolled time loop
            tr = S - 1 - t                     # bwd direction runs time-reversed
            # hoisted input gates: fwd lanes from position t, bwd lanes from tr
            g_in = jnp.where(fwd_mask,
                             gih_ref[t * B:(t + 1) * B, :],
                             gih_ref[tr * B:(tr + 1) * B, :])
            g = g_in + jnp.dot(h, whh, preferred_element_type=jnp.float32)  # [B, 8H]
            a = jnp.where(sig_mask, jax.nn.sigmoid(g), jnp.tanh(g))
            i_g = a[:, 0 * H2:1 * H2]
            f_g = a[:, 1 * H2:2 * H2]
            o_g = a[:, 2 * H2:3 * H2]
            g_g = a[:, 3 * H2:4 * H2]
            c = f_g * c + i_g * g_g
            h = o_g * jnp.tanh(c)
            if residual:                       # residual between stacked layers
                dst[t * B:(t + 1) * B, 0:H] = (
                    h[:, 0:H] + h1_ref[t * B:(t + 1) * B, 0:H])
                dst[tr * B:(tr + 1) * B, H:H2] = (
                    h[:, H:H2] + h1_ref[tr * B:(tr + 1) * B, H:H2])
            else:
                dst[t * B:(t + 1) * B, 0:H] = h[:, 0:H]
                dst[tr * B:(tr + 1) * B, H:H2] = h[:, H:H2]

    # layer 0: Wih*x + bias for all steps & both directions in ONE matmul
    gih_ref[...] = (jnp.dot(tok, wih0_ref[...],
                            preferred_element_type=jnp.float32) + bg_ref[0])
    run_layer(whh_ref[0], residual=False)

    # layer 1: input is the combined [fwd|bwd] layer-0 sequence (block-diag Wih)
    gih_ref[...] = (jnp.dot(h1_ref[...], wih1_ref[...],
                            preferred_element_type=jnp.float32) + bg_ref[1])
    run_layer(whh_ref[1], residual=True)

    # ---- scalar-mix epilogue: write the representation directly as [B, S, 2H] ----
    s0 = smix_ref[0]
    s1 = smix_ref[1]
    s2 = smix_ref[2]
    gamma = smix_ref[3]
    for t in range(S):
        tok_t = tok_ref[t * B:(t + 1) * B, :]                  # [B, P]
        rep0 = jnp.concatenate([tok_t, tok_t], axis=-1)        # layer-0 rep = [proj|proj]
        o_ref[:, t, :] = gamma * (s0 * rep0
                                  + s1 * h1_ref[t * B:(t + 1) * B, :]
                                  + s2 * h2_ref[t * B:(t + 1) * B, :])


# ---------------- parameters (deterministic synthetic init) ----------------
def init_params(key):
    ks = iter(jax.random.split(key, 16))

    def nrm(shape, scale=0.1):
        return scale * jax.random.normal(next(ks), shape, jnp.float32)

    H = H_LSTM
    p = {}
    p["char_emb"] = nrm((CHAR_VOCAB, D_CHAR))

    # packed CNN weight: rows j*D..(j+1)*D = weights applied to the char at
    # offset +j; filters of width w only populate offsets 0..w-1.
    wc = jnp.zeros((MAX_W, D_CHAR, N_FILT), jnp.float32)
    col = 0
    for (w, f) in FILTERS:
        wc = wc.at[:w, :, col:col + f].set(nrm((w, D_CHAR, f)))
        col += f
    p["cnn_w"] = wc.reshape(MAX_W * D_CHAR, N_FILT)
    p["cnn_b"] = nrm((1, N_FILT))

    p["hw_wt"] = nrm((N_HIGHWAY, N_FILT, N_FILT))
    p["hw_bt"] = nrm((N_HIGHWAY, 1, N_FILT))
    p["hw_wh"] = nrm((N_HIGHWAY, N_FILT, N_FILT))
    p["hw_bh"] = nrm((N_HIGHWAY, 1, N_FILT))
    p["proj_w"] = nrm((N_FILT, P_DIM))
    p["proj_b"] = nrm((1, P_DIM))

    # raw per-(direction, layer, gate) LSTM weights; gate order i, f, o, g
    # (sigmoid gates first, tanh gate last).
    wih_raw = nrm((2, N_LSTM_LAYERS, 4, H, P_DIM))   # [d, l, gate, H, Din]
    whh_raw = nrm((2, N_LSTM_LAYERS, 4, H, H))
    b_raw = nrm((2, N_LSTM_LAYERS, 4, H))

    # packed gate-axis column index: gate*2H + dir*H + h
    # layer-0 input projection (both directions read the same token input)
    p["wih0"] = jnp.transpose(wih_raw[:, 0], (3, 1, 0, 2)).reshape(P_DIM, 8 * H)

    # layer-1 input projection and both Whh: block-diagonal over direction,
    # rows = combined [fwd h | bwd h] layout.
    w1 = jnp.zeros((2 * H, 4, 2, H), jnp.float32)
    whh_p = jnp.zeros((N_LSTM_LAYERS, 2 * H, 4, 2, H), jnp.float32)
    for d in range(2):
        w1 = w1.at[d * H:(d + 1) * H, :, d, :].set(
            jnp.transpose(wih_raw[d, 1], (2, 0, 1)))
        for l in range(N_LSTM_LAYERS):
            whh_p = whh_p.at[l, d * H:(d + 1) * H, :, d, :].set(
                jnp.transpose(whh_raw[d, l], (2, 0, 1)))
    p["wih1"] = w1.reshape(2 * H, 8 * H)
    p["whh"] = whh_p.reshape(N_LSTM_LAYERS, 2 * H, 8 * H)
    p["bg"] = jnp.transpose(b_raw, (1, 2, 0, 3)).reshape(N_LSTM_LAYERS, 1, 8 * H)

    p["mix_w"] = nrm((3,))
    p["mix_gamma"] = jnp.ones((1,), jnp.float32)
    return p


# ---------------- ELMo forward (equivalent of ElmoEmbeddings.forward) ----------------
def elmo_forward(params, char_ids):
    Bsz, Ssz, Csz = char_ids.shape
    N = Bsz * Ssz

    # XLA glue: char-embedding gather with the MAX_W conv offsets packed along
    # K; token rows ordered (time, batch) so the kernel needs no relayouts.
    ids = jnp.transpose(char_ids, (1, 0, 2)).reshape(N, Csz)            # [N, C]
    shifted = [jnp.pad(ids[:, j:], ((0, 0), (0, j))) for j in range(MAX_W)]
    ids_k = jnp.stack(shifted, axis=-1)                                 # [N, C, MAX_W]
    emb = params["char_emb"][ids_k]                                     # [N, C, MAX_W, D]
    emb_packed = jnp.transpose(emb, (1, 0, 2, 3)).reshape(Csz * N, MAX_W * D_CHAR)

    smix = jnp.concatenate([jax.nn.softmax(params["mix_w"]),
                            params["mix_gamma"]])                       # s0,s1,s2,gamma

    vmem_args = (emb_packed, params["cnn_w"], params["cnn_b"],
                 params["hw_wt"], params["hw_bt"], params["hw_wh"], params["hw_bh"],
                 params["proj_w"], params["proj_b"],
                 params["wih0"], params["wih1"], params["whh"], params["bg"])

    return pl.pallas_call(
        elmo_kernel,
        out_shape=jax.ShapeDtypeStruct((Bsz, Ssz, ELMO_SIZE), jnp.float32),
        grid=(1,),
        in_specs=[_full_spec(a.shape) for a in vmem_args]
        + [pl.BlockSpec(memory_space=pltpu.MemorySpace.SMEM)],          # mix scalars
        out_specs=_full_spec((Bsz, Ssz, ELMO_SIZE)),
        scratch_shapes=[
            pltpu.VMEM((N, P_DIM), jnp.float32),           # token projections
            pltpu.VMEM((N, 8 * H_LSTM), jnp.float32),      # hoisted input gates
            pltpu.VMEM((N, 2 * H_LSTM), jnp.float32),      # layer-1 [fwd|bwd] seq
            pltpu.VMEM((N, 2 * H_LSTM), jnp.float32),      # layer-2 (+residual) seq
        ],
        compiler_params=pltpu.CompilerParams(
            dimension_semantics=("arbitrary",)),
    )(*vmem_args, smix)


if __name__ == "__main__":
    key = jax.random.PRNGKey(0)
    k_ids, k_params = jax.random.split(key)
    # TODO(synk): batch_to_ids (Python string -> ELMo char-id preprocessing) has
    # no Pallas equivalent; synthetic char-id tensors are used as kernel input.
    char_ids = jax.random.randint(k_ids, (B, S, C), 1, CHAR_VOCAB, dtype=jnp.int32)
    params = init_params(k_params)

    out = jax.jit(elmo_forward)(params, char_ids)
    out = jax.block_until_ready(out)
    assert out.shape == (B, S, ELMO_SIZE), out.shape
    assert jnp.all(jnp.isfinite(out))
    print("KERNEL_OK")
</pallas_src>

<mosaic_0001>
module attributes {stable_mosaic.version = 11 : i64} {
  func.func @elmo_kernel(%arg0: i32, %arg1: memref<256x48xf32, #tpu.memory_space<vmem>>, %arg2: memref<48x32xf32, #tpu.memory_space<vmem>>, %arg3: memref<1x32xf32, #tpu.memory_space<vmem>>, %arg4: memref<2x32x32xf32, #tpu.memory_space<vmem>>, %arg5: memref<2x1x32xf32, #tpu.memory_space<vmem>>, %arg6: memref<2x32x32xf32, #tpu.memory_space<vmem>>, %arg7: memref<2x1x32xf32, #tpu.memory_space<vmem>>, %arg8: memref<32x16xf32, #tpu.memory_space<vmem>>, %arg9: memref<1x16xf32, #tpu.memory_space<vmem>>, %arg10: memref<16x128xf32, #tpu.memory_space<vmem>>, %arg11: memref<32x128xf32, #tpu.memory_space<vmem>>, %arg12: memref<2x32x128xf32, #tpu.memory_space<vmem>>, %arg13: memref<2x1x128xf32, #tpu.memory_space<vmem>>, %arg14: memref<4xf32, #tpu.memory_space<smem>>, %arg15: memref<2x8x32xf32, #tpu.memory_space<vmem>>, %arg16: memref<16x16xf32, #tpu.memory_space<vmem>>, %arg17: memref<16x128xf32, #tpu.memory_space<vmem>>, %arg18: memref<16x32xf32, #tpu.memory_space<vmem>>, %arg19: memref<16x32xf32, #tpu.memory_space<vmem>>) attributes {dimension_semantics = [#tpu.dimension_semantics<arbitrary>], iteration_bounds = array<i64: 1>, scalar_prefetch = 0 : i64, scratch_operands = 4 : i64, tpu.core_type = #tpu.core_type<tc>, window_params = [{pipeline_mode = #tpu.pipeline_mode<synchronous>, transform_indices = @transform_0, window_bounds = array<i64: 256, 48>}, {pipeline_mode = #tpu.pipeline_mode<synchronous>, transform_indices = @transform_1, window_bounds = array<i64: 48, 32>}, {pipeline_mode = #tpu.pipeline_mode<synchronous>, transform_indices = @transform_2, window_bounds = array<i64: 1, 32>}, {pipeline_mode = #tpu.pipeline_mode<synchronous>, transform_indices = @transform_3, window_bounds = array<i64: 2, 32, 32>}, {pipeline_mode = #tpu.pipeline_mode<synchronous>, transform_indices = @transform_4, window_bounds = array<i64: 2, 1, 32>}, {pipeline_mode = #tpu.pipeline_mode<synchronous>, transform_indices = @transform_5, window_bounds = array<i64: 2, 32, 32>}, {pipeline_mode = #tpu.pipeline_mode<synchronous>, transform_indices = @transform_6, window_bounds = array<i64: 2, 1, 32>}, {pipeline_mode = #tpu.pipeline_mode<synchronous>, transform_indices = @transform_7, window_bounds = array<i64: 32, 16>}, {pipeline_mode = #tpu.pipeline_mode<synchronous>, transform_indices = @transform_8, window_bounds = array<i64: 1, 16>}, {pipeline_mode = #tpu.pipeline_mode<synchronous>, transform_indices = @transform_9, window_bounds = array<i64: 16, 128>}, {pipeline_mode = #tpu.pipeline_mode<synchronous>, transform_indices = @transform_10, window_bounds = array<i64: 32, 128>}, {pipeline_mode = #tpu.pipeline_mode<synchronous>, transform_indices = @transform_11, window_bounds = array<i64: 2, 32, 128>}, {pipeline_mode = #tpu.pipeline_mode<synchronous>, transform_indices = @transform_12, window_bounds = array<i64: 2, 1, 128>}, {transform_indices = @transform_13, window_bounds = array<i64: 4>}, {pipeline_mode = #tpu.pipeline_mode<synchronous>, transform_indices = @transform_14, window_bounds = array<i64: 2, 8, 32>}]} {
    %c0 = arith.constant 0 : index
    %c0_0 = arith.constant 0 : index
    %0 = vector.load %arg1[%c0, %c0_0] : memref<256x48xf32, #tpu.memory_space<vmem>>, vector<256x48xf32>
    %c0_1 = arith.constant 0 : index
    %c0_2 = arith.constant 0 : index
    %1 = vector.load %arg2[%c0_1, %c0_2] : memref<48x32xf32, #tpu.memory_space<vmem>>, vector<48x32xf32>
    %cst = arith.constant dense<0.000000e+00> : vector<256x32xf32>
    %2 = tpu.matmul %0, %1, %cst {dimension_numbers = #tpu.dot_dimension_numbers<[1], [0], [0], [1], [0, 0, 1, 1], [], []>} : vector<256x48xf32>, vector<48x32xf32>, vector<256x32xf32> -> vector<256x32xf32>
    %3 = vector.shape_cast %2 : vector<256x32xf32> to vector<16x16x32xf32>
    %4 = tpu.iota {dimensions = array<i32: 0>} : vector<16x16x32xi32>
    %5 = tpu.iota {dimensions = array<i32: 2>} : vector<16x16x32xi32>
    %c15_i32 = arith.constant 15 : i32
    %6 = vector.broadcast %c15_i32 : i32 to vector<16x16x32xi32>
    %c8_i32 = arith.constant 8 : i32
    %7 = vector.broadcast %c8_i32 : i32 to vector<16x16x32xi32>
    %8 = arith.cmpi sge, %5, %7 : vector<16x16x32xi32>
    %c14_i32 = arith.constant 14 : i32
    %9 = vector.broadcast %c14_i32 : i32 to vector<16x16x32xi32>
    %10 = arith.select %8, %9, %6 : vector<16x16x32xi1>, vector<16x16x32xi32>
    %c16_i32 = arith.constant 16 : i32
    %11 = vector.broadcast %c16_i32 : i32 to vector<16x16x32xi32>
    %12 = arith.cmpi sge, %5, %11 : vector<16x16x32xi32>
    %c13_i32 = arith.constant 13 : i32
    %13 = vector.broadcast %c13_i32 : i32 to vector<16x16x32xi32>
    %14 = arith.select %12, %13, %10 : vector<16x16x32xi1>, vector<16x16x32xi32>
    %15 = arith.cmpi sle, %4, %14 : vector<16x16x32xi32>
    %cst_3 = arith.constant -1.000000e+30 : f32
    %16 = vector.broadcast %cst_3 : f32 to vector<16x16x32xf32>
    %17 = arith.select %15, %3, %16 : vector<16x16x32xi1>, vector<16x16x32xf32>
    %cst_4 = arith.constant dense<0xFF800000> : vector<16x32xf32>
    %18 = vector.multi_reduction <maximumf>, %17, %cst_4 [0] : vector<16x16x32xf32> to vector<16x32xf32>
    %c0_5 = arith.constant 0 : index
    %c0_6 = arith.constant 0 : index
    %19 = vector.load %arg3[%c0_5, %c0_6] : memref<1x32xf32, #tpu.memory_space<vmem>>, vector<1x32xf32>
    %20 = vector.broadcast %19 : vector<1x32xf32> to vector<16x32xf32>
    %21 = arith.addf %18, %20 : vector<16x32xf32>
    %cst_7 = arith.constant 0.000000e+00 : f32
    %22 = vector.broadcast %cst_7 : f32 to vector<16x32xf32>
    %23 = arith.maximumf %21, %22 : vector<16x32xf32>
    %c0_8 = arith.constant 0 : index
    %c0_9 = arith.constant 0 : index
    %c0_10 = arith.constant 0 : index
    %24 = vector.load %arg4[%c0_8, %c0_9, %c0_10] : memref<2x32x32xf32, #tpu.memory_space<vmem>>, vector<1x32x32xf32>
    %25 = vector.shape_cast %24 : vector<1x32x32xf32> to vector<32x32xf32>
    %cst_11 = arith.constant dense<0.000000e+00> : vector<16x32xf32>
    %26 = tpu.matmul %23, %25, %cst_11 {dimension_numbers = #tpu.dot_dimension_numbers<[1], [0], [0], [1], [0, 0, 1, 1], [], []>} : vector<16x32xf32>, vector<32x32xf32>, vector<16x32xf32> -> vector<16x32xf32>
    %c0_12 = arith.constant 0 : index
    %c0_13 = arith.constant 0 : index
    %c0_14 = arith.constant 0 : index
    %27 = vector.load %arg5[%c0_12, %c0_13, %c0_14] : memref<2x1x32xf32, #tpu.memory_space<vmem>>, vector<1x1x32xf32>
    %28 = vector.shape_cast %27 : vector<1x1x32xf32> to vector<1x32xf32>
    %29 = vector.broadcast %28 : vector<1x32xf32> to vector<16x32xf32>
    %30 = arith.addf %26, %29 : vector<16x32xf32>
    %31 = arith.negf %30 : vector<16x32xf32>
    %32 = math.exp %31 : vector<16x32xf32>
    %cst_15 = arith.constant 1.000000e+00 : f32
    %33 = vector.broadcast %cst_15 : f32 to vector<16x32xf32>
    %34 = arith.addf %33, %32 : vector<16x32xf32>
    %35 = arith.divf %33, %34 : vector<16x32xf32>
    %c0_16 = arith.constant 0 : index
    %c0_17 = arith.constant 0 : index
    %c0_18 = arith.constant 0 : index
    %36 = vector.load %arg6[%c0_16, %c0_17, %c0_18] : memref<2x32x32xf32, #tpu.memory_space<vmem>>, vector<1x32x32xf32>
    %37 = vector.shape_cast %36 : vector<1x32x32xf32> to vector<32x32xf32>
    %cst_19 = arith.constant dense<0.000000e+00> : vector<16x32xf32>
    %38 = tpu.matmul %23, %37, %cst_19 {dimension_numbers = #tpu.dot_dimension_numbers<[1], [0], [0], [1], [0, 0, 1, 1], [], []>} : vector<16x32xf32>, vector<32x32xf32>, vector<16x32xf32> -> vector<16x32xf32>
    %c0_20 = arith.constant 0 : index
    %c0_21 = arith.constant 0 : index
    %c0_22 = arith.constant 0 : index
    %39 = vector.load %arg7[%c0_20, %c0_21, %c0_22] : memref<2x1x32xf32, #tpu.memory_space<vmem>>, vector<1x1x32xf32>
    %40 = vector.shape_cast %39 : vector<1x1x32xf32> to vector<1x32xf32>
    %41 = vector.broadcast %40 : vector<1x32xf32> to vector<16x32xf32>
    %42 = arith.addf %38, %41 : vector<16x32xf32>
    %cst_23 = arith.constant 0.000000e+00 : f32
    %43 = vector.broadcast %cst_23 : f32 to vector<16x32xf32>
    %44 = arith.maximumf %42, %43 : vector<16x32xf32>
    %45 = arith.mulf %35, %44 : vector<16x32xf32>
    %cst_24 = arith.constant 1.000000e+00 : f32
    %46 = vector.broadcast %cst_24 : f32 to vector<16x32xf32>
    %47 = arith.subf %46, %35 : vector<16x32xf32>
    %48 = arith.mulf %47, %23 : vector<16x32xf32>
    %49 = arith.addf %45, %48 : vector<16x32xf32>
    %c1 = arith.constant 1 : index
    %c0_25 = arith.constant 0 : index
    %c0_26 = arith.constant 0 : index
    %50 = vector.load %arg4[%c1, %c0_25, %c0_26] : memref<2x32x32xf32, #tpu.memory_space<vmem>>, vector<1x32x32xf32>
    %51 = vector.shape_cast %50 : vector<1x32x32xf32> to vector<32x32xf32>
    %cst_27 = arith.constant dense<0.000000e+00> : vector<16x32xf32>
    %52 = tpu.matmul %49, %51, %cst_27 {dimension_numbers = #tpu.dot_dimension_numbers<[1], [0], [0], [1], [0, 0, 1, 1], [], []>} : vector<16x32xf32>, vector<32x32xf32>, vector<16x32xf32> -> vector<16x32xf32>
    %c1_28 = arith.constant 1 : index
    %c0_29 = arith.constant 0 : index
    %c0_30 = arith.constant 0 : index
    %53 = vector.load %arg5[%c1_28, %c0_29, %c0_30] : memref<2x1x32xf32, #tpu.memory_space<vmem>>, vector<1x1x32xf32>
    %54 = vector.shape_cast %53 : vector<1x1x32xf32> to vector<1x32xf32>
    %55 = vector.broadcast %54 : vector<1x32xf32> to vector<16x32xf32>
    %56 = arith.addf %52, %55 : vector<16x32xf32>
    %57 = arith.negf %56 : vector<16x32xf32>
    %58 = math.exp %57 : vector<16x32xf32>
    %cst_31 = arith.constant 1.000000e+00 : f32
    %59 = vector.broadcast %cst_31 : f32 to vector<16x32xf32>
    %60 = arith.addf %59, %58 : vector<16x32xf32>
    %61 = arith.divf %59, %60 : vector<16x32xf32>
    %c1_32 = arith.constant 1 : index
    %c0_33 = arith.constant 0 : index
    %c0_34 = arith.constant 0 : index
    %62 = vector.load %arg6[%c1_32, %c0_33, %c0_34] : memref<2x32x32xf32, #tpu.memory_space<vmem>>, vector<1x32x32xf32>
    %63 = vector.shape_cast %62 : vector<1x32x32xf32> to vector<32x32xf32>
    %cst_35 = arith.constant dense<0.000000e+00> : vector<16x32xf32>
    %64 = tpu.matmul %49, %63, %cst_35 {dimension_numbers = #tpu.dot_dimension_numbers<[1], [0], [0], [1], [0, 0, 1, 1], [], []>} : vector<16x32xf32>, vector<32x32xf32>, vector<16x32xf32> -> vector<16x32xf32>
    %c1_36 = arith.constant 1 : index
    %c0_37 = arith.constant 0 : index
    %c0_38 = arith.constant 0 : index
    %65 = vector.load %arg7[%c1_36, %c0_37, %c0_38] : memref<2x1x32xf32, #tpu.memory_space<vmem>>, vector<1x1x32xf32>
    %66 = vector.shape_cast %65 : vector<1x1x32xf32> to vector<1x32xf32>
    %67 = vector.broadcast %66 : vector<1x32xf32> to vector<16x32xf32>
    %68 = arith.addf %64, %67 : vector<16x32xf32>
    %cst_39 = arith.constant 0.000000e+00 : f32
    %69 = vector.broadcast %cst_39 : f32 to vector<16x32xf32>
    %70 = arith.maximumf %68, %69 : vector<16x32xf32>
    %71 = arith.mulf %61, %70 : vector<16x32xf32>
    %cst_40 = arith.constant 1.000000e+00 : f32
    %72 = vector.broadcast %cst_40 : f32 to vector<16x32xf32>
    %73 = arith.subf %72, %61 : vector<16x32xf32>
    %74 = arith.mulf %73, %49 : vector<16x32xf32>
    %75 = arith.addf %71, %74 : vector<16x32xf32>
    %c0_41 = arith.constant 0 : index
    %c0_42 = arith.constant 0 : index
    %76 = vector.load %arg8[%c0_41, %c0_42] : memref<32x16xf32, #tpu.memory_space<vmem>>, vector<32x16xf32>
    %cst_43 = arith.constant dense<0.000000e+00> : vector<16x16xf32>
    %77 = tpu.matmul %75, %76, %cst_43 {dimension_numbers = #tpu.dot_dimension_numbers<[1], [0], [0], [1], [0, 0, 1, 1], [], []>} : vector<16x32xf32>, vector<32x16xf32>, vector<16x16xf32> -> vector<16x16xf32>
    %c0_44 = arith.constant 0 : index
    %c0_45 = arith.constant 0 : index
    %78 = vector.load %arg9[%c0_44, %c0_45] : memref<1x16xf32, #tpu.memory_space<vmem>>, vector<1x16xf32>
    %79 = vector.broadcast %78 : vector<1x16xf32> to vector<16x16xf32>
    %80 = arith.addf %77, %79 : vector<16x16xf32>
    %c0_46 = arith.constant 0 : index
    %c0_47 = arith.constant 0 : index
    %81 = vector.load %arg16[%c0_46, %c0_47] : memref<16x16xf32, #tpu.memory_space<vmem>>, vector<16x16xf32>
    tpu.vector_store %arg16[%c0_46, %c0_47], %80 {strides = array<i32>} : memref<16x16xf32, #tpu.memory_space<vmem>>, vector<16x16xf32>,
    %82 = tpu.iota {dimensions = array<i32: 1>} : vector<2x128xi32>
    %c96_i32 = arith.constant 96 : i32
    %83 = vector.broadcast %c96_i32 : i32 to vector<2x128xi32>
    %84 = arith.cmpi slt, %82, %83 : vector<2x128xi32>
    %c32_i32 = arith.constant 32 : i32
    %c0_i32 = arith.constant 0 : i32
    %85 = arith.cmpi eq, %c32_i32, %c0_i32 : i32
    %c1_i32 = arith.constant 1 : i32
    %86 = arith.select %85, %c1_i32, %c32_i32 : i32
    %87 = vector.broadcast %86 : i32 to vector<2x128xi32>
    %88 = arith.remsi %82, %87 : vector<2x128xi32>
    %c0_i32_48 = arith.constant 0 : i32
    %89 = vector.broadcast %c0_i32_48 : i32 to vector<2x128xi32>
    %90 = arith.cmpi ne, %88, %89 : vector<2x128xi32>
    %c0_i32_49 = arith.constant 0 : i32
    %91 = vector.broadcast %c0_i32_49 : i32 to vector<2x128xi32>
    %92 = arith.cmpi slt, %88, %91 : vector<2x128xi32>
    %c0_i32_50 = arith.constant 0 : i32
    %93 = arith.cmpi slt, %86, %c0_i32_50 : i32
    %94 = vector.broadcast %93 : i1 to vector<2x128xi1>
    %95 = vector.broadcast %94 : vector<2x128xi1> to vector<2x128xi1>
    %96 = arith.xori %92, %95 : vector<2x128xi1>
    %97 = arith.andi %96, %90 : vector<2x128xi1>
    %98 = vector.broadcast %86 : i32 to vector<2x128xi32>
    %99 = arith.addi %88, %98 : vector<2x128xi32>
    %100 = arith.select %97, %99, %88 : vector<2x128xi1>, vector<2x128xi32>
    %c16_i32_51 = arith.constant 16 : i32
    %101 = vector.broadcast %c16_i32_51 : i32 to vector<2x128xi32>
    %102 = arith.cmpi slt, %100, %101 : vector<2x128xi32>
    %c0_52 = arith.constant 0 : index
    %c0_53 = arith.constant 0 : index
    %103 = vector.load %arg10[%c0_52, %c0_53] : memref<16x128xf32, #tpu.memory_space<vmem>>, vector<16x128xf32>
    %cst_54 = arith.constant dense<0.000000e+00> : vector<16x128xf32>
    %104 = tpu.matmul %80, %103, %cst_54 {dimension_numbers = #tpu.dot_dimension_numbers<[1], [0], [0], [1], [0, 0, 1, 1], [], []>} : vector<16x16xf32>, vector<16x128xf32>, vector<16x128xf32> -> vector<16x128xf32>
    %c0_55 = arith.constant 0 : index
    %c0_56 = arith.constant 0 : index
    %c0_57 = arith.constant 0 : index
    %105 = vector.load %arg13[%c0_55, %c0_56, %c0_57] : memref<2x1x128xf32, #tpu.memory_space<vmem>>, vector<1x1x128xf32>
    %106 = vector.shape_cast %105 : vector<1x1x128xf32> to vector<1x128xf32>
    %107 = vector.broadcast %106 : vector<1x128xf32> to vector<16x128xf32>
    %108 = arith.addf %104, %107 : vector<16x128xf32>
    %c0_58 = arith.constant 0 : index
    %c0_59 = arith.constant 0 : index
    %109 = vector.load %arg17[%c0_58, %c0_59] : memref<16x128xf32, #tpu.memory_space<vmem>>, vector<16x128xf32>
    tpu.vector_store %arg17[%c0_58, %c0_59], %108 {strides = array<i32>} : memref<16x128xf32, #tpu.memory_space<vmem>>, vector<16x128xf32>,
    %c0_60 = arith.constant 0 : index
    %c0_61 = arith.constant 0 : index
    %c0_62 = arith.constant 0 : index
    %110 = vector.load %arg12[%c0_60, %c0_61, %c0_62] : memref<2x32x128xf32, #tpu.memory_space<vmem>>, vector<1x32x128xf32>
    %111 = vector.shape_cast %110 : vector<1x32x128xf32> to vector<32x128xf32>
    %cst_63 = arith.constant 0.000000e+00 : f32
    %112 = vector.broadcast %cst_63 : f32 to vector<2x32xf32>
    %cst_64 = arith.constant 0.000000e+00 : f32
    %113 = vector.broadcast %cst_64 : f32 to vector<2x32xf32>
    %c0_65 = arith.constant 0 : index
    %c0_66 = arith.constant 0 : index
    %114 = vector.load %arg17[%c0_65, %c0_66] : memref<16x128xf32, #tpu.memory_space<vmem>>, vector<2x128xf32>
    %c14 = arith.constant 14 : index
    %c0_67 = arith.constant 0 : index
    %115 = vector.load %arg17[%c14, %c0_67] : memref<16x128xf32, #tpu.memory_space<vmem>>, vector<2x128xf32>
    %116 = arith.select %102, %114, %115 : vector<2x128xi1>, vector<2x128xf32>
    %cst_68 = arith.constant dense<0.000000e+00> : vector<2x128xf32>
    %117 = tpu.matmul %112, %111, %cst_68 {dimension_numbers = #tpu.dot_dimension_numbers<[1], [0], [0], [1], [0, 0, 1, 1], [], []>} : vector<2x32xf32>, vector<32x128xf32>, vector<2x128xf32> -> vector<2x128xf32>
    %118 = arith.addf %116, %117 : vector<2x128xf32>
    %119 = arith.negf %118 : vector<2x128xf32>
    %120 = math.exp %119 : vector<2x128xf32>
    %cst_69 = arith.constant 1.000000e+00 : f32
    %121 = vector.broadcast %cst_69 : f32 to vector<2x128xf32>
    %122 = arith.addf %121, %120 : vector<2x128xf32>
    %123 = arith.divf %121, %122 : vector<2x128xf32>
    %124 = math.tanh %118 : vector<2x128xf32>
    %125 = arith.select %84, %123, %124 : vector<2x128xi1>, vector<2x128xf32>
    %126 = vector.extract_strided_slice %125 {offsets = [0, 0], sizes = [2, 32], strides = [1, 1]} : vector<2x128xf32> to vector<2x32xf32>
    %127 = vector.extract_strided_slice %125 {offsets = [0, 32], sizes = [2, 32], strides = [1, 1]} : vector<2x128xf32> to vector<2x32xf32>
    %128 = vector.extract_strided_slice %125 {offsets = [0, 64], sizes = [2, 32], strides = [1, 1]} : vector<2x128xf32> to vector<2x32xf32>
    %129 = vector.extract_strided_slice %125 {offsets = [0, 96], sizes = [2, 32], strides = [1, 1]} : vector<2x128xf32> to vector<2x32xf32>
    %130 = arith.mulf %127, %113 : vector<2x32xf32>
    %131 = arith.mulf %126, %129 : vector<2x32xf32>
    %132 = arith.addf %130, %131 : vector<2x32xf32>
    %133 = math.tanh %132 : vector<2x32xf32>
    %134 = arith.mulf %128, %133 : vector<2x32xf32>
    %135 = vector.extract_strided_slice %134 {offsets = [0, 0], sizes = [2, 16], strides = [1, 1]} : vector<2x32xf32> to vector<2x16xf32>
    %c0_70 = arith.constant 0 : index
    %c0_71 = arith.constant 0 : index
    %136 = vector.load %arg18[%c0_70, %c0_71] : memref<16x32xf32, #tpu.memory_space<vmem>>, vector<2x16xf32>
    tpu.vector_store %arg18[%c0_70, %c0_71], %135 {strides = array<i32>} : memref<16x32xf32, #tpu.memory_space<vmem>>, vector<2x16xf32>,
    %137 = vector.extract_strided_slice %134 {offsets = [0, 16], sizes = [2, 16], strides = [1, 1]} : vector<2x32xf32> to vector<2x16xf32>
    %c14_72 = arith.constant 14 : index
    %c16 = arith.constant 16 : index
    %138 = vector.load %arg18[%c14_72, %c16] : memref<16x32xf32, #tpu.memory_space<vmem>>, vector<2x16xf32>
    tpu.vector_store %arg18[%c14_72, %c16], %137 {strides = array<i32>} : memref<16x32xf32, #tpu.memory_space<vmem>>, vector<2x16xf32>,
    %c2 = arith.constant 2 : index
    %c0_73 = arith.constant 0 : index
    %139 = vector.load %arg17[%c2, %c0_73] : memref<16x128xf32, #tpu.memory_space<vmem>>, vector<2x128xf32>
    %c12 = arith.constant 12 : index
    %c0_74 = arith.constant 0 : index
    %140 = vector.load %arg17[%c12, %c0_74] : memref<16x128xf32, #tpu.memory_space<vmem>>, vector<2x128xf32>
    %141 = arith.select %102, %139, %140 : vector<2x128xi1>, vector<2x128xf32>
    %cst_75 = arith.constant dense<0.000000e+00> : vector<2x128xf32>
    %142 = tpu.matmul %134, %111, %cst_75 {dimension_numbers = #tpu.dot_dimension_numbers<[1], [0], [0], [1], [0, 0, 1, 1], [], []>} : vector<2x32xf32>, vector<32x128xf32>, vector<2x128xf32> -> vector<2x128xf32>
    %143 = arith.addf %141, %142 : vector<2x128xf32>
    %144 = arith.negf %143 : vector<2x128xf32>
    %145 = math.exp %144 : vector<2x128xf32>
    %cst_76 = arith.constant 1.000000e+00 : f32
    %146 = vector.broadcast %cst_76 : f32 to vector<2x128xf32>
    %147 = arith.addf %146, %145 : vector<2x128xf32>
    %148 = arith.divf %146, %147 : vector<2x128xf32>
    %149 = math.tanh %143 : vector<2x128xf32>
    %150 = arith.select %84, %148, %149 : vector<2x128xi1>, vector<2x128xf32>
    %151 = vector.extract_strided_slice %150 {offsets = [0, 0], sizes = [2, 32], strides = [1, 1]} : vector<2x128xf32> to vector<2x32xf32>
    %152 = vector.extract_strided_slice %150 {offsets = [0, 32], sizes = [2, 32], strides = [1, 1]} : vector<2x128xf32> to vector<2x32xf32>
    %153 = vector.extract_strided_slice %150 {offsets = [0, 64], sizes = [2, 32], strides = [1, 1]} : vector<2x128xf32> to vector<2x32xf32>
    %154 = vector.extract_strided_slice %150 {offsets = [0, 96], sizes = [2, 32], strides = [1, 1]} : vector<2x128xf32> to vector<2x32xf32>
    %155 = arith.mulf %152, %132 : vector<2x32xf32>
    %156 = arith.mulf %151, %154 : vector<2x32xf32>
    %157 = arith.addf %155, %156 : vector<2x32xf32>
    %158 = math.tanh %157 : vector<2x32xf32>
    %159 = arith.mulf %153, %158 : vector<2x32xf32>
    %160 = vector.extract_strided_slice %159 {offsets = [0, 0], sizes = [2, 16], strides = [1, 1]} : vector<2x32xf32> to vector<2x16xf32>
    %c2_77 = arith.constant 2 : index
    %c0_78 = arith.constant 0 : index
    %161 = vector.load %arg18[%c2_77, %c0_78] : memref<16x32xf32, #tpu.memory_space<vmem>>, vector<2x16xf32>
    tpu.vector_store %arg18[%c2_77, %c0_78], %160 {strides = array<i32>} : memref<16x32xf32, #tpu.memory_space<vmem>>, vector<2x16xf32>,
    %162 = vector.extract_strided_slice %159 {offsets = [0, 16], sizes = [2, 16], strides = [1, 1]} : vector<2x32xf32> to vector<2x16xf32>
    %c12_79 = arith.constant 12 : index
    %c16_80 = arith.constant 16 : index
    %163 = vector.load %arg18[%c12_79, %c16_80] : memref<16x32xf32, #tpu.memory_space<vmem>>, vector<2x16xf32>
    tpu.vector_store %arg18[%c12_79, %c16_80], %162 {strides = array<i32>} : memref<16x32xf32, #tpu.memory_space<vmem>>, vector<2x16xf32>,
    %c4 = arith.constant 4 : index
    %c0_81 = arith.constant 0 : index
    %164 = vector.load %arg17[%c4, %c0_81] : memref<16x128xf32, #tpu.memory_space<vmem>>, vector<2x128xf32>
    %c10 = arith.constant 10 : index
    %c0_82 = arith.constant 0 : index
    %165 = vector.load %arg17[%c10, %c0_82] : memref<16x128xf32, #tpu.memory_space<vmem>>, vector<2x128xf32>
    %166 = arith.select %102, %164, %165 : vector<2x128xi1>, vector<2x128xf32>
    %cst_83 = arith.constant dense<0.000000e+00> : vector<2x128xf32>
    %167 = tpu.matmul %159, %111, %cst_83 {dimension_numbers = #tpu.dot_dimension_numbers<[1], [0], [0], [1], [0, 0, 1, 1], [], []>} : vector<2x32xf32>, vector<32x128xf32>, vector<2x128xf32> -> vector<2x128xf32>
    %168 = arith.addf %166, %167 : vector<2x128xf32>
    %169 = arith.negf %168 : vector<2x128xf32>
    %170 = math.exp %169 : vector<2x128xf32>
    %cst_84 = arith.constant 1.000000e+00 : f32
    %171 = vector.broadcast %cst_84 : f32 to vector<2x128xf32>
    %172 = arith.addf %171, %170 : vector<2x128xf32>
    %173 = arith.divf %171, %172 : vector<2x128xf32>
    %174 = math.tanh %168 : vector<2x128xf32>
    %175 = arith.select %84, %173, %174 : vector<2x128xi1>, vector<2x128xf32>
    %176 = vector.extract_strided_slice %175 {offsets = [0, 0], sizes = [2, 32], strides = [1, 1]} : vector<2x128xf32> to vector<2x32xf32>
    %177 = vector.extract_strided_slice %175 {offsets = [0, 32], sizes = [2, 32], strides = [1, 1]} : vector<2x128xf32> to vector<2x32xf32>
    %178 = vector.extract_strided_slice %175 {offsets = [0, 64], sizes = [2, 32], strides = [1, 1]} : vector<2x128xf32> to vector<2x32xf32>
    %179 = vector.extract_strided_slice %175 {offsets = [0, 96], sizes = [2, 32], strides = [1, 1]} : vector<2x128xf32> to vector<2x32xf32>
    %180 = arith.mulf %177, %157 : vector<2x32xf32>
    %181 = arith.mulf %176, %179 : vector<2x32xf32>
    %182 = arith.addf %180, %181 : vector<2x32xf32>
    %183 = math.tanh %182 : vector<2x32xf32>
    %184 = arith.mulf %178, %183 : vector<2x32xf32>
    %185 = vector.extract_strided_slice %184 {offsets = [0, 0], sizes = [2, 16], strides = [1, 1]} : vector<2x32xf32> to vector<2x16xf32>
    %c4_85 = arith.constant 4 : index
    %c0_86 = arith.constant 0 : index
    %186 = vector.load %arg18[%c4_85, %c0_86] : memref<16x32xf32, #tpu.memory_space<vmem>>, vector<2x16xf32>
    tpu.vector_store %arg18[%c4_85, %c0_86], %185 {strides = array<i32>} : memref<16x32xf32, #tpu.memory_space<vmem>>, vector<2x16xf32>,
    %187 = vector.extract_strided_slice %184 {offsets = [0, 16], sizes = [2, 16], strides = [1, 1]} : vector<2x32xf32> to vector<2x16xf32>
    %c10_87 = arith.constant 10 : index
    %c16_88 = arith.constant 16 : index
    %188 = vector.load %arg18[%c10_87, %c16_88] : memref<16x32xf32, #tpu.memory_space<vmem>>, vector<2x16xf32>
    tpu.vector_store %arg18[%c10_87, %c16_88], %187 {strides = array<i32>} : memref<16x32xf32, #tpu.memory_space<vmem>>, vector<2x16xf32>,
    %c6 = arith.constant 6 : index
    %c0_89 = arith.constant 0 : index
    %189 = vector.load %arg17[%c6, %c0_89] : memref<16x128xf32, #tpu.memory_space<vmem>>, vector<2x128xf32>
    %c8 = arith.constant 8 : index
    %c0_90 = arith.constant 0 : index
    %190 = vector.load %arg17[%c8, %c0_90] : memref<16x128xf32, #tpu.memory_space<vmem>>, vector<2x128xf32>
    %191 = arith.select %102, %189, %190 : vector<2x128xi1>, vector<2x128xf32>
    %cst_91 = arith.constant dense<0.000000e+00> : vector<2x128xf32>
    %192 = tpu.matmul %184, %111, %cst_91 {dimension_numbers = #tpu.dot_dimension_numbers<[1], [0], [0], [1], [0, 0, 1, 1], [], []>} : vector<2x32xf32>, vector<32x128xf32>, vector<2x128xf32> -> vector<2x128xf32>
    %193 = arith.addf %191, %192 : vector<2x128xf32>
    %194 = arith.negf %193 : vector<2x128xf32>
    %195 = math.exp %194 : vector<2x128xf32>
    %cst_92 = arith.constant 1.000000e+00 : f32
    %196 = vector.broadcast %cst_92 : f32 to vector<2x128xf32>
    %197 = arith.addf %196, %195 : vector<2x128xf32>
    %198 = arith.divf %196, %197 : vector<2x128xf32>
    %199 = math.tanh %193 : vector<2x128xf32>
    %200 = arith.select %84, %198, %199 : vector<2x128xi1>, vector<2x128xf32>
    %201 = vector.extract_strided_slice %200 {offsets = [0, 0], sizes = [2, 32], strides = [1, 1]} : vector<2x128xf32> to vector<2x32xf32>
    %202 = vector.extract_strided_slice %200 {offsets = [0, 32], sizes = [2, 32], strides = [1, 1]} : vector<2x128xf32> to vector<2x32xf32>
    %203 = vector.extract_strided_slice %200 {offsets = [0, 64], sizes = [2, 32], strides = [1, 1]} : vector<2x128xf32> to vector<2x32xf32>
    %204 = vector.extract_strided_slice %200 {offsets = [0, 96], sizes = [2, 32], strides = [1, 1]} : vector<2x128xf32> to vector<2x32xf32>
    %205 = arith.mulf %202, %182 : vector<2x32xf32>
    %206 = arith.mulf %201, %204 : vector<2x32xf32>
    %207 = arith.addf %205, %206 : vector<2x32xf32>
    %208 = math.tanh %207 : vector<2x32xf32>
    %209 = arith.mulf %203, %208 : vector<2x32xf32>
    %210 = vector.extract_strided_slice %209 {offsets = [0, 0], sizes = [2, 16], strides = [1, 1]} : vector<2x32xf32> to vector<2x16xf32>
    %c6_93 = arith.constant 6 : index
    %c0_94 = arith.constant 0 : index
    %211 = vector.load %arg18[%c6_93, %c0_94] : memref<16x32xf32, #tpu.memory_space<vmem>>, vector<2x16xf32>
    tpu.vector_store %arg18[%c6_93, %c0_94], %210 {strides = array<i32>} : memref<16x32xf32, #tpu.memory_space<vmem>>, vector<2x16xf32>,
    %212 = vector.extract_strided_slice %209 {offsets = [0, 16], sizes = [2, 16], strides = [1, 1]} : vector<2x32xf32> to vector<2x16xf32>
    %c8_95 = arith.constant 8 : index
    %c16_96 = arith.constant 16 : index
    %213 = vector.load %arg18[%c8_95, %c16_96] : memref<16x32xf32, #tpu.memory_space<vmem>>, vector<2x16xf32>
    tpu.vector_store %arg18[%c8_95, %c16_96], %212 {strides = array<i32>} : memref<16x32xf32, #tpu.memory_space<vmem>>, vector<2x16xf32>,
    %c8_97 = arith.constant 8 : index
    %c0_98 = arith.constant 0 : index
    %214 = vector.load %arg17[%c8_97, %c0_98] : memref<16x128xf32, #tpu.memory_space<vmem>>, vector<2x128xf32>
    %c6_99 = arith.constant 6 : index
    %c0_100 = arith.constant 0 : index
    %215 = vector.load %arg17[%c6_99, %c0_100] : memref<16x128xf32, #tpu.memory_space<vmem>>, vector<2x128xf32>
    %216 = arith.select %102, %214, %215 : vector<2x128xi1>, vector<2x128xf32>
    %cst_101 = arith.constant dense<0.000000e+00> : vector<2x128xf32>
    %217 = tpu.matmul %209, %111, %cst_101 {dimension_numbers = #tpu.dot_dimension_numbers<[1], [0], [0], [1], [0, 0, 1, 1], [], []>} : vector<2x32xf32>, vector<32x128xf32>, vector<2x128xf32> -> vector<2x128xf32>
    %218 = arith.addf %216, %217 : vector<2x128xf32>
    %219 = arith.negf %218 : vector<2x128xf32>
    %220 = math.exp %219 : vector<2x128xf32>
    %cst_102 = arith.constant 1.000000e+00 : f32
    %221 = vector.broadcast %cst_102 : f32 to vector<2x128xf32>
    %222 = arith.addf %221, %220 : vector<2x128xf32>
    %223 = arith.divf %221, %222 : vector<2x128xf32>
    %224 = math.tanh %218 : vector<2x128xf32>
    %225 = arith.select %84, %223, %224 : vector<2x128xi1>, vector<2x128xf32>
    %226 = vector.extract_strided_slice %225 {offsets = [0, 0], sizes = [2, 32], strides = [1, 1]} : vector<2x128xf32> to vector<2x32xf32>
    %227 = vector.extract_strided_slice %225 {offsets = [0, 32], sizes = [2, 32], strides = [1, 1]} : vector<2x128xf32> to vector<2x32xf32>
    %228 = vector.extract_strided_slice %225 {offsets = [0, 64], sizes = [2, 32], strides = [1, 1]} : vector<2x128xf32> to vector<2x32xf32>
    %229 = vector.extract_strided_slice %225 {offsets = [0, 96], sizes = [2, 32], strides = [1, 1]} : vector<2x128xf32> to vector<2x32xf32>
    %230 = arith.mulf %227, %207 : vector<2x32xf32>
    %231 = arith.mulf %226, %229 : vector<2x32xf32>
    %232 = arith.addf %230, %231 : vector<2x32xf32>
    %233 = math.tanh %232 : vector<2x32xf32>
    %234 = arith.mulf %228, %233 : vector<2x32xf32>
    %235 = vector.extract_strided_slice %234 {offsets = [0, 0], sizes = [2, 16], strides = [1, 1]} : vector<2x32xf32> to vector<2x16xf32>
    %c8_103 = arith.constant 8 : index
    %c0_104 = arith.constant 0 : index
    %236 = vector.load %arg18[%c8_103, %c0_104] : memref<16x32xf32, #tpu.memory_space<vmem>>, vector<2x16xf32>
    tpu.vector_store %arg18[%c8_103, %c0_104], %235 {strides = array<i32>} : memref<16x32xf32, #tpu.memory_space<vmem>>, vector<2x16xf32>,
    %237 = vector.extract_strided_slice %234 {offsets = [0, 16], sizes = [2, 16], strides = [1, 1]} : vector<2x32xf32> to vector<2x16xf32>
    %c6_105 = arith.constant 6 : index
    %c16_106 = arith.constant 16 : index
    %238 = vector.load %arg18[%c6_105, %c16_106] : memref<16x32xf32, #tpu.memory_space<vmem>>, vector<2x16xf32>
    tpu.vector_store %arg18[%c6_105, %c16_106], %237 {strides = array<i32>} : memref<16x32xf32, #tpu.memory_space<vmem>>, vector<2x16xf32>,
    %c10_107 = arith.constant 10 : index
    %c0_108 = arith.constant 0 : index
    %239 = vector.load %arg17[%c10_107, %c0_108] : memref<16x128xf32, #tpu.memory_space<vmem>>, vector<2x128xf32>
    %c4_109 = arith.constant 4 : index
    %c0_110 = arith.constant 0 : index
    %240 = vector.load %arg17[%c4_109, %c0_110] : memref<16x128xf32, #tpu.memory_space<vmem>>, vector<2x128xf32>
    %241 = arith.select %102, %239, %240 : vector<2x128xi1>, vector<2x128xf32>
    %cst_111 = arith.constant dense<0.000000e+00> : vector<2x128xf32>
    %242 = tpu.matmul %234, %111, %cst_111 {dimension_numbers = #tpu.dot_dimension_numbers<[1], [0], [0], [1], [0, 0, 1, 1], [], []>} : vector<2x32xf32>, vector<32x128xf32>, vector<2x128xf32> -> vector<2x128xf32>
    %243 = arith.addf %241, %242 : vector<2x128xf32>
    %244 = arith.negf %243 : vector<2x128xf32>
    %245 = math.exp %244 : vector<2x128xf32>
    %cst_112 = arith.constant 1.000000e+00 : f32
    %246 = vector.broadcast %cst_112 : f32 to vector<2x128xf32>
    %247 = arith.addf %246, %245 : vector<2x128xf32>
    %248 = arith.divf %246, %247 : vector<2x128xf32>
    %249 = math.tanh %243 : vector<2x128xf32>
    %250 = arith.select %84, %248, %249 : vector<2x128xi1>, vector<2x128xf32>
    %251 = vector.extract_strided_slice %250 {offsets = [0, 0], sizes = [2, 32], strides = [1, 1]} : vector<2x128xf32> to vector<2x32xf32>
    %252 = vector.extract_strided_slice %250 {offsets = [0, 32], sizes = [2, 32], strides = [1, 1]} : vector<2x128xf32> to vector<2x32xf32>
    %253 = vector.extract_strided_slice %250 {offsets = [0, 64], sizes = [2, 32], strides = [1, 1]} : vector<2x128xf32> to vector<2x32xf32>
    %254 = vector.extract_strided_slice %250 {offsets = [0, 96], sizes = [2, 32], strides = [1, 1]} : vector<2x128xf32> to vector<2x32xf32>
    %255 = arith.mulf %252, %232 : vector<2x32xf32>
    %256 = arith.mulf %251, %254 : vector<2x32xf32>
    %257 = arith.addf %255, %256 : vector<2x32xf32>
    %258 = math.tanh %257 : vector<2x32xf32>
    %259 = arith.mulf %253, %258 : vector<2x32xf32>
    %260 = vector.extract_strided_slice %259 {offsets = [0, 0], sizes = [2, 16], strides = [1, 1]} : vector<2x32xf32> to vector<2x16xf32>
    %c10_113 = arith.constant 10 : index
    %c0_114 = arith.constant 0 : index
    %261 = vector.load %arg18[%c10_113, %c0_114] : memref<16x32xf32, #tpu.memory_space<vmem>>, vector<2x16xf32>
    tpu.vector_store %arg18[%c10_113, %c0_114], %260 {strides = array<i32>} : memref<16x32xf32, #tpu.memory_space<vmem>>, vector<2x16xf32>,
    %262 = vector.extract_strided_slice %259 {offsets = [0, 16], sizes = [2, 16], strides = [1, 1]} : vector<2x32xf32> to vector<2x16xf32>
    %c4_115 = arith.constant 4 : index
    %c16_116 = arith.constant 16 : index
    %263 = vector.load %arg18[%c4_115, %c16_116] : memref<16x32xf32, #tpu.memory_space<vmem>>, vector<2x16xf32>
    tpu.vector_store %arg18[%c4_115, %c16_116], %262 {strides = array<i32>} : memref<16x32xf32, #tpu.memory_space<vmem>>, vector<2x16xf32>,
    %c12_117 = arith.constant 12 : index
    %c0_118 = arith.constant 0 : index
    %264 = vector.load %arg17[%c12_117, %c0_118] : memref<16x128xf32, #tpu.memory_space<vmem>>, vector<2x128xf32>
    %c2_119 = arith.constant 2 : index
    %c0_120 = arith.constant 0 : index
    %265 = vector.load %arg17[%c2_119, %c0_120] : memref<16x128xf32, #tpu.memory_space<vmem>>, vector<2x128xf32>
    %266 = arith.select %102, %264, %265 : vector<2x128xi1>, vector<2x128xf32>
    %cst_121 = arith.constant dense<0.000000e+00> : vector<2x128xf32>
    %267 = tpu.matmul %259, %111, %cst_121 {dimension_numbers = #tpu.dot_dimension_numbers<[1], [0], [0], [1], [0, 0, 1, 1], [], []>} : vector<2x32xf32>, vector<32x128xf32>, vector<2x128xf32> -> vector<2x128xf32>
    %268 = arith.addf %266, %267 : vector<2x128xf32>
    %269 = arith.negf %268 : vector<2x128xf32>
    %270 = math.exp %269 : vector<2x128xf32>
    %cst_122 = arith.constant 1.000000e+00 : f32
    %271 = vector.broadcast %cst_122 : f32 to vector<2x128xf32>
    %272 = arith.addf %271, %270 : vector<2x128xf32>
    %273 = arith.divf %271, %272 : vector<2x128xf32>
    %274 = math.tanh %268 : vector<2x128xf32>
    %275 = arith.select %84, %273, %274 : vector<2x128xi1>, vector<2x128xf32>
    %276 = vector.extract_strided_slice %275 {offsets = [0, 0], sizes = [2, 32], strides = [1, 1]} : vector<2x128xf32> to vector<2x32xf32>
    %277 = vector.extract_strided_slice %275 {offsets = [0, 32], sizes = [2, 32], strides = [1, 1]} : vector<2x128xf32> to vector<2x32xf32>
    %278 = vector.extract_strided_slice %275 {offsets = [0, 64], sizes = [2, 32], strides = [1, 1]} : vector<2x128xf32> to vector<2x32xf32>
    %279 = vector.extract_strided_slice %275 {offsets = [0, 96], sizes = [2, 32], strides = [1, 1]} : vector<2x128xf32> to vector<2x32xf32>
    %280 = arith.mulf %277, %257 : vector<2x32xf32>
    %281 = arith.mulf %276, %279 : vector<2x32xf32>
    %282 = arith.addf %280, %281 : vector<2x32xf32>
    %283 = math.tanh %282 : vector<2x32xf32>
    %284 = arith.mulf %278, %283 : vector<2x32xf32>
    %285 = vector.extract_strided_slice %284 {offsets = [0, 0], sizes = [2, 16], strides = [1, 1]} : vector<2x32xf32> to vector<2x16xf32>
    %c12_123 = arith.constant 12 : index
    %c0_124 = arith.constant 0 : index
    %286 = vector.load %arg18[%c12_123, %c0_124] : memref<16x32xf32, #tpu.memory_space<vmem>>, vector<2x16xf32>
    tpu.vector_store %arg18[%c12_123, %c0_124], %285 {strides = array<i32>} : memref<16x32xf32, #tpu.memory_space<vmem>>, vector<2x16xf32>,
    %287 = vector.extract_strided_slice %284 {offsets = [0, 16], sizes = [2, 16], strides = [1, 1]} : vector<2x32xf32> to vector<2x16xf32>
    %c2_125 = arith.constant 2 : index
    %c16_126 = arith.constant 16 : index
    %288 = vector.load %arg18[%c2_125, %c16_126] : memref<16x32xf32, #tpu.memory_space<vmem>>, vector<2x16xf32>
    tpu.vector_store %arg18[%c2_125, %c16_126], %287 {strides = array<i32>} : memref<16x32xf32, #tpu.memory_space<vmem>>, vector<2x16xf32>,
    %c14_127 = arith.constant 14 : index
    %c0_128 = arith.constant 0 : index
    %289 = vector.load %arg17[%c14_127, %c0_128] : memref<16x128xf32, #tpu.memory_space<vmem>>, vector<2x128xf32>
    %c0_129 = arith.constant 0 : index
    %c0_130 = arith.constant 0 : index
    %290 = vector.load %arg17[%c0_129, %c0_130] : memref<16x128xf32, #tpu.memory_space<vmem>>, vector<2x128xf32>
    %291 = arith.select %102, %289, %290 : vector<2x128xi1>, vector<2x128xf32>
    %cst_131 = arith.constant dense<0.000000e+00> : vector<2x128xf32>
    %292 = tpu.matmul %284, %111, %cst_131 {dimension_numbers = #tpu.dot_dimension_numbers<[1], [0], [0], [1], [0, 0, 1, 1], [], []>} : vector<2x32xf32>, vector<32x128xf32>, vector<2x128xf32> -> vector<2x128xf32>
    %293 = arith.addf %291, %292 : vector<2x128xf32>
    %294 = arith.negf %293 : vector<2x128xf32>
    %295 = math.exp %294 : vector<2x128xf32>
    %cst_132 = arith.constant 1.000000e+00 : f32
    %296 = vector.broadcast %cst_132 : f32 to vector<2x128xf32>
    %297 = arith.addf %296, %295 : vector<2x128xf32>
    %298 = arith.divf %296, %297 : vector<2x128xf32>
    %299 = math.tanh %293 : vector<2x128xf32>
    %300 = arith.select %84, %298, %299 : vector<2x128xi1>, vector<2x128xf32>
    %301 = vector.extract_strided_slice %300 {offsets = [0, 0], sizes = [2, 32], strides = [1, 1]} : vector<2x128xf32> to vector<2x32xf32>
    %302 = vector.extract_strided_slice %300 {offsets = [0, 32], sizes = [2, 32], strides = [1, 1]} : vector<2x128xf32> to vector<2x32xf32>
    %303 = vector.extract_strided_slice %300 {offsets = [0, 64], sizes = [2, 32], strides = [1, 1]} : vector<2x128xf32> to vector<2x32xf32>
    %304 = vector.extract_strided_slice %300 {offsets = [0, 96], sizes = [2, 32], strides = [1, 1]} : vector<2x128xf32> to vector<2x32xf32>
    %305 = arith.mulf %302, %282 : vector<2x32xf32>
    %306 = arith.mulf %301, %304 : vector<2x32xf32>
    %307 = arith.addf %305, %306 : vector<2x32xf32>
    %308 = math.tanh %307 : vector<2x32xf32>
    %309 = arith.mulf %303, %308 : vector<2x32xf32>
    %310 = vector.extract_strided_slice %309 {offsets = [0, 0], sizes = [2, 16], strides = [1, 1]} : vector<2x32xf32> to vector<2x16xf32>
    %c14_133 = arith.constant 14 : index
    %c0_134 = arith.constant 0 : index
    %311 = vector.load %arg18[%c14_133, %c0_134] : memref<16x32xf32, #tpu.memory_space<vmem>>, vector<2x16xf32>
    tpu.vector_store %arg18[%c14_133, %c0_134], %310 {strides = array<i32>} : memref<16x32xf32, #tpu.memory_space<vmem>>, vector<2x16xf32>,
    %312 = vector.extract_strided_slice %309 {offsets = [0, 16], sizes = [2, 16], strides = [1, 1]} : vector<2x32xf32> to vector<2x16xf32>
    %c0_135 = arith.constant 0 : index
    %c16_136 = arith.constant 16 : index
    %313 = vector.load %arg18[%c0_135, %c16_136] : memref<16x32xf32, #tpu.memory_space<vmem>>, vector<2x16xf32>
    tpu.vector_store %arg18[%c0_135, %c16_136], %312 {strides = array<i32>} : memref<16x32xf32, #tpu.memory_space<vmem>>, vector<2x16xf32>,
    %c0_137 = arith.constant 0 : index
    %c0_138 = arith.constant 0 : index
    %314 = vector.load %arg18[%c0_137, %c0_138] : memref<16x32xf32, #tpu.memory_space<vmem>>, vector<16x32xf32>
    %c0_139 = arith.constant 0 : index
    %c0_140 = arith.constant 0 : index
    %315 = vector.load %arg11[%c0_139, %c0_140] : memref<32x128xf32, #tpu.memory_space<vmem>>, vector<32x128xf32>
    %cst_141 = arith.constant dense<0.000000e+00> : vector<16x128xf32>
    %316 = tpu.matmul %314, %315, %cst_141 {dimension_numbers = #tpu.dot_dimension_numbers<[1], [0], [0], [1], [0, 0, 1, 1], [], []>} : vector<16x32xf32>, vector<32x128xf32>, vector<16x128xf32> -> vector<16x128xf32>
    %c1_142 = arith.constant 1 : index
    %c0_143 = arith.constant 0 : index
    %c0_144 = arith.constant 0 : index
    %317 = vector.load %arg13[%c1_142, %c0_143, %c0_144] : memref<2x1x128xf32, #tpu.memory_space<vmem>>, vector<1x1x128xf32>
    %318 = vector.shape_cast %317 : vector<1x1x128xf32> to vector<1x128xf32>
    %319 = vector.broadcast %318 : vector<1x128xf32> to vector<16x128xf32>
    %320 = arith.addf %316, %319 : vector<16x128xf32>
    %c0_145 = arith.constant 0 : index
    %c0_146 = arith.constant 0 : index
    %321 = vector.load %arg17[%c0_145, %c0_146] : memref<16x128xf32, #tpu.memory_space<vmem>>, vector<16x128xf32>
    tpu.vector_store %arg17[%c0_145, %c0_146], %320 {strides = array<i32>} : memref<16x128xf32, #tpu.memory_space<vmem>>, vector<16x128xf32>,
    %c1_147 = arith.constant 1 : index
    %c0_148 = arith.constant 0 : index
    %c0_149 = arith.constant 0 : index
    %322 = vector.load %arg12[%c1_147, %c0_148, %c0_149] : memref<2x32x128xf32, #tpu.memory_space<vmem>>, vector<1x32x128xf32>
    %323 = vector.shape_cast %322 : vector<1x32x128xf32> to vector<32x128xf32>
    %cst_150 = arith.constant 0.000000e+00 : f32
    %324 = vector.broadcast %cst_150 : f32 to vector<2x32xf32>
    %cst_151 = arith.constant 0.000000e+00 : f32
    %325 = vector.broadcast %cst_151 : f32 to vector<2x32xf32>
    %c0_152 = arith.constant 0 : index
    %c0_153 = arith.constant 0 : index
    %326 = vector.load %arg17[%c0_152, %c0_153] : memref<16x128xf32, #tpu.memory_space<vmem>>, vector<2x128xf32>
    %c14_154 = arith.constant 14 : index
    %c0_155 = arith.constant 0 : index
    %327 = vector.load %arg17[%c14_154, %c0_155] : memref<16x128xf32, #tpu.memory_space<vmem>>, vector<2x128xf32>
    %328 = arith.select %102, %326, %327 : vector<2x128xi1>, vector<2x128xf32>
    %cst_156 = arith.constant dense<0.000000e+00> : vector<2x128xf32>
    %329 = tpu.matmul %324, %323, %cst_156 {dimension_numbers = #tpu.dot_dimension_numbers<[1], [0], [0], [1], [0, 0, 1, 1], [], []>} : vector<2x32xf32>, vector<32x128xf32>, vector<2x128xf32> -> vector<2x128xf32>
    %330 = arith.addf %328, %329 : vector<2x128xf32>
    %331 = arith.negf %330 : vector<2x128xf32>
    %332 = math.exp %331 : vector<2x128xf32>
    %cst_157 = arith.constant 1.000000e+00 : f32
    %333 = vector.broadcast %cst_157 : f32 to vector<2x128xf32>
    %334 = arith.addf %333, %332 : vector<2x128xf32>
    %335 = arith.divf %333, %334 : vector<2x128xf32>
    %336 = math.tanh %330 : vector<2x128xf32>
    %337 = arith.select %84, %335, %336 : vector<2x128xi1>, vector<2x128xf32>
    %338 = vector.extract_strided_slice %337 {offsets = [0, 0], sizes = [2, 32], strides = [1, 1]} : vector<2x128xf32> to vector<2x32xf32>
    %339 = vector.extract_strided_slice %337 {offsets = [0, 32], sizes = [2, 32], strides = [1, 1]} : vector<2x128xf32> to vector<2x32xf32>
    %340 = vector.extract_strided_slice %337 {offsets = [0, 64], sizes = [2, 32], strides = [1, 1]} : vector<2x128xf32> to vector<2x32xf32>
    %341 = vector.extract_strided_slice %337 {offsets = [0, 96], sizes = [2, 32], strides = [1, 1]} : vector<2x128xf32> to vector<2x32xf32>
    %342 = arith.mulf %339, %325 : vector<2x32xf32>
    %343 = arith.mulf %338, %341 : vector<2x32xf32>
    %344 = arith.addf %342, %343 : vector<2x32xf32>
    %345 = math.tanh %344 : vector<2x32xf32>
    %346 = arith.mulf %340, %345 : vector<2x32xf32>
    %347 = vector.extract_strided_slice %346 {offsets = [0, 0], sizes = [2, 16], strides = [1, 1]} : vector<2x32xf32> to vector<2x16xf32>
    %c0_158 = arith.constant 0 : index
    %c0_159 = arith.constant 0 : index
    %348 = vector.load %arg18[%c0_158, %c0_159] : memref<16x32xf32, #tpu.memory_space<vmem>>, vector<2x16xf32>
    %349 = arith.addf %347, %348 : vector<2x16xf32>
    %c0_160 = arith.constant 0 : index
    %c0_161 = arith.constant 0 : index
    %350 = vector.load %arg19[%c0_160, %c0_161] : memref<16x32xf32, #tpu.memory_space<vmem>>, vector<2x16xf32>
    tpu.vector_store %arg19[%c0_160, %c0_161], %349 {strides = array<i32>} : memref<16x32xf32, #tpu.memory_space<vmem>>, vector<2x16xf32>,
    %351 = vector.extract_strided_slice %346 {offsets = [0, 16], sizes = [2, 16], strides = [1, 1]} : vector<2x32xf32> to vector<2x16xf32>
    %c14_162 = arith.constant 14 : index
    %c16_163 = arith.constant 16 : index
    %352 = vector.load %arg18[%c14_162, %c16_163] : memref<16x32xf32, #tpu.memory_space<vmem>>, vector<2x16xf32>
    %353 = arith.addf %351, %352 : vector<2x16xf32>
    %c14_164 = arith.constant 14 : index
    %c16_165 = arith.constant 16 : index
    %354 = vector.load %arg19[%c14_164, %c16_165] : memref<16x32xf32, #tpu.memory_space<vmem>>, vector<2x16xf32>
    tpu.vector_store %arg19[%c14_164, %c16_165], %353 {strides = array<i32>} : memref<16x32xf32, #tpu.memory_space<vmem>>, vector<2x16xf32>,
    %c2_166 = arith.constant 2 : index
    %c0_167 = arith.constant 0 : index
    %355 = vector.load %arg17[%c2_166, %c0_167] : memref<16x128xf32, #tpu.memory_space<vmem>>, vector<2x128xf32>
    %c12_168 = arith.constant 12 : index
    %c0_169 = arith.constant 0 : index
    %356 = vector.load %arg17[%c12_168, %c0_169] : memref<16x128xf32, #tpu.memory_space<vmem>>, vector<2x128xf32>
    %357 = arith.select %102, %355, %356 : vector<2x128xi1>, vector<2x128xf32>
    %cst_170 = arith.constant dense<0.000000e+00> : vector<2x128xf32>
    %358 = tpu.matmul %346, %323, %cst_170 {dimension_numbers = #tpu.dot_dimension_numbers<[1], [0], [0], [1], [0, 0, 1, 1], [], []>} : vector<2x32xf32>, vector<32x128xf32>, vector<2x128xf32> -> vector<2x128xf32>
    %359 = arith.addf %357, %358 : vector<2x128xf32>
    %360 = arith.negf %359 : vector<2x128xf32>
    %361 = math.exp %360 : vector<2x128xf32>
    %cst_171 = arith.constant 1.000000e+00 : f32
    %362 = vector.broadcast %cst_171 : f32 to vector<2x128xf32>
    %363 = arith.addf %362, %361 : vector<2x128xf32>
    %364 = arith.divf %362, %363 : vector<2x128xf32>
    %365 = math.tanh %359 : vector<2x128xf32>
    %366 = arith.select %84, %364, %365 : vector<2x128xi1>, vector<2x128xf32>
    %367 = vector.extract_strided_slice %366 {offsets = [0, 0], sizes = [2, 32], strides = [1, 1]} : vector<2x128xf32> to vector<2x32xf32>
    %368 = vector.extract_strided_slice %366 {offsets = [0, 32], sizes = [2, 32], strides = [1, 1]} : vector<2x128xf32> to vector<2x32xf32>
    %369 = vector.extract_strided_slice %366 {offsets = [0, 64], sizes = [2, 32], strides = [1, 1]} : vector<2x128xf32> to vector<2x32xf32>
    %370 = vector.extract_strided_slice %366 {offsets = [0, 96], sizes = [2, 32], strides = [1, 1]} : vector<2x128xf32> to vector<2x32xf32>
    %371 = arith.mulf %368, %344 : vector<2x32xf32>
    %372 = arith.mulf %367, %370 : vector<2x32xf32>
    %373 = arith.addf %371, %372 : vector<2x32xf32>
    %374 = math.tanh %373 : vector<2x32xf32>
    %375 = arith.mulf %369, %374 : vector<2x32xf32>
    %376 = vector.extract_strided_slice %375 {offsets = [0, 0], sizes = [2, 16], strides = [1, 1]} : vector<2x32xf32> to vector<2x16xf32>
    %c2_172 = arith.constant 2 : index
    %c0_173 = arith.constant 0 : index
    %377 = vector.load %arg18[%c2_172, %c0_173] : memref<16x32xf32, #tpu.memory_space<vmem>>, vector<2x16xf32>
    %378 = arith.addf %376, %377 : vector<2x16xf32>
    %c2_174 = arith.constant 2 : index
    %c0_175 = arith.constant 0 : index
    %379 = vector.load %arg19[%c2_174, %c0_175] : memref<16x32xf32, #tpu.memory_space<vmem>>, vector<2x16xf32>
    tpu.vector_store %arg19[%c2_174, %c0_175], %378 {strides = array<i32>} : memref<16x32xf32, #tpu.memory_space<vmem>>, vector<2x16xf32>,
    %380 = vector.extract_strided_slice %375 {offsets = [0, 16], sizes = [2, 16], strides = [1, 1]} : vector<2x32xf32> to vector<2x16xf32>
    %c12_176 = arith.constant 12 : index
    %c16_177 = arith.constant 16 : index
    %381 = vector.load %arg18[%c12_176, %c16_177] : memref<16x32xf32, #tpu.memory_space<vmem>>, vector<2x16xf32>
    %382 = arith.addf %380, %381 : vector<2x16xf32>
    %c12_178 = arith.constant 12 : index
    %c16_179 = arith.constant 16 : index
    %383 = vector.load %arg19[%c12_178, %c16_179] : memref<16x32xf32, #tpu.memory_space<vmem>>, vector<2x16xf32>
    tpu.vector_store %arg19[%c12_178, %c16_179], %382 {strides = array<i32>} : memref<16x32xf32, #tpu.memory_space<vmem>>, vector<2x16xf32>,
    %c4_180 = arith.constant 4 : index
    %c0_181 = arith.constant 0 : index
    %384 = vector.load %arg17[%c4_180, %c0_181] : memref<16x128xf32, #tpu.memory_space<vmem>>, vector<2x128xf32>
    %c10_182 = arith.constant 10 : index
    %c0_183 = arith.constant 0 : index
    %385 = vector.load %arg17[%c10_182, %c0_183] : memref<16x128xf32, #tpu.memory_space<vmem>>, vector<2x128xf32>
    %386 = arith.select %102, %384, %385 : vector<2x128xi1>, vector<2x128xf32>
    %cst_184 = arith.constant dense<0.000000e+00> : vector<2x128xf32>
    %387 = tpu.matmul %375, %323, %cst_184 {dimension_numbers = #tpu.dot_dimension_numbers<[1], [0], [0], [1], [0, 0, 1, 1], [], []>} : vector<2x32xf32>, vector<32x128xf32>, vector<2x128xf32> -> vector<2x128xf32>
    %388 = arith.addf %386, %387 : vector<2x128xf32>
    %389 = arith.negf %388 : vector<2x128xf32>
    %390 = math.exp %389 : vector<2x128xf32>
    %cst_185 = arith.constant 1.000000e+00 : f32
    %391 = vector.broadcast %cst_185 : f32 to vector<2x128xf32>
    %392 = arith.addf %391, %390 : vector<2x128xf32>
    %393 = arith.divf %391, %392 : vector<2x128xf32>
    %394 = math.tanh %388 : vector<2x128xf32>
    %395 = arith.select %84, %393, %394 : vector<2x128xi1>, vector<2x128xf32>
    %396 = vector.extract_strided_slice %395 {offsets = [0, 0], sizes = [2, 32], strides = [1, 1]} : vector<2x128xf32> to vector<2x32xf32>
    %397 = vector.extract_strided_slice %395 {offsets = [0, 32], sizes = [2, 32], strides = [1, 1]} : vector<2x128xf32> to vector<2x32xf32>
    %398 = vector.extract_strided_slice %395 {offsets = [0, 64], sizes = [2, 32], strides = [1, 1]} : vector<2x128xf32> to vector<2x32xf32>
    %399 = vector.extract_strided_slice %395 {offsets = [0, 96], sizes = [2, 32], strides = [1, 1]} : vector<2x128xf32> to vector<2x32xf32>
    %400 = arith.mulf %397, %373 : vector<2x32xf32>
    %401 = arith.mulf %396, %399 : vector<2x32xf32>
    %402 = arith.addf %400, %401 : vector<2x32xf32>
    %403 = math.tanh %402 : vector<2x32xf32>
    %404 = arith.mulf %398, %403 : vector<2x32xf32>
    %405 = vector.extract_strided_slice %404 {offsets = [0, 0], sizes = [2, 16], strides = [1, 1]} : vector<2x32xf32> to vector<2x16xf32>
    %c4_186 = arith.constant 4 : index
    %c0_187 = arith.constant 0 : index
    %406 = vector.load %arg18[%c4_186, %c0_187] : memref<16x32xf32, #tpu.memory_space<vmem>>, vector<2x16xf32>
    %407 = arith.addf %405, %406 : vector<2x16xf32>
    %c4_188 = arith.constant 4 : index
    %c0_189 = arith.constant 0 : index
    %408 = vector.load %arg19[%c4_188, %c0_189] : memref<16x32xf32, #tpu.memory_space<vmem>>, vector<2x16xf32>
    tpu.vector_store %arg19[%c4_188, %c0_189], %407 {strides = array<i32>} : memref<16x32xf32, #tpu.memory_space<vmem>>, vector<2x16xf32>,
    %409 = vector.extract_strided_slice %404 {offsets = [0, 16], sizes = [2, 16], strides = [1, 1]} : vector<2x32xf32> to vector<2x16xf32>
    %c10_190 = arith.constant 10 : index
    %c16_191 = arith.constant 16 : index
    %410 = vector.load %arg18[%c10_190, %c16_191] : memref<16x32xf32, #tpu.memory_space<vmem>>, vector<2x16xf32>
    %411 = arith.addf %409, %410 : vector<2x16xf32>
    %c10_192 = arith.constant 10 : index
    %c16_193 = arith.constant 16 : index
    %412 = vector.load %arg19[%c10_192, %c16_193] : memref<16x32xf32, #tpu.memory_space<vmem>>, vector<2x16xf32>
    tpu.vector_store %arg19[%c10_192, %c16_193], %411 {strides = array<i32>} : memref<16x32xf32, #tpu.memory_space<vmem>>, vector<2x16xf32>,
    %c6_194 = arith.constant 6 : index
    %c0_195 = arith.constant 0 : index
    %413 = vector.load %arg17[%c6_194, %c0_195] : memref<16x128xf32, #tpu.memory_space<vmem>>, vector<2x128xf32>
    %c8_196 = arith.constant 8 : index
    %c0_197 = arith.constant 0 : index
    %414 = vector.load %arg17[%c8_196, %c0_197] : memref<16x128xf32, #tpu.memory_space<vmem>>, vector<2x128xf32>
    %415 = arith.select %102, %413, %414 : vector<2x128xi1>, vector<2x128xf32>
    %cst_198 = arith.constant dense<0.000000e+00> : vector<2x128xf32>
    %416 = tpu.matmul %404, %323, %cst_198 {dimension_numbers = #tpu.dot_dimension_numbers<[1], [0], [0], [1], [0, 0, 1, 1], [], []>} : vector<2x32xf32>, vector<32x128xf32>, vector<2x128xf32> -> vector<2x128xf32>
    %417 = arith.addf %415, %416 : vector<2x128xf32>
    %418 = arith.negf %417 : vector<2x128xf32>
    %419 = math.exp %418 : vector<2x128xf32>
    %cst_199 = arith.constant 1.000000e+00 : f32
    %420 = vector.broadcast %cst_199 : f32 to vector<2x128xf32>
    %421 = arith.addf %420, %419 : vector<2x128xf32>
    %422 = arith.divf %420, %421 : vector<2x128xf32>
    %423 = math.tanh %417 : vector<2x128xf32>
    %424 = arith.select %84, %422, %423 : vector<2x128xi1>, vector<2x128xf32>
    %425 = vector.extract_strided_slice %424 {offsets = [0, 0], sizes = [2, 32], strides = [1, 1]} : vector<2x128xf32> to vector<2x32xf32>
    %426 = vector.extract_strided_slice %424 {offsets = [0, 32], sizes = [2, 32], strides = [1, 1]} : vector<2x128xf32> to vector<2x32xf32>
    %427 = vector.extract_strided_slice %424 {offsets = [0, 64], sizes = [2, 32], strides = [1, 1]} : vector<2x128xf32> to vector<2x32xf32>
    %428 = vector.extract_strided_slice %424 {offsets = [0, 96], sizes = [2, 32], strides = [1, 1]} : vector<2x128xf32> to vector<2x32xf32>
    %429 = arith.mulf %426, %402 : vector<2x32xf32>
    %430 = arith.mulf %425, %428 : vector<2x32xf32>
    %431 = arith.addf %429, %430 : vector<2x32xf32>
    %432 = math.tanh %431 : vector<2x32xf32>
    %433 = arith.mulf %427, %432 : vector<2x32xf32>
    %434 = vector.extract_strided_slice %433 {offsets = [0, 0], sizes = [2, 16], strides = [1, 1]} : vector<2x32xf32> to vector<2x16xf32>
    %c6_200 = arith.constant 6 : index
    %c0_201 = arith.constant 0 : index
    %435 = vector.load %arg18[%c6_200, %c0_201] : memref<16x32xf32, #tpu.memory_space<vmem>>, vector<2x16xf32>
    %436 = arith.addf %434, %435 : vector<2x16xf32>
    %c6_202 = arith.constant 6 : index
    %c0_203 = arith.constant 0 : index
    %437 = vector.load %arg19[%c6_202, %c0_203] : memref<16x32xf32, #tpu.memory_space<vmem>>, vector<2x16xf32>
    tpu.vector_store %arg19[%c6_202, %c0_203], %436 {strides = array<i32>} : memref<16x32xf32, #tpu.memory_space<vmem>>, vector<2x16xf32>,
    %438 = vector.extract_strided_slice %433 {offsets = [0, 16], sizes = [2, 16], strides = [1, 1]} : vector<2x32xf32> to vector<2x16xf32>
    %c8_204 = arith.constant 8 : index
    %c16_205 = arith.constant 16 : index
    %439 = vector.load %arg18[%c8_204, %c16_205] : memref<16x32xf32, #tpu.memory_space<vmem>>, vector<2x16xf32>
    %440 = arith.addf %438, %439 : vector<2x16xf32>
    %c8_206 = arith.constant 8 : index
    %c16_207 = arith.constant 16 : index
    %441 = vector.load %arg19[%c8_206, %c16_207] : memref<16x32xf32, #tpu.memory_space<vmem>>, vector<2x16xf32>
    tpu.vector_store %arg19[%c8_206, %c16_207], %440 {strides = array<i32>} : memref<16x32xf32, #tpu.memory_space<vmem>>, vector<2x16xf32>,
    %c8_208 = arith.constant 8 : index
    %c0_209 = arith.constant 0 : index
    %442 = vector.load %arg17[%c8_208, %c0_209] : memref<16x128xf32, #tpu.memory_space<vmem>>, vector<2x128xf32>
    %c6_210 = arith.constant 6 : index
    %c0_211 = arith.constant 0 : index
    %443 = vector.load %arg17[%c6_210, %c0_211] : memref<16x128xf32, #tpu.memory_space<vmem>>, vector<2x128xf32>
    %444 = arith.select %102, %442, %443 : vector<2x128xi1>, vector<2x128xf32>
    %cst_212 = arith.constant dense<0.000000e+00> : vector<2x128xf32>
    %445 = tpu.matmul %433, %323, %cst_212 {dimension_numbers = #tpu.dot_dimension_numbers<[1], [0], [0], [1], [0, 0, 1, 1], [], []>} : vector<2x32xf32>, vector<32x128xf32>, vector<2x128xf32> -> vector<2x128xf32>
    %446 = arith.addf %444, %445 : vector<2x128xf32>
    %447 = arith.negf %446 : vector<2x128xf32>
    %448 = math.exp %447 : vector<2x128xf32>
    %cst_213 = arith.constant 1.000000e+00 : f32
    %449 = vector.broadcast %cst_213 : f32 to vector<2x128xf32>
    %450 = arith.addf %449, %448 : vector<2x128xf32>
    %451 = arith.divf %449, %450 : vector<2x128xf32>
    %452 = math.tanh %446 : vector<2x128xf32>
    %453 = arith.select %84, %451, %452 : vector<2x128xi1>, vector<2x128xf32>
    %454 = vector.extract_strided_slice %453 {offsets = [0, 0], sizes = [2, 32], strides = [1, 1]} : vector<2x128xf32> to vector<2x32xf32>
    %455 = vector.extract_strided_slice %453 {offsets = [0, 32], sizes = [2, 32], strides = [1, 1]} : vector<2x128xf32> to vector<2x32xf32>
    %456 = vector.extract_strided_slice %453 {offsets = [0, 64], sizes = [2, 32], strides = [1, 1]} : vector<2x128xf32> to vector<2x32xf32>
    %457 = vector.extract_strided_slice %453 {offsets = [0, 96], sizes = [2, 32], strides = [1, 1]} : vector<2x128xf32> to vector<2x32xf32>
    %458 = arith.mulf %455, %431 : vector<2x32xf32>
    %459 = arith.mulf %454, %457 : vector<2x32xf32>
    %460 = arith.addf %458, %459 : vector<2x32xf32>
    %461 = math.tanh %460 : vector<2x32xf32>
    %462 = arith.mulf %456, %461 : vector<2x32xf32>
    %463 = vector.extract_strided_slice %462 {offsets = [0, 0], sizes = [2, 16], strides = [1, 1]} : vector<2x32xf32> to vector<2x16xf32>
    %c8_214 = arith.constant 8 : index
    %c0_215 = arith.constant 0 : index
    %464 = vector.load %arg18[%c8_214, %c0_215] : memref<16x32xf32, #tpu.memory_space<vmem>>, vector<2x16xf32>
    %465 = arith.addf %463, %464 : vector<2x16xf32>
    %c8_216 = arith.constant 8 : index
    %c0_217 = arith.constant 0 : index
    %466 = vector.load %arg19[%c8_216, %c0_217] : memref<16x32xf32, #tpu.memory_space<vmem>>, vector<2x16xf32>
    tpu.vector_store %arg19[%c8_216, %c0_217], %465 {strides = array<i32>} : memref<16x32xf32, #tpu.memory_space<vmem>>, vector<2x16xf32>,
    %467 = vector.extract_strided_slice %462 {offsets = [0, 16], sizes = [2, 16], strides = [1, 1]} : vector<2x32xf32> to vector<2x16xf32>
    %c6_218 = arith.constant 6 : index
    %c16_219 = arith.constant 16 : index
    %468 = vector.load %arg18[%c6_218, %c16_219] : memref<16x32xf32, #tpu.memory_space<vmem>>, vector<2x16xf32>
    %469 = arith.addf %467, %468 : vector<2x16xf32>
    %c6_220 = arith.constant 6 : index
    %c16_221 = arith.constant 16 : index
    %470 = vector.load %arg19[%c6_220, %c16_221] : memref<16x32xf32, #tpu.memory_space<vmem>>, vector<2x16xf32>
    tpu.vector_store %arg19[%c6_220, %c16_221], %469 {strides = array<i32>} : memref<16x32xf32, #tpu.memory_space<vmem>>, vector<2x16xf32>,
    %c10_222 = arith.constant 10 : index
    %c0_223 = arith.constant 0 : index
    %471 = vector.load %arg17[%c10_222, %c0_223] : memref<16x128xf32, #tpu.memory_space<vmem>>, vector<2x128xf32>
    %c4_224 = arith.constant 4 : index
    %c0_225 = arith.constant 0 : index
    %472 = vector.load %arg17[%c4_224, %c0_225] : memref<16x128xf32, #tpu.memory_space<vmem>>, vector<2x128xf32>
    %473 = arith.select %102, %471, %472 : vector<2x128xi1>, vector<2x128xf32>
    %cst_226 = arith.constant dense<0.000000e+00> : vector<2x128xf32>
    %474 = tpu.matmul %462, %323, %cst_226 {dimension_numbers = #tpu.dot_dimension_numbers<[1], [0], [0], [1], [0, 0, 1, 1], [], []>} : vector<2x32xf32>, vector<32x128xf32>, vector<2x128xf32> -> vector<2x128xf32>
    %475 = arith.addf %473, %474 : vector<2x128xf32>
    %476 = arith.negf %475 : vector<2x128xf32>
    %477 = math.exp %476 : vector<2x128xf32>
    %cst_227 = arith.constant 1.000000e+00 : f32
    %478 = vector.broadcast %cst_227 : f32 to vector<2x128xf32>
    %479 = arith.addf %478, %477 : vector<2x128xf32>
    %480 = arith.divf %478, %479 : vector<2x128xf32>
    %481 = math.tanh %475 : vector<2x128xf32>
    %482 = arith.select %84, %480, %481 : vector<2x128xi1>, vector<2x128xf32>
    %483 = vector.extract_strided_slice %482 {offsets = [0, 0], sizes = [2, 32], strides = [1, 1]} : vector<2x128xf32> to vector<2x32xf32>
    %484 = vector.extract_strided_slice %482 {offsets = [0, 32], sizes = [2, 32], strides = [1, 1]} : vector<2x128xf32> to vector<2x32xf32>
    %485 = vector.extract_strided_slice %482 {offsets = [0, 64], sizes = [2, 32], strides = [1, 1]} : vector<2x128xf32> to vector<2x32xf32>
    %486 = vector.extract_strided_slice %482 {offsets = [0, 96], sizes = [2, 32], strides = [1, 1]} : vector<2x128xf32> to vector<2x32xf32>
    %487 = arith.mulf %484, %460 : vector<2x32xf32>
    %488 = arith.mulf %483, %486 : vector<2x32xf32>
    %489 = arith.addf %487, %488 : vector<2x32xf32>
    %490 = math.tanh %489 : vector<2x32xf32>
    %491 = arith.mulf %485, %490 : vector<2x32xf32>
    %492 = vector.extract_strided_slice %491 {offsets = [0, 0], sizes = [2, 16], strides = [1, 1]} : vector<2x32xf32> to vector<2x16xf32>
    %c10_228 = arith.constant 10 : index
    %c0_229 = arith.constant 0 : index
    %493 = vector.load %arg18[%c10_228, %c0_229] : memref<16x32xf32, #tpu.memory_space<vmem>>, vector<2x16xf32>
    %494 = arith.addf %492, %493 : vector<2x16xf32>
    %c10_230 = arith.constant 10 : index
    %c0_231 = arith.constant 0 : index
    %495 = vector.load %arg19[%c10_230, %c0_231] : memref<16x32xf32, #tpu.memory_space<vmem>>, vector<2x16xf32>
    tpu.vector_store %arg19[%c10_230, %c0_231], %494 {strides = array<i32>} : memref<16x32xf32, #tpu.memory_space<vmem>>, vector<2x16xf32>,
    %496 = vector.extract_strided_slice %491 {offsets = [0, 16], sizes = [2, 16], strides = [1, 1]} : vector<2x32xf32> to vector<2x16xf32>
    %c4_232 = arith.constant 4 : index
    %c16_233 = arith.constant 16 : index
    %497 = vector.load %arg18[%c4_232, %c16_233] : memref<16x32xf32, #tpu.memory_space<vmem>>, vector<2x16xf32>
    %498 = arith.addf %496, %497 : vector<2x16xf32>
    %c4_234 = arith.constant 4 : index
    %c16_235 = arith.constant 16 : index
    %499 = vector.load %arg19[%c4_234, %c16_235] : memref<16x32xf32, #tpu.memory_space<vmem>>, vector<2x16xf32>
    tpu.vector_store %arg19[%c4_234, %c16_235], %498 {strides = array<i32>} : memref<16x32xf32, #tpu.memory_space<vmem>>, vector<2x16xf32>,
    %c12_236 = arith.constant 12 : index
    %c0_237 = arith.constant 0 : index
    %500 = vector.load %arg17[%c12_236, %c0_237] : memref<16x128xf32, #tpu.memory_space<vmem>>, vector<2x128xf32>
    %c2_238 = arith.constant 2 : index
    %c0_239 = arith.constant 0 : index
    %501 = vector.load %arg17[%c2_238, %c0_239] : memref<16x128xf32, #tpu.memory_space<vmem>>, vector<2x128xf32>
    %502 = arith.select %102, %500, %501 : vector<2x128xi1>, vector<2x128xf32>
    %cst_240 = arith.constant dense<0.000000e+00> : vector<2x128xf32>
    %503 = tpu.matmul %491, %323, %cst_240 {dimension_numbers = #tpu.dot_dimension_numbers<[1], [0], [0], [1], [0, 0, 1, 1], [], []>} : vector<2x32xf32>, vector<32x128xf32>, vector<2x128xf32> -> vector<2x128xf32>
    %504 = arith.addf %502, %503 : vector<2x128xf32>
    %505 = arith.negf %504 : vector<2x128xf32>
    %506 = math.exp %505 : vector<2x128xf32>
    %cst_241 = arith.constant 1.000000e+00 : f32
    %507 = vector.broadcast %cst_241 : f32 to vector<2x128xf32>
    %508 = arith.addf %507, %506 : vector<2x128xf32>
    %509 = arith.divf %507, %508 : vector<2x128xf32>
    %510 = math.tanh %504 : vector<2x128xf32>
    %511 = arith.select %84, %509, %510 : vector<2x128xi1>, vector<2x128xf32>
    %512 = vector.extract_strided_slice %511 {offsets = [0, 0], sizes = [2, 32], strides = [1, 1]} : vector<2x128xf32> to vector<2x32xf32>
    %513 = vector.extract_strided_slice %511 {offsets = [0, 32], sizes = [2, 32], strides = [1, 1]} : vector<2x128xf32> to vector<2x32xf32>
    %514 = vector.extract_strided_slice %511 {offsets = [0, 64], sizes = [2, 32], strides = [1, 1]} : vector<2x128xf32> to vector<2x32xf32>
    %515 = vector.extract_strided_slice %511 {offsets = [0, 96], sizes = [2, 32], strides = [1, 1]} : vector<2x128xf32> to vector<2x32xf32>
    %516 = arith.mulf %513, %489 : vector<2x32xf32>
    %517 = arith.mulf %512, %515 : vector<2x32xf32>
    %518 = arith.addf %516, %517 : vector<2x32xf32>
    %519 = math.tanh %518 : vector<2x32xf32>
    %520 = arith.mulf %514, %519 : vector<2x32xf32>
    %521 = vector.extract_strided_slice %520 {offsets = [0, 0], sizes = [2, 16], strides = [1, 1]} : vector<2x32xf32> to vector<2x16xf32>
    %c12_242 = arith.constant 12 : index
    %c0_243 = arith.constant 0 : index
    %522 = vector.load %arg18[%c12_242, %c0_243] : memref<16x32xf32, #tpu.memory_space<vmem>>, vector<2x16xf32>
    %523 = arith.addf %521, %522 : vector<2x16xf32>
    %c12_244 = arith.constant 12 : index
    %c0_245 = arith.constant 0 : index
    %524 = vector.load %arg19[%c12_244, %c0_245] : memref<16x32xf32, #tpu.memory_space<vmem>>, vector<2x16xf32>
    tpu.vector_store %arg19[%c12_244, %c0_245], %523 {strides = array<i32>} : memref<16x32xf32, #tpu.memory_space<vmem>>, vector<2x16xf32>,
    %525 = vector.extract_strided_slice %520 {offsets = [0, 16], sizes = [2, 16], strides = [1, 1]} : vector<2x32xf32> to vector<2x16xf32>
    %c2_246 = arith.constant 2 : index
    %c16_247 = arith.constant 16 : index
    %526 = vector.load %arg18[%c2_246, %c16_247] : memref<16x32xf32, #tpu.memory_space<vmem>>, vector<2x16xf32>
    %527 = arith.addf %525, %526 : vector<2x16xf32>
    %c2_248 = arith.constant 2 : index
    %c16_249 = arith.constant 16 : index
    %528 = vector.load %arg19[%c2_248, %c16_249] : memref<16x32xf32, #tpu.memory_space<vmem>>, vector<2x16xf32>
    tpu.vector_store %arg19[%c2_248, %c16_249], %527 {strides = array<i32>} : memref<16x32xf32, #tpu.memory_space<vmem>>, vector<2x16xf32>,
    %c14_250 = arith.constant 14 : index
    %c0_251 = arith.constant 0 : index
    %529 = vector.load %arg17[%c14_250, %c0_251] : memref<16x128xf32, #tpu.memory_space<vmem>>, vector<2x128xf32>
    %c0_252 = arith.constant 0 : index
    %c0_253 = arith.constant 0 : index
    %530 = vector.load %arg17[%c0_252, %c0_253] : memref<16x128xf32, #tpu.memory_space<vmem>>, vector<2x128xf32>
    %531 = arith.select %102, %529, %530 : vector<2x128xi1>, vector<2x128xf32>
    %cst_254 = arith.constant dense<0.000000e+00> : vector<2x128xf32>
    %532 = tpu.matmul %520, %323, %cst_254 {dimension_numbers = #tpu.dot_dimension_numbers<[1], [0], [0], [1], [0, 0, 1, 1], [], []>} : vector<2x32xf32>, vector<32x128xf32>, vector<2x128xf32> -> vector<2x128xf32>
    %533 = arith.addf %531, %532 : vector<2x128xf32>
    %534 = arith.negf %533 : vector<2x128xf32>
    %535 = math.exp %534 : vector<2x128xf32>
    %cst_255 = arith.constant 1.000000e+00 : f32
    %536 = vector.broadcast %cst_255 : f32 to vector<2x128xf32>
    %537 = arith.addf %536, %535 : vector<2x128xf32>
    %538 = arith.divf %536, %537 : vector<2x128xf32>
    %539 = math.tanh %533 : vector<2x128xf32>
    %540 = arith.select %84, %538, %539 : vector<2x128xi1>, vector<2x128xf32>
    %541 = vector.extract_strided_slice %540 {offsets = [0, 0], sizes = [2, 32], strides = [1, 1]} : vector<2x128xf32> to vector<2x32xf32>
    %542 = vector.extract_strided_slice %540 {offsets = [0, 32], sizes = [2, 32], strides = [1, 1]} : vector<2x128xf32> to vector<2x32xf32>
    %543 = vector.extract_strided_slice %540 {offsets = [0, 64], sizes = [2, 32], strides = [1, 1]} : vector<2x128xf32> to vector<2x32xf32>
    %544 = vector.extract_strided_slice %540 {offsets = [0, 96], sizes = [2, 32], strides = [1, 1]} : vector<2x128xf32> to vector<2x32xf32>
    %545 = arith.mulf %542, %518 : vector<2x32xf32>
    %546 = arith.mulf %541, %544 : vector<2x32xf32>
    %547 = arith.addf %545, %546 : vector<2x32xf32>
    %548 = math.tanh %547 : vector<2x32xf32>
    %549 = arith.mulf %543, %548 : vector<2x32xf32>
    %550 = vector.extract_strided_slice %549 {offsets = [0, 0], sizes = [2, 16], strides = [1, 1]} : vector<2x32xf32> to vector<2x16xf32>
    %c14_256 = arith.constant 14 : index
    %c0_257 = arith.constant 0 : index
    %551 = vector.load %arg18[%c14_256, %c0_257] : memref<16x32xf32, #tpu.memory_space<vmem>>, vector<2x16xf32>
    %552 = arith.addf %550, %551 : vector<2x16xf32>
    %c14_258 = arith.constant 14 : index
    %c0_259 = arith.constant 0 : index
    %553 = vector.load %arg19[%c14_258, %c0_259] : memref<16x32xf32, #tpu.memory_space<vmem>>, vector<2x16xf32>
    tpu.vector_store %arg19[%c14_258, %c0_259], %552 {strides = array<i32>} : memref<16x32xf32, #tpu.memory_space<vmem>>, vector<2x16xf32>,
    %554 = vector.extract_strided_slice %549 {offsets = [0, 16], sizes = [2, 16], strides = [1, 1]} : vector<2x32xf32> to vector<2x16xf32>
    %c0_260 = arith.constant 0 : index
    %c16_261 = arith.constant 16 : index
    %555 = vector.load %arg18[%c0_260, %c16_261] : memref<16x32xf32, #tpu.memory_space<vmem>>, vector<2x16xf32>
    %556 = arith.addf %554, %555 : vector<2x16xf32>
    %c0_262 = arith.constant 0 : index
    %c16_263 = arith.constant 16 : index
    %557 = vector.load %arg19[%c0_262, %c16_263] : memref<16x32xf32, #tpu.memory_space<vmem>>, vector<2x16xf32>
    tpu.vector_store %arg19[%c0_262, %c16_263], %556 {strides = array<i32>} : memref<16x32xf32, #tpu.memory_space<vmem>>, vector<2x16xf32>,
    %c0_264 = arith.constant 0 : index
    %558 = memref.load %arg14[%c0_264] : memref<4xf32, #tpu.memory_space<smem>>
    %c1_265 = arith.constant 1 : index
    %559 = memref.load %arg14[%c1_265] : memref<4xf32, #tpu.memory_space<smem>>
    %c2_266 = arith.constant 2 : index
    %560 = memref.load %arg14[%c2_266] : memref<4xf32, #tpu.memory_space<smem>>
    %c3 = arith.constant 3 : index
    %561 = memref.load %arg14[%c3] : memref<4xf32, #tpu.memory_space<smem>>
    %c0_267 = arith.constant 0 : index
    %c0_268 = arith.constant 0 : index
    %562 = vector.load %arg16[%c0_267, %c0_268] : memref<16x16xf32, #tpu.memory_space<vmem>>, vector<2x16xf32>
    %563 = tpu.concatenate %562, %562 in 1 : vector<2x16xf32>, vector<2x16xf32> -> vector<2x32xf32>
    %564 = vector.broadcast %558 : f32 to vector<2x32xf32>
    %565 = arith.mulf %564, %563 : vector<2x32xf32>
    %c0_269 = arith.constant 0 : index
    %c0_270 = arith.constant 0 : index
    %566 = vector.load %arg18[%c0_269, %c0_270] : memref<16x32xf32, #tpu.memory_space<vmem>>, vector<2x32xf32>
    %567 = vector.broadcast %559 : f32 to vector<2x32xf32>
    %568 = arith.mulf %567, %566 : vector<2x32xf32>
    %569 = arith.addf %565, %568 : vector<2x32xf32>
    %c0_271 = arith.constant 0 : index
    %c0_272 = arith.constant 0 : index
    %570 = vector.load %arg19[%c0_271, %c0_272] : memref<16x32xf32, #tpu.memory_space<vmem>>, vector<2x32xf32>
    %571 = vector.broadcast %560 : f32 to vector<2x32xf32>
    %572 = arith.mulf %571, %570 : vector<2x32xf32>
    %573 = arith.addf %569, %572 : vector<2x32xf32>
    %574 = vector.broadcast %561 : f32 to vector<2x32xf32>
    %575 = arith.mulf %574, %573 : vector<2x32xf32>
    %c0_273 = arith.constant 0 : index
    %c0_274 = arith.constant 0 : index
    %c0_275 = arith.constant 0 : index
    %576 = vector.load %arg15[%c0_273, %c0_274, %c0_275] : memref<2x8x32xf32, #tpu.memory_space<vmem>>, vector<2x1x32xf32>
    %577 = vector.shape_cast %576 : vector<2x1x32xf32> to vector<2x32xf32>
    %578 = vector.shape_cast %575 : vector<2x32xf32> to vector<2x1x32xf32>
    tpu.vector_store %arg15[%c0_273, %c0_274, %c0_275], %578 {strides = array<i32>} : memref<2x8x32xf32, #tpu.memory_space<vmem>>, vector<2x1x32xf32>,
    %c2_276 = arith.constant 2 : index
    %c0_277 = arith.constant 0 : index
    %579 = vector.load %arg16[%c2_276, %c0_277] : memref<16x16xf32, #tpu.memory_space<vmem>>, vector<2x16xf32>
    %580 = tpu.concatenate %579, %579 in 1 : vector<2x16xf32>, vector<2x16xf32> -> vector<2x32xf32>
    %581 = vector.broadcast %558 : f32 to vector<2x32xf32>
    %582 = arith.mulf %581, %580 : vector<2x32xf32>
    %c2_278 = arith.constant 2 : index
    %c0_279 = arith.constant 0 : index
    %583 = vector.load %arg18[%c2_278, %c0_279] : memref<16x32xf32, #tpu.memory_space<vmem>>, vector<2x32xf32>
    %584 = vector.broadcast %559 : f32 to vector<2x32xf32>
    %585 = arith.mulf %584, %583 : vector<2x32xf32>
    %586 = arith.addf %582, %585 : vector<2x32xf32>
    %c2_280 = arith.constant 2 : index
    %c0_281 = arith.constant 0 : index
    %587 = vector.load %arg19[%c2_280, %c0_281] : memref<16x32xf32, #tpu.memory_space<vmem>>, vector<2x32xf32>
    %588 = vector.broadcast %560 : f32 to vector<2x32xf32>
    %589 = arith.mulf %588, %587 : vector<2x32xf32>
    %590 = arith.addf %586, %589 : vector<2x32xf32>
    %591 = vector.broadcast %561 : f32 to vector<2x32xf32>
    %592 = arith.mulf %591, %590 : vector<2x32xf32>
    %c0_282 = arith.constant 0 : index
    %c1_283 = arith.constant 1 : index
    %c0_284 = arith.constant 0 : index
    %593 = vector.load %arg15[%c0_282, %c1_283, %c0_284] : memref<2x8x32xf32, #tpu.memory_space<vmem>>, vector<2x1x32xf32>
    %594 = vector.shape_cast %593 : vector<2x1x32xf32> to vector<2x32xf32>
    %595 = vector.shape_cast %592 : vector<2x32xf32> to vector<2x1x32xf32>
    tpu.vector_store %arg15[%c0_282, %c1_283, %c0_284], %595 {strides = array<i32>} : memref<2x8x32xf32, #tpu.memory_space<vmem>>, vector<2x1x32xf32>,
    %c4_285 = arith.constant 4 : index
    %c0_286 = arith.constant 0 : index
    %596 = vector.load %arg16[%c4_285, %c0_286] : memref<16x16xf32, #tpu.memory_space<vmem>>, vector<2x16xf32>
    %597 = tpu.concatenate %596, %596 in 1 : vector<2x16xf32>, vector<2x16xf32> -> vector<2x32xf32>
    %598 = vector.broadcast %558 : f32 to vector<2x32xf32>
    %599 = arith.mulf %598, %597 : vector<2x32xf32>
    %c4_287 = arith.constant 4 : index
    %c0_288 = arith.constant 0 : index
    %600 = vector.load %arg18[%c4_287, %c0_288] : memref<16x32xf32, #tpu.memory_space<vmem>>, vector<2x32xf32>
    %601 = vector.broadcast %559 : f32 to vector<2x32xf32>
    %602 = arith.mulf %601, %600 : vector<2x32xf32>
    %603 = arith.addf %599, %602 : vector<2x32xf32>
    %c4_289 = arith.constant 4 : index
    %c0_290 = arith.constant 0 : index
    %604 = vector.load %arg19[%c4_289, %c0_290] : memref<16x32xf32, #tpu.memory_space<vmem>>, vector<2x32xf32>
    %605 = vector.broadcast %560 : f32 to vector<2x32xf32>
    %606 = arith.mulf %605, %604 : vector<2x32xf32>
    %607 = arith.addf %603, %606 : vector<2x32xf32>
    %608 = vector.broadcast %561 : f32 to vector<2x32xf32>
    %609 = arith.mulf %608, %607 : vector<2x32xf32>
    %c0_291 = arith.constant 0 : index
    %c2_292 = arith.constant 2 : index
    %c0_293 = arith.constant 0 : index
    %610 = vector.load %arg15[%c0_291, %c2_292, %c0_293] : memref<2x8x32xf32, #tpu.memory_space<vmem>>, vector<2x1x32xf32>
    %611 = vector.shape_cast %610 : vector<2x1x32xf32> to vector<2x32xf32>
    %612 = vector.shape_cast %609 : vector<2x32xf32> to vector<2x1x32xf32>
    tpu.vector_store %arg15[%c0_291, %c2_292, %c0_293], %612 {strides = array<i32>} : memref<2x8x32xf32, #tpu.memory_space<vmem>>, vector<2x1x32xf32>,
    %c6_294 = arith.constant 6 : index
    %c0_295 = arith.constant 0 : index
    %613 = vector.load %arg16[%c6_294, %c0_295] : memref<16x16xf32, #tpu.memory_space<vmem>>, vector<2x16xf32>
    %614 = tpu.concatenate %613, %613 in 1 : vector<2x16xf32>, vector<2x16xf32> -> vector<2x32xf32>
    %615 = vector.broadcast %558 : f32 to vector<2x32xf32>
    %616 = arith.mulf %615, %614 : vector<2x32xf32>
    %c6_296 = arith.constant 6 : index
    %c0_297 = arith.constant 0 : index
    %617 = vector.load %arg18[%c6_296, %c0_297] : memref<16x32xf32, #tpu.memory_space<vmem>>, vector<2x32xf32>
    %618 = vector.broadcast %559 : f32 to vector<2x32xf32>
    %619 = arith.mulf %618, %617 : vector<2x32xf32>
    %620 = arith.addf %616, %619 : vector<2x32xf32>
    %c6_298 = arith.constant 6 : index
    %c0_299 = arith.constant 0 : index
    %621 = vector.load %arg19[%c6_298, %c0_299] : memref<16x32xf32, #tpu.memory_space<vmem>>, vector<2x32xf32>
    %622 = vector.broadcast %560 : f32 to vector<2x32xf32>
    %623 = arith.mulf %622, %621 : vector<2x32xf32>
    %624 = arith.addf %620, %623 : vector<2x32xf32>
    %625 = vector.broadcast %561 : f32 to vector<2x32xf32>
    %626 = arith.mulf %625, %624 : vector<2x32xf32>
    %c0_300 = arith.constant 0 : index
    %c3_301 = arith.constant 3 : index
    %c0_302 = arith.constant 0 : index
    %627 = vector.load %arg15[%c0_300, %c3_301, %c0_302] : memref<2x8x32xf32, #tpu.memory_space<vmem>>, vector<2x1x32xf32>
    %628 = vector.shape_cast %627 : vector<2x1x32xf32> to vector<2x32xf32>
    %629 = vector.shape_cast %626 : vector<2x32xf32> to vector<2x1x32xf32>
    tpu.vector_store %arg15[%c0_300, %c3_301, %c0_302], %629 {strides = array<i32>} : memref<2x8x32xf32, #tpu.memory_space<vmem>>, vector<2x1x32xf32>,
    %c8_303 = arith.constant 8 : index
    %c0_304 = arith.constant 0 : index
    %630 = vector.load %arg16[%c8_303, %c0_304] : memref<16x16xf32, #tpu.memory_space<vmem>>, vector<2x16xf32>
    %631 = tpu.concatenate %630, %630 in 1 : vector<2x16xf32>, vector<2x16xf32> -> vector<2x32xf32>
    %632 = vector.broadcast %558 : f32 to vector<2x32xf32>
    %633 = arith.mulf %632, %631 : vector<2x32xf32>
    %c8_305 = arith.constant 8 : index
    %c0_306 = arith.constant 0 : index
    %634 = vector.load %arg18[%c8_305, %c0_306] : memref<16x32xf32, #tpu.memory_space<vmem>>, vector<2x32xf32>
    %635 = vector.broadcast %559 : f32 to vector<2x32xf32>
    %636 = arith.mulf %635, %634 : vector<2x32xf32>
    %637 = arith.addf %633, %636 : vector<2x32xf32>
    %c8_307 = arith.constant 8 : index
    %c0_308 = arith.constant 0 : index
    %638 = vector.load %arg19[%c8_307, %c0_308] : memref<16x32xf32, #tpu.memory_space<vmem>>, vector<2x32xf32>
    %639 = vector.broadcast %560 : f32 to vector<2x32xf32>
    %640 = arith.mulf %639, %638 : vector<2x32xf32>
    %641 = arith.addf %637, %640 : vector<2x32xf32>
    %642 = vector.broadcast %561 : f32 to vector<2x32xf32>
    %643 = arith.mulf %642, %641 : vector<2x32xf32>
    %c0_309 = arith.constant 0 : index
    %c4_310 = arith.constant 4 : index
    %c0_311 = arith.constant 0 : index
    %644 = vector.load %arg15[%c0_309, %c4_310, %c0_311] : memref<2x8x32xf32, #tpu.memory_space<vmem>>, vector<2x1x32xf32>
    %645 = vector.shape_cast %644 : vector<2x1x32xf32> to vector<2x32xf32>
    %646 = vector.shape_cast %643 : vector<2x32xf32> to vector<2x1x32xf32>
    tpu.vector_store %arg15[%c0_309, %c4_310, %c0_311], %646 {strides = array<i32>} : memref<2x8x32xf32, #tpu.memory_space<vmem>>, vector<2x1x32xf32>,
    %c10_312 = arith.constant 10 : index
    %c0_313 = arith.constant 0 : index
    %647 = vector.load %arg16[%c10_312, %c0_313] : memref<16x16xf32, #tpu.memory_space<vmem>>, vector<2x16xf32>
    %648 = tpu.concatenate %647, %647 in 1 : vector<2x16xf32>, vector<2x16xf32> -> vector<2x32xf32>
    %649 = vector.broadcast %558 : f32 to vector<2x32xf32>
    %650 = arith.mulf %649, %648 : vector<2x32xf32>
    %c10_314 = arith.constant 10 : index
    %c0_315 = arith.constant 0 : index
    %651 = vector.load %arg18[%c10_314, %c0_315] : memref<16x32xf32, #tpu.memory_space<vmem>>, vector<2x32xf32>
    %652 = vector.broadcast %559 : f32 to vector<2x32xf32>
    %653 = arith.mulf %652, %651 : vector<2x32xf32>
    %654 = arith.addf %650, %653 : vector<2x32xf32>
    %c10_316 = arith.constant 10 : index
    %c0_317 = arith.constant 0 : index
    %655 = vector.load %arg19[%c10_316, %c0_317] : memref<16x32xf32, #tpu.memory_space<vmem>>, vector<2x32xf32>
    %656 = vector.broadcast %560 : f32 to vector<2x32xf32>
    %657 = arith.mulf %656, %655 : vector<2x32xf32>
    %658 = arith.addf %654, %657 : vector<2x32xf32>
    %659 = vector.broadcast %561 : f32 to vector<2x32xf32>
    %660 = arith.mulf %659, %658 : vector<2x32xf32>
    %c0_318 = arith.constant 0 : index
    %c5 = arith.constant 5 : index
    %c0_319 = arith.constant 0 : index
    %661 = vector.load %arg15[%c0_318, %c5, %c0_319] : memref<2x8x32xf32, #tpu.memory_space<vmem>>, vector<2x1x32xf32>
    %662 = vector.shape_cast %661 : vector<2x1x32xf32> to vector<2x32xf32>
    %663 = vector.shape_cast %660 : vector<2x32xf32> to vector<2x1x32xf32>
    tpu.vector_store %arg15[%c0_318, %c5, %c0_319], %663 {strides = array<i32>} : memref<2x8x32xf32, #tpu.memory_space<vmem>>, vector<2x1x32xf32>,
    %c12_320 = arith.constant 12 : index
    %c0_321 = arith.constant 0 : index
    %664 = vector.load %arg16[%c12_320, %c0_321] : memref<16x16xf32, #tpu.memory_space<vmem>>, vector<2x16xf32>
    %665 = tpu.concatenate %664, %664 in 1 : vector<2x16xf32>, vector<2x16xf32> -> vector<2x32xf32>
    %666 = vector.broadcast %558 : f32 to vector<2x32xf32>
    %667 = arith.mulf %666, %665 : vector<2x32xf32>
    %c12_322 = arith.constant 12 : index
    %c0_323 = arith.constant 0 : index
    %668 = vector.load %arg18[%c12_322, %c0_323] : memref<16x32xf32, #tpu.memory_space<vmem>>, vector<2x32xf32>
    %669 = vector.broadcast %559 : f32 to vector<2x32xf32>
    %670 = arith.mulf %669, %668 : vector<2x32xf32>
    %671 = arith.addf %667, %670 : vector<2x32xf32>
    %c12_324 = arith.constant 12 : index
    %c0_325 = arith.constant 0 : index
    %672 = vector.load %arg19[%c12_324, %c0_325] : memref<16x32xf32, #tpu.memory_space<vmem>>, vector<2x32xf32>
    %673 = vector.broadcast %560 : f32 to vector<2x32xf32>
    %674 = arith.mulf %673, %672 : vector<2x32xf32>
    %675 = arith.addf %671, %674 : vector<2x32xf32>
    %676 = vector.broadcast %561 : f32 to vector<2x32xf32>
    %677 = arith.mulf %676, %675 : vector<2x32xf32>
    %c0_326 = arith.constant 0 : index
    %c6_327 = arith.constant 6 : index
    %c0_328 = arith.constant 0 : index
    %678 = vector.load %arg15[%c0_326, %c6_327, %c0_328] : memref<2x8x32xf32, #tpu.memory_space<vmem>>, vector<2x1x32xf32>
    %679 = vector.shape_cast %678 : vector<2x1x32xf32> to vector<2x32xf32>
    %680 = vector.shape_cast %677 : vector<2x32xf32> to vector<2x1x32xf32>
    tpu.vector_store %arg15[%c0_326, %c6_327, %c0_328], %680 {strides = array<i32>} : memref<2x8x32xf32, #tpu.memory_space<vmem>>, vector<2x1x32xf32>,
    %c14_329 = arith.constant 14 : index
    %c0_330 = arith.constant 0 : index
    %681 = vector.load %arg16[%c14_329, %c0_330] : memref<16x16xf32, #tpu.memory_space<vmem>>, vector<2x16xf32>
    %682 = tpu.concatenate %681, %681 in 1 : vector<2x16xf32>, vector<2x16xf32> -> vector<2x32xf32>
    %683 = vector.broadcast %558 : f32 to vector<2x32xf32>
    %684 = arith.mulf %683, %682 : vector<2x32xf32>
    %c14_331 = arith.constant 14 : index
    %c0_332 = arith.constant 0 : index
    %685 = vector.load %arg18[%c14_331, %c0_332] : memref<16x32xf32, #tpu.memory_space<vmem>>, vector<2x32xf32>
    %686 = vector.broadcast %559 : f32 to vector<2x32xf32>
    %687 = arith.mulf %686, %685 : vector<2x32xf32>
    %688 = arith.addf %684, %687 : vector<2x32xf32>
    %c14_333 = arith.constant 14 : index
    %c0_334 = arith.constant 0 : index
    %689 = vector.load %arg19[%c14_333, %c0_334] : memref<16x32xf32, #tpu.memory_space<vmem>>, vector<2x32xf32>
    %690 = vector.broadcast %560 : f32 to vector<2x32xf32>
    %691 = arith.mulf %690, %689 : vector<2x32xf32>
    %692 = arith.addf %688, %691 : vector<2x32xf32>
    %693 = vector.broadcast %561 : f32 to vector<2x32xf32>
    %694 = arith.mulf %693, %692 : vector<2x32xf32>
    %c0_335 = arith.constant 0 : index
    %c7 = arith.constant 7 : index
    %c0_336 = arith.constant 0 : index
    %695 = vector.load %arg15[%c0_335, %c7, %c0_336] : memref<2x8x32xf32, #tpu.memory_space<vmem>>, vector<2x1x32xf32>
    %696 = vector.shape_cast %695 : vector<2x1x32xf32> to vector<2x32xf32>
    %697 = vector.shape_cast %694 : vector<2x32xf32> to vector<2x1x32xf32>
    tpu.vector_store %arg15[%c0_335, %c7, %c0_336], %697 {strides = array<i32>} : memref<2x8x32xf32, #tpu.memory_space<vmem>>, vector<2x1x32xf32>,
    return
  }
  func.func @transform_0(%arg0: i32) -> (i32, i32) {
    %c0_i32 = arith.constant 0 : i32
    %c0_i32_0 = arith.constant 0 : i32
    %c0_i32_1 = arith.constant 0 : i32
    return %c0_i32, %c0_i32_0 : i32, i32
  }
  func.func @transform_1(%arg0: i32) -> (i32, i32) {
    %c0_i32 = arith.constant 0 : i32
    %c0_i32_0 = arith.constant 0 : i32
    %c0_i32_1 = arith.constant 0 : i32
    return %c0_i32, %c0_i32_0 : i32, i32
  }
  func.func @transform_2(%arg0: i32) -> (i32, i32) {
    %c0_i32 = arith.constant 0 : i32
    %c0_i32_0 = arith.constant 0 : i32
    %c0_i32_1 = arith.constant 0 : i32
    return %c0_i32, %c0_i32_0 : i32, i32
  }
  func.func @transform_3(%arg0: i32) -> (i32, i32, i32) {
    %c0_i32 = arith.constant 0 : i32
    %c0_i32_0 = arith.constant 0 : i32
    %c0_i32_1 = arith.constant 0 : i32
    %c0_i32_2 = arith.constant 0 : i32
    return %c0_i32, %c0_i32_0, %c0_i32_1 : i32, i32, i32
  }
  func.func @transform_4(%arg0: i32) -> (i32, i32, i32) {
    %c0_i32 = arith.constant 0 : i32
    %c0_i32_0 = arith.constant 0 : i32
    %c0_i32_1 = arith.constant 0 : i32
    %c0_i32_2 = arith.constant 0 : i32
    return %c0_i32, %c0_i32_0, %c0_i32_1 : i32, i32, i32
  }
  func.func @transform_5(%arg0: i32) -> (i32, i32, i32) {
    %c0_i32 = arith.constant 0 : i32
    %c0_i32_0 = arith.constant 0 : i32
    %c0_i32_1 = arith.constant 0 : i32
    %c0_i32_2 = arith.constant 0 : i32
    return %c0_i32, %c0_i32_0, %c0_i32_1 : i32, i32, i32
  }
  func.func @transform_6(%arg0: i32) -> (i32, i32, i32) {
    %c0_i32 = arith.constant 0 : i32
    %c0_i32_0 = arith.constant 0 : i32
    %c0_i32_1 = arith.constant 0 : i32
    %c0_i32_2 = arith.constant 0 : i32
    return %c0_i32, %c0_i32_0, %c0_i32_1 : i32, i32, i32
  }
  func.func @transform_7(%arg0: i32) -> (i32, i32) {
    %c0_i32 = arith.constant 0 : i32
    %c0_i32_0 = arith.constant 0 : i32
    %c0_i32_1 = arith.constant 0 : i32
    return %c0_i32, %c0_i32_0 : i32, i32
  }
  func.func @transform_8(%arg0: i32) -> (i32, i32) {
    %c0_i32 = arith.constant 0 : i32
    %c0_i32_0 = arith.constant 0 : i32
    %c0_i32_1 = arith.constant 0 : i32
    return %c0_i32, %c0_i32_0 : i32, i32
  }
  func.func @transform_9(%arg0: i32) -> (i32, i32) {
    %c0_i32 = arith.constant 0 : i32
    %c0_i32_0 = arith.constant 0 : i32
    %c0_i32_1 = arith.constant 0 : i32
    return %c0_i32, %c0_i32_0 : i32, i32
  }
  func.func @transform_10(%arg0: i32) -> (i32, i32) {
    %c0_i32 = arith.constant 0 : i32
    %c0_i32_0 = arith.constant 0 : i32
    %c0_i32_1 = arith.constant 0 : i32
    return %c0_i32, %c0_i32_0 : i32, i32
  }
  func.func @transform_11(%arg0: i32) -> (i32, i32, i32) {
    %c0_i32 = arith.constant 0 : i32
    %c0_i32_0 = arith.constant 0 : i32
    %c0_i32_1 = arith.constant 0 : i32
    %c0_i32_2 = arith.constant 0 : i32
    return %c0_i32, %c0_i32_0, %c0_i32_1 : i32, i32, i32
  }
  func.func @transform_12(%arg0: i32) -> (i32, i32, i32) {
    %c0_i32 = arith.constant 0 : i32
    %c0_i32_0 = arith.constant 0 : i32
    %c0_i32_1 = arith.constant 0 : i32
    %c0_i32_2 = arith.constant 0 : i32
    return %c0_i32, %c0_i32_0, %c0_i32_1 : i32, i32, i32
  }
  func.func @transform_13(%arg0: i32) -> i32 {
    %c0_i32 = arith.constant 0 : i32
    %c0_i32_0 = arith.constant 0 : i32
    return %c0_i32 : i32
  }
  func.func @transform_14(%arg0: i32) -> (i32, i32, i32) {
    %c0_i32 = arith.constant 0 : i32
    %c0_i32_0 = arith.constant 0 : i32
    %c0_i32_1 = arith.constant 0 : i32
    %c0_i32_2 = arith.constant 0 : i32
    return %c0_i32, %c0_i32_0, %c0_i32_1 : i32, i32, i32
  }
}

</mosaic_0001>

<bundles_post_ra>
// kernel: elmo_forward.1
= control target key start
LH: loop header
LB: loop body
LE: loop exit
PB: predicated region body
PF: predicated region fallthrough
CT: control target
= control target key end

     0   :  { %19 = vsyncpa [#allocation8], 0  ;;  %s5322_s0 = inlined_call_operand.vmem [shape: f32[256,48], index: 0, kind: input, shape index: {}]   ;;  %s5323_s1 = inlined_call_operand.vmem [shape: f32[48,32], index: 1, kind: input, shape index: {}]   ;;  %s5324_s2 = inlined_call_operand.vmem [shape: f32[1,32], index: 2, kind: input, shape index: {}]   ;;  %s5325_s3 = inlined_call_operand.vmem [shape: f32[2,32,32], index: 3, kind: input, shape index: {}]   ;;  %s5326_s4 = inlined_call_operand.vmem [shape: f32[2,1,32], index: 4, kind: input, shape index: {}]   ;;  %s5327_s5 = inlined_call_operand.vmem [shape: f32[2,32,32], index: 5, kind: input, shape index: {}]   ;;  %s5328_s6 = inlined_call_operand.vmem [shape: f32[2,1,32], index: 6, kind: input, shape index: {}]   ;;  %s5329_s7 = inlined_call_operand.vmem [shape: f32[32,16], index: 7, kind: input, shape index: {}]   ;;  %s5330_s8 = inlined_call_operand.vmem [shape: f32[1,16], index: 8, kind: input, shape index: {}]   ;;  %s5331_s9 = inlined_call_operand.vmem [shape: f32[16,128], index: 9, kind: input, shape index: {}]   ;;  %s5332_s10 = inlined_call_operand.vmem [shape: f32[32,128], index: 10, kind: input, shape index: {}]   ;;  %s5333_s11 = inlined_call_operand.vmem [shape: f32[2,32,128], index: 11, kind: input, shape index: {}]   ;;  %s5334_s12 = inlined_call_operand.vmem [shape: f32[2,1,128], index: 12, kind: input, shape index: {}]   ;;  %s5335_s13 = inlined_call_operand.vmem [shape: f32[4], index: 13, kind: input, shape index: {}]   ;;  %s5336_s14 = inlined_call_operand.hbm [shape: f32[2,8,32], index: 14, kind: output, shape index: {}]  }
   0x1   :  { %20 = vsyncpa [#allocation7], 0  ;;  %s53_s15 = sshll.u32 %s5335_s13, 4  ;;  %s54_s15 = int_to_ptr.vmem [resolvable:$true] %s53_s15 }
   0x2   :  { %s4365_s16 = scalar_lea.vmem %s54_s15, 16  ;;  %p4370_p1 = scmp.lt.s32.totalorder %s54_s15, %s54_s15 }
   0x3   :  { %p4366_p0 = scmp.ne.s32.totalorder %s54_s15, %s4365_s16  ;;  %p4371_p2 = scmp.lt.s32.totalorder %s4365_s16, %s4365_s16 }
   0x5   :  { %p4372_p3 = por %p4371_p2, %p4370_p1 }
   0x7   :  { %p4373_p4 = pnand %p4372_p3, %p4366_p0 }
   0x9   :  { %4376 = shalt.err (!%p4373_p4)
}
   0xa   :  { %s4403_s17 = smov [#allocation6]  }
   0xb   :  { %56 = dma.vmem_to_smem %s54_s15, 16, %s4403_s17, [#allocation8]  }
   0xc   :  { %4399 = dma.done.wait [#allocation8], 16  }
   0xd   :  { %4400 = vsyncadd [#allocation8], 4294967280 }
   0xe   :  { %60 = sfence }
   0xf   :  { %v93_v0 = vld [vmem:[%s5323_s1] sm:$0xff]  ;;  %v94_v1 = vld [vmem:[%s5323_s1 + $0x8] sm:$0xff]  ;;  %v95_v2 = vld [vmem:[%s5323_s1 + $0x10] sm:$0xff]  ;;  %vm99_vm0 = vcmask 392192   ;;  %vm475_vm1 = vcmask 261120   ;;  %vm4406_vm6 = vmmov 0  }
  0x10   :  { %v4049_v3 = vpack.c.bf16 %v94_v1, %v93_v0  ;;  %v96_v4 = vld [vmem:[%s5323_s1 + $0x18] sm:$0xff]  ;;  %v97_v6 = vld [vmem:[%s5323_s1 + $0x20] sm:$0xff]  ;;  %v98_v7 = vld [vmem:[%s5323_s1 + $0x28] sm:$0xff]  ;;  %vm1045_vm7 = vcmask 130048   ;;  %s4409_s21 = smov 64   ;;  %vm1264_vm10 = vcmask 123904  }
  0x11   :  { %v4053_v5 = vpack.c.bf16 %v96_v4, %v95_v2  ;;  %v61_v8 = vld [vmem:[%s5322_s0] sm:$0xff]  ;;  %v4057_v9 = vpack.c.bf16 %v98_v7, %v97_v6  ;;  %v62_v10 = vld [vmem:[%s5322_s0 + $0x8] sm:$0xff]  ;;  %v63_v11 = vld [vmem:[%s5322_s0 + $0x10] sm:$0xff]  ;;  %vm1266_vm11 = vcmask 255104   ;;  %s3579_s16 = sld [smem:[#allocation6 + $0x1]]  ;;  %s3581_s17 = sld [smem:[#allocation6 + $0x3]] }
  0x12   :  { %4050 = vmatprep.subr.bf16.mxu0 %v4049_v3  ;;  %3752 = vmatprep.mubr.msk.f32.mxu0 %vm99_vm0, %v61_v8  ;;  %v64_v12 = vld [vmem:[%s5322_s0 + $0x18] sm:$0xff]  ;;  %v65_v13 = vld [vmem:[%s5322_s0 + $0x20] sm:$0xff]  ;;  %v66_v14 = vld [vmem:[%s5322_s0 + $0x28] sm:$0xff]  ;;  %vm3169_vm12 = vcmask 253952   ;;  %s4412_s18 = smov [#allocation9]  }
  0x13   :  { %4052 = vmatpush3.bf16.msra.mxu0 %v4049_v3  ;;  %v67_v15 = vld [vmem:[%s5322_s0 + $0x30] sm:$0xff]  ;;  %v68_v16 = vld [vmem:[%s5322_s0 + $0x38] sm:$0xff]  ;;  %v69_v17 = vld [vmem:[%s5322_s0 + $0x40] sm:$0xff]  ;;  %s3464_s1 = sshll.u32 %s4412_s18, 4  ;;  %s3465_s1 = int_to_ptr.vmem [resolvable:$true] %s3464_s1 }
  0x14   :  { %4054 = vmatprep.subr.bf16.mxu0 %v4053_v5  ;;  %v70_v18 = vld [vmem:[%s5322_s0 + $0x48] sm:$0xff]  ;;  %v71_v19 = vld [vmem:[%s5322_s0 + $0x50] sm:$0xff]  ;;  %v72_v20 = vld [vmem:[%s5322_s0 + $0x58] sm:$0xff]  ;;  %s4377_s19 = scalar_lea.vmem %s3465_s1, 256  ;;  %p4382_p6 = scmp.lt.s32.totalorder %s3465_s1, %s3465_s1 }
  0x15   :  { %v73_v21 = vld [vmem:[%s5322_s0 + $0x60] sm:$0xff]  ;;  %v74_v22 = vld [vmem:[%s5322_s0 + $0x68] sm:$0xff]  ;;  %v75_v23 = vld [vmem:[%s5322_s0 + $0x70] sm:$0xff]  ;;  %p4378_p5 = scmp.ne.s32.totalorder %s3465_s1, %s4377_s19  ;;  %p4383_p7 = scmp.lt.s32.totalorder %s4377_s19, %s4377_s19 }
  0x16   :  { %v76_v24 = vld [vmem:[%s5322_s0 + $0x78] sm:$0xff]  ;;  %v77_v25 = vld [vmem:[%s5322_s0 + $0x80] sm:$0xff]  ;;  %v78_v26 = vld [vmem:[%s5322_s0 + $0x88] sm:$0xff] }
  0x17   :  { %4056 = vmatpush3.bf16.msra.mxu0 %v4053_v5  ;;  %v79_v27 = vld [vmem:[%s5322_s0 + $0x90] sm:$0xff]  ;;  %v80_v28 = vld [vmem:[%s5322_s0 + $0x98] sm:$0xff]  ;;  %v81_v29 = vld [vmem:[%s5322_s0 + $0xa0] sm:$0xff]  ;;  %p4384_p8 = por %p4383_p7, %p4382_p6 }
  0x18   :  { %4058 = vmatprep.subr.bf16.mxu0 %v4057_v9  ;;  %v82_v30 = vld [vmem:[%s5322_s0 + $0xa8] sm:$0xff]  ;;  %v83_v31 = vld [vmem:[%s5322_s0 + $0xb0] sm:$0xff]  ;;  %v84_v32 = vld [vmem:[%s5322_s0 + $0xb8] sm:$0xff] }
  0x19   :  { %v85_v33 = vld [vmem:[%s5322_s0 + $0xc0] sm:$0xff]  ;;  %v86_v34 = vld [vmem:[%s5322_s0 + $0xc8] sm:$0xff]  ;;  %v87_v35 = vld [vmem:[%s5322_s0 + $0xd0] sm:$0xff]  ;;  %p4385_p9 = pnand %p4384_p8, %p4378_p5 }
  0x1a   :  { %v88_v36 = vld [vmem:[%s5322_s0 + $0xd8] sm:$0xff]  ;;  %v89_v37 = vld [vmem:[%s5322_s0 + $0xe0] sm:$0xff]  ;;  %v90_v38 = vld [vmem:[%s5322_s0 + $0xe8] sm:$0xff] }
  0x1b   :  { %4060 = vmatpush3.bf16.msra.mxu0 %v4057_v9  ;;  %v91_v39 = vld [vmem:[%s5322_s0 + $0xf0] sm:$0xff]  ;;  %v92_v40 = vld [vmem:[%s5322_s0 + $0xf8] sm:$0xff]  ;;  %v549_v41 = vld [vmem:[%s5325_s3] sm:$0xff] }
  0x1c   :  { %v550_v42 = vld [vmem:[%s5325_s3 + $0x8] sm:$0xff]  ;;  %v551_v44 = vld [vmem:[%s5325_s3 + $0x10] sm:$0xff]  ;;  %v552_v45 = vld [vmem:[%s5325_s3 + $0x18] sm:$0xff] }
  0x1d   :  { %v4061_v43 = vpack.c.bf16 %v550_v42, %v549_v41  ;;  %v4065_v46 = vpack.c.bf16 %v552_v45, %v551_v44  ;;  %v653_v47 = vld [vmem:[%s5327_s5] sm:$0xff]  ;;  %v654_v48 = vld [vmem:[%s5327_s5 + $0x8] sm:$0xff] }
  0x1e   :  { %3753 = vmatmul.mubr.msk.f32.vlgmr.msra.gmra.mrb[0].mxu0 %vm99_vm0, %v62_v10  ;;  %v4657_v49 = vpack.c.bf16 %v654_v48, %v653_v47 }
  0x1f   :  { %3755 = vmatprep.mubr.msk.f32.mxu0 %vm99_vm0, %v63_v11  ;;  %4062 = vmatprep.subr.bf16.mxu1 %v4061_v43 }
  0x20   :  { %4064 = vmatpush3.bf16.msra.mxu1 %v4061_v43 }
  0x21   :  { %4066 = vmatprep.subr.bf16.mxu1 %v4065_v46 }
  0x22   :  { %3756 = vmatmul.mubr.msk.f32.gmra.mrb[2].mxu0 %vm99_vm0, %v64_v12 }
  0x23   :  { %3758 = vmatprep.mubr.msk.f32.mxu0 %vm99_vm0, %v65_v13 }
  0x24   :  { %4068 = vmatpush3.bf16.msra.mxu1 %v4065_v46 }
  0x25   :  { %4070 = vmatprep.subr.bf16.mxu1 %v4657_v49 }
  0x26   :  { %3759 = vmatmul.mubr.msk.f32.gmra.mrb[4].mxu0 %vm99_vm0, %v66_v14 }
  0x27   :  { %3761 = vmatprep.mubr.msk.f32.mxu0 %vm99_vm0, %v67_v15 }
  0x2a   :  { %3762 = vmatmul.mubr.msk.f32.gmra.mrb[6].mxu0 %vm99_vm0, %v68_v16 }
  0x2b   :  { %3764 = vmatprep.mubr.msk.f32.mxu0 %vm99_vm0, %v69_v17 }
  0x2e   :  { %3765 = vmatmul.mubr.msk.f32.gmra.mrb[8].mxu0 %vm99_vm0, %v70_v18 }
  0x2f   :  { %3767 = vmatprep.mubr.msk.f32.mxu0 %vm99_vm0, %v71_v19 }
  0x32   :  { %3768 = vmatmul.mubr.msk.f32.gmra.mrb[10].mxu0 %vm99_vm0, %v72_v20 }
  0x33   :  { %3770 = vmatprep.mubr.msk.f32.mxu0 %vm99_vm0, %v73_v21 }
  0x36   :  { %3771 = vmatmul.mubr.msk.f32.gmra.mrb[12].mxu0 %vm99_vm0, %v74_v22 }
  0x37   :  { %3773 = vmatprep.mubr.msk.f32.mxu0 %vm99_vm0, %v75_v23 }
  0x3a   :  { %3774 = vmatmul.mubr.msk.f32.gmra.mrb[14].mxu0 %vm99_vm0, %v76_v24 }
  0x3b   :  { %3776 = vmatprep.mubr.msk.f32.mxu0 %vm99_vm0, %v77_v25 }
  0x3e   :  { %3777 = vmatmul.mubr.msk.f32.gmra.mrb[16].mxu0 %vm99_vm0, %v78_v26 }
  0x3f   :  { %3779 = vmatprep.mubr.msk.f32.mxu0 %vm99_vm0, %v79_v27 }
  0x42   :  { %3780 = vmatmul.mubr.msk.f32.gmra.mrb[18].mxu0 %vm99_vm0, %v80_v28 }
  0x43   :  { %3782 = vmatprep.mubr.msk.f32.mxu0 %vm99_vm0, %v81_v29 }
  0x46   :  { %3783 = vmatmul.mubr.msk.f32.gmra.mrb[20].mxu0 %vm99_vm0, %v82_v30 }
  0x47   :  { %3785 = vmatprep.mubr.msk.f32.mxu0 %vm99_vm0, %v83_v31 }
  0x4a   :  { %3786 = vmatmul.mubr.msk.f32.gmra.mrb[22].mxu0 %vm99_vm0, %v84_v32 }
  0x4b   :  { %3788 = vmatprep.mubr.msk.f32.mxu0 %vm99_vm0, %v85_v33 }
  0x4e   :  { %3789 = vmatmul.mubr.msk.f32.gmra.mrb[24].mxu0 %vm99_vm0, %v86_v34 }
  0x4f   :  { %3791 = vmatprep.mubr.msk.f32.mxu0 %vm99_vm0, %v87_v35 }
  0x52   :  { %3792 = vmatmul.mubr.msk.f32.gmra.mrb[26].mxu0 %vm99_vm0, %v88_v36 }
  0x53   :  { %3794 = vmatprep.mubr.msk.f32.mxu0 %vm99_vm0, %v89_v37 }
  0x56   :  { %3795 = vmatmul.mubr.msk.f32.gmra.mrb[28].mxu0 %vm99_vm0, %v90_v38 }
  0x57   :  { %3797 = vmatprep.mubr.msk.f32.mxu0 %vm99_vm0, %v91_v39  ;;  %v421_v39 = vlaneseq }
  0x59   :  { %v4682_v46 = vand.u32 127, %v421_v39 }
  0x5a   :  { %3798 = vmatmul.mubr.msk.f32.gmra.mrb[30].mxu0 %vm99_vm0, %v92_v40 }
  0x5b   :  { %vm423_vm2 = vcmp.ge.s32.totalorder %v4682_v46, 8  ;;  %vm425_vm3 = vcmp.ge.s32.totalorder %v4682_v46, 16  ;;  %vm1048_vm9 = vcmp.lt.s32.totalorder %v4682_v46, 96 }
  0xf1   :  { %v3754_v50 = vpop.f32.mrb[0].mxu0 }
  0xf2   :  { %v262_v51 = vpop.f32.mrb[1].mxu0  ;;  %v507_v55 = vsel %vm475_vm1, %v3754_v50, -inf }
  0xf3   :  { %v476_v58 = vsel %vm475_vm1, %v262_v51, -inf }
  0xf5   :  { %v3757_v52 = vpop.f32.mrb[2].mxu0 }
  0xf6   :  { %v272_v53 = vpop.f32.mrb[3].mxu0  ;;  %v508_v63 = vsel %vm475_vm1, %v3757_v52, -inf }
  0xf7   :  { %v477_v2 = vsel %vm475_vm1, %v272_v53, -inf }
  0xf9   :  { %v3760_v54 = vpop.f32.mrb[4].mxu0 }
  0xfa   :  { %v509_v56 = vsel %vm475_vm1, %v3760_v54, -inf  ;;  %v282_v57 = vpop.f32.mrb[5].mxu0 }
  0xfb   :  { %v510_v59 = vmax.f32 %v507_v55, %v509_v56  ;;  %v478_v60 = vsel %vm475_vm1, %v282_v57, -inf }
  0xfc   :  { %v479_v61 = vmax.f32 %v476_v58, %v478_v60  ;;  %v4404_v58 = vmov 15  }
  0xfd   :  { %v3763_v62 = vpop.f32.mrb[6].mxu0 }
  0xfe   :  { %v511_v0 = vsel %vm475_vm1, %v3763_v62, -inf  ;;  %v292_v1 = vpop.f32.mrb[7].mxu0 }
  0xff   :  { %v512_v3 = vmax.f32 %v508_v63, %v511_v0  ;;  %v480_v4 = vsel %vm475_vm1, %v292_v1, -inf }
 0x100   :  { %v481_v5 = vmax.f32 %v477_v2, %v480_v4 }
 0x101   :  { %v3766_v6 = vpop.f32.mrb[8].mxu0 }
 0x102   :  { %v513_v7 = vsel %vm475_vm1, %v3766_v6, -inf  ;;  %v302_v8 = vpop.f32.mrb[9].mxu0 }
 0x103   :  { %v514_v9 = vmax.f32 %v510_v59, %v513_v7  ;;  %v482_v10 = vsel %vm475_vm1, %v302_v8, -inf  ;;  %v424_v59 = vsel %vm423_vm2, 14, %v4404_v58  ;;  %v3514_v58 = vld [vmem:[%s5328_s6] ss:$0 sm:$0xff] }
 0x104   :  { %v483_v11 = vmax.f32 %v479_v61, %v482_v10  ;;  %v426_v1 = vsel %vm425_vm3, 13, %v424_v59 }
 0x105   :  { %v3769_v12 = vpop.f32.mrb[10].mxu0  ;;  %vm441_vm4 = vcmp.ge.s32.totalorder %v426_v1, 14  ;;  %vm442_vm5 = vcmp.ge.s32.totalorder %v426_v1, 15 }
 0x106   :  { %v515_v13 = vsel %vm475_vm1, %v3769_v12, -inf  ;;  %v312_v14 = vpop.f32.mrb[11].mxu0 }
 0x107   :  { %v516_v15 = vmax.f32 %v512_v3, %v515_v13  ;;  %v484_v16 = vsel %vm475_vm1, %v312_v14, -inf }
 0x108   :  { %v485_v17 = vmax.f32 %v481_v5, %v484_v16 }
 0x109   :  { %v3772_v18 = vpop.f32.mrb[12].mxu0 }
 0x10a   :  { %v517_v19 = vsel %vm475_vm1, %v3772_v18, -inf  ;;  %v322_v20 = vpop.f32.mrb[13].mxu0 }
 0x10b   :  { %v518_v21 = vmax.f32 %v514_v9, %v517_v19  ;;  %v486_v22 = vsel %vm475_vm1, %v322_v20, -inf }
 0x10c   :  { %v487_v23 = vmax.f32 %v483_v11, %v486_v22 }
 0x10d   :  { %v3775_v24 = vpop.f32.mrb[14].mxu0 }
 0x10e   :  { %v519_v25 = vsel %vm475_vm1, %v3775_v24, -inf  ;;  %v332_v26 = vpop.f32.mrb[15].mxu0  ;;  %v3508_v24 = vld [vmem:[%s5324_s2] ss:$0 sm:$0xff]  ;;  %s4408_s2 = smov 32  }
 0x10f   :  { %v520_v27 = vmax.f32 %v516_v15, %v519_v25  ;;  %v488_v28 = vsel %vm475_vm1, %v332_v26, -inf }
 0x110   :  { %v489_v29 = vmax.f32 %v485_v17, %v488_v28 }
 0x111   :  { %v3778_v30 = vpop.f32.mrb[16].mxu0 }
 0x112   :  { %v521_v31 = vsel %vm475_vm1, %v3778_v30, -inf  ;;  %v342_v32 = vpop.f32.mrb[17].mxu0  ;;  %v656_v30 = vld [vmem:[%s5327_s5 + $0x18] sm:$0xff] }
 0x113   :  { %v522_v33 = vmax.f32 %v518_v21, %v521_v31  ;;  %v490_v34 = vsel %vm475_vm1, %v342_v32, -inf }
 0x114   :  { %v491_v35 = vmax.f32 %v487_v23, %v490_v34  ;;  %v3517_v34 = vld [vmem:[%s5325_s3 + $0x20] sm:$0xff] }
 0x115   :  { %v3781_v36 = vpop.f32.mrb[18].mxu0 }
 0x116   :  { %v523_v37 = vsel %vm475_vm1, %v3781_v36, -inf  ;;  %v352_v38 = vpop.f32.mrb[19].mxu0 }
 0x117   :  { %v524_v40 = vmax.f32 %v520_v27, %v523_v37  ;;  %v492_v41 = vsel %vm475_vm1, %v352_v38, -inf  ;;  %v3520_v37 = vld [vmem:[%s5325_s3 + $0x38] sm:$0xff] }
 0x118   :  { %v493_v42 = vmax.f32 %v489_v29, %v492_v41  ;;  %v655_v29 = vld [vmem:[%s5327_s5 + $0x10] sm:$0xff]  ;;  %v3528_v41 = vld [vmem:[%s5327_s5 + $0x28] sm:$0xff] }
 0x119   :  { %v3784_v43 = vpop.f32.mrb[20].mxu0 }
 0x11a   :  { %v525_v44 = vsel %vm475_vm1, %v3784_v43, -inf  ;;  %v362_v45 = vpop.f32.mrb[21].mxu0  ;;  %v3509_v43 = vld [vmem:[%s5326_s4] ss:$0 sm:$0xff] }
 0x11b   :  { %v526_v47 = vmax.f32 %v522_v33, %v525_v44  ;;  %v494_v48 = vsel %vm475_vm1, %v362_v45, -inf  ;;  %v4073_v33 = vpack.c.bf16 %v656_v30, %v655_v29 }
 0x11c   :  { %v495_v50 = vmax.f32 %v491_v35, %v494_v48  ;;  %v3518_v35 = vld [vmem:[%s5325_s3 + $0x28] sm:$0xff] }
 0x11d   :  { %v3787_v51 = vpop.f32.mrb[22].mxu0  ;;  %v4077_v36 = vpack.c.bf16 %v3518_v35, %v3517_v34 }
 0x11e   :  { %v527_v52 = vsel %vm475_vm1, %v3787_v51, -inf  ;;  %v372_v53 = vpop.f32.mrb[23].mxu0 }
 0x11f   :  { %v528_v54 = vmax.f32 %v524_v40, %v527_v52  ;;  %v496_v55 = vsel %vm475_vm1, %v372_v53, -inf  ;;  %v3527_v40 = vld [vmem:[%s5327_s5 + $0x20] sm:$0xff] }
 0x120   :  { %v497_v56 = vmax.f32 %v493_v42, %v496_v55  ;;  %v4085_v42 = vpack.c.bf16 %v3528_v41, %v3527_v40 }
 0x121   :  { %v3790_v57 = vpop.f32.mrb[24].mxu0 }
 0x122   :  { %v529_v60 = vsel %vm475_vm1, %v3790_v57, -inf  ;;  %v382_v61 = vpop.f32.mrb[25].mxu0 }
 0x123   :  { %v530_v62 = vmax.f32 %v526_v47, %v529_v60  ;;  %v498_v63 = vsel %vm475_vm1, %v382_v61, -inf }
 0x124   :  { %v499_v0 = vmax.f32 %v495_v50, %v498_v63 }
 0x125   :  { %v3793_v2 = vpop.f32.mrb[26].mxu0 }
 0x126   :  { %v531_v3 = vsel %vm475_vm1, %v3793_v2, -inf  ;;  %v392_v4 = vpop.f32.mrb[27].mxu0 }
 0x127   :  { %v532_v5 = vmax.f32 %v528_v54, %v531_v3  ;;  %v500_v6 = vsel %vm475_vm1, %v392_v4, -inf }
 0x128   :  { %v501_v7 = vmax.f32 %v497_v56, %v500_v6 }
 0x129   :  { %v3796_v8 = vpop.f32.mrb[28].mxu0 }
 0x12a   :  { %v472_v9 = vsel %vm441_vm4, %v3796_v8, -1e+30  ;;  %v402_v10 = vpop.f32.mrb[29].mxu0  ;;  %v3530_v8 = vld [vmem:[%s5327_s5 + $0x38] sm:$0xff] }
 0x12b   :  { %v533_v11 = vsel %vm475_vm1, %v472_v9, -inf  ;;  %v471_v12 = vsel %vm441_vm4, %v402_v10, -1e+30 }
 0x12c   :  { %v534_v13 = vmax.f32 %v530_v62, %v533_v11  ;;  %v502_v14 = vsel %vm475_vm1, %v471_v12, -inf  ;;  %v953_v12 = vld [vmem:[%s5329_s7] sm:$0xff] }
 0x12d   :  { %v503_v15 = vmax.f32 %v499_v0, %v502_v14  ;;  %v3799_v16 = vpop.f32.mrb[30].mxu0 }
 0x12e   :  { %v474_v17 = vsel %vm442_vm5, %v3799_v16, -1e+30  ;;  %v412_v18 = vpop.f32.mrb[31].mxu0  ;;  %v956_v16 = vld [vmem:[%s5329_s7 + $0x18] sm:$0xff] }
 0x12f   :  { %v535_v19 = vsel %vm475_vm1, %v474_v17, -inf  ;;  %v473_v20 = vsel %vm442_vm5, %v412_v18, -1e+30  ;;  %v3522_v18 = vld [vmem:[%s5326_s4 + $0x1] ss:$0 sm:$0xff] }
 0x130   :  { %v536_v21 = vmax.f32 %v532_v5, %v535_v19  ;;  %v504_v22 = vsel %vm475_vm1, %v473_v20, -inf }
 0x131   :  { %v505_v23 = vmax.f32 %v501_v7, %v504_v22  ;;  %v3529_v7 = vld [vmem:[%s5327_s5 + $0x30] sm:$0xff] }
 0x132   :  { %v537_v25 = vmax.f32 %v534_v13, %v536_v21  ;;  %v4089_v11 = vpack.c.bf16 %v3530_v8, %v3529_v7  ;;  %v954_v13 = vld [vmem:[%s5329_s7 + $0x8] sm:$0xff] }
 0x133   :  { %v506_v26 = vmax.f32 %v503_v15, %v505_v23  ;;  %v4093_v14 = vpack.c.bf16 %v954_v13, %v953_v12  ;;  %v955_v15 = vld [vmem:[%s5329_s7 + $0x10] sm:$0xff] }
 0x134   :  { %v546_v27 = vadd.f32 %v3508_v24, %v537_v25  ;;  %v4097_v17 = vpack.c.bf16 %v956_v16, %v955_v15 }
 0x135   :  { %v545_v28 = vadd.f32 %v3508_v24, %v506_v26 }
 0x136   :  { %v548_v32 = vmax.f32 %v546_v27, 0.0 }
 0x137   :  { %v547_v31 = vmax.f32 %v545_v28, 0.0 }
 0x139   :  { %3808 = vmatprep.mubr.msk.f32.mxu1 %vm475_vm1, %v547_v31 }
 0x13a   :  { %3809 = vmatmul.mubr.msk.f32.vlgmr.msra.gmra.mrb[0].mxu1 %vm475_vm1, %v548_v32 }
 0x13b   :  { %4072 = vmatpush3.bf16.msra.mxu1 %v4657_v49  ;;  %3819 = vmatprep.mubr.msk.f32.mxu1 %vm475_vm1, %v547_v31  ;;  %v3519_v49 = vld [vmem:[%s5325_s3 + $0x30] sm:$0xff]  ;;  %s3122_s3 = sld [smem:[#allocation6]] }
 0x13c   :  { %4074 = vmatprep.subr.bf16.mxu1 %v4073_v33  ;;  %v4081_v38 = vpack.c.bf16 %v3520_v37, %v3519_v49 }
 0x13f   :  { %4076 = vmatpush3.bf16.msra.mxu1 %v4073_v33 }
 0x140   :  { %4078 = vmatprep.subr.bf16.mxu1 %v4077_v36 }
 0x142   :  { %3820 = vmatmul.mubr.msk.f32.vlgmr.msra.gmra.mrb[2].mxu1 %vm475_vm1, %v548_v32 }
 0x143   :  { %4080 = vmatpush3.bf16.msra.mxu1 %v4077_v36 }
 0x144   :  { %4082 = vmatprep.subr.bf16.mxu1 %v4081_v38 }
 0x147   :  { %4084 = vmatpush3.bf16.msra.mxu1 %v4081_v38 }
 0x148   :  { %4086 = vmatprep.subr.bf16.mxu1 %v4085_v42 }
 0x20d   :  { %v3810_v44 = vpop.f32.mrb[0].mxu1 }
 0x20e   :  { %v638_v45 = vadd.f32 %v3810_v44, %v3509_v43  ;;  %v632_v47 = vpop.f32.mrb[1].mxu1 }
 0x20f   :  { %v633_v48 = vadd.f32 %v3509_v43, %v632_v47  ;;  %v1062_v47 = vld [vmem:[%s5331_s9] sm:$0xff] }
 0x210   :  { %v3513_v50 = vmul.f32 -1.442695, %v638_v45 }
 0x211   :  { %v3512_v51 = vmul.f32 -1.442695, %v633_v48  ;;  %v1063_v48 = vld [vmem:[%s5331_s9 + $0x8] sm:$0xff]  ;;  %s3580_s9 = sld [smem:[#allocation6 + $0x2]] }
 0x212   :  { %4221 = vpow2.f32 %v3513_v50  ;;  %v4101_v50 = vpack.c.bf16 %v1063_v48, %v1062_v47 }
 0x213   :  { %4223 = vpow2.f32 %v3512_v51  ;;  %v1154_v51 = vld [vmem:[%s5333_s11] sm:$0xff] }
 0x215   :  { %v3821_v52 = vpop.f32.mrb[2].mxu1 }
 0x216   :  { %v730_v53 = vpop.f32.mrb[3].mxu1  ;;  %v736_v59 = vadd.f32 %v3821_v52, %v3514_v58  ;;  %v1155_v52 = vld [vmem:[%s5333_s11 + $0x8] sm:$0xff] }
 0x217   :  { %v731_v60 = vadd.f32 %v3514_v58, %v730_v53  ;;  %v4405_v53 = vmov 0.0|0.0   ;;  %v4407_v58 = vmov 0.0  }
 0x218   :  { %v740_v61 = vmax.f32 %v736_v59, 0.0  ;;  %4123 = vmatprep.subr.bf16.mxu0 %v4405_v53  ;;  %3903 = vmatprep.mubr.msk.f32.mxu0 %vm4406_vm6, %v4407_v58  ;;  %v3535_v59 = vld [vmem:[%s5330_s8] ss:$0 sm:$0xff] }
 0x219   :  { %v739_v63 = vmax.f32 %v731_v60, 0.0 }
 0x21c   :  { %v4222_v54 = vpop.eup %4221 }
 0x21d   :  { %v4224_v55 = vpop.eup %4223  ;;  %v648_v56 = vadd.f32 1.0, %v4222_v54  ;;  %v4778_v54 = vpack.c.bf16 %v1155_v52, %v1154_v51 }
 0x21e   :  { %v647_v57 = vadd.f32 1.0, %v4224_v55  ;;  %v1156_v55 = vld [vmem:[%s5333_s11 + $0x10] sm:$0xff] }
 0x21f   :  { %4225 = vrcp.f32 %v648_v56  ;;  %v1157_v56 = vld [vmem:[%s5333_s11 + $0x18] sm:$0xff]  ;;  %4125 = vmatpush3.bf16.msra.mxu0 %v4778_v54 }
 0x220   :  { %4227 = vrcp.f32 %v647_v57  ;;  %4126 = vmatprep.subr.bf16.mxu0 %v4405_v53  ;;  %v4789_v57 = vpack.c.bf16 %v1157_v56, %v1156_v55 }
 0x223   :  { %4128 = vmatpush3.bf16.msra.mxu0 %v4789_v57 }
 0x224   :  { %4135 = vmatprep.subr.bf16.mxu0 %v4405_v53 }
 0x229   :  { %v4226_v62 = vpop.eup %4225 }
 0x22a   :  { %v4228_v0 = vpop.eup %4227  ;;  %v742_v1 = vmul.f32 %v4226_v62, %v740_v61  ;;  %v744_v2 = vsub.f32 1.0, %v4226_v62 }
 0x22b   :  { %v741_v3 = vmul.f32 %v4228_v0, %v739_v63  ;;  %v743_v4 = vsub.f32 1.0, %v4228_v0  ;;  %v3538_v0 = vld [vmem:[%s5334_s12] ss:$0 sm:$0xff] }
 0x22c   :  { %v746_v5 = vmul.f32 %v744_v2, %v548_v32 }
 0x22d   :  { %v745_v6 = vmul.f32 %v743_v4, %v547_v31  ;;  %v3532_v31 = vld [vmem:[%s5328_s6 + $0x1] ss:$0 sm:$0xff] }
 0x22e   :  { %v748_v9 = vadd.f32 %v746_v5, %v742_v1  ;;  %v1053_v5 = vand.u32 31, %v4682_v46 }
 0x22f   :  { %v747_v10 = vadd.f32 %v745_v6, %v741_v3 }
 0x230   :  { %vm4819_vm8 = vcmp.lt.s32.totalorder %v1053_v5, 16 }
 0x231   :  { %3830 = vmatprep.mubr.msk.f32.mxu1 %vm475_vm1, %v747_v10 }
 0x232   :  { %3831 = vmatmul.mubr.msk.f32.vlgmr.msra.gmra.mrb[4].mxu1 %vm475_vm1, %v748_v9 }
 0x233   :  { %4088 = vmatpush3.bf16.msra.mxu1 %v4085_v42  ;;  %3841 = vmatprep.mubr.msk.f32.mxu1 %vm475_vm1, %v747_v10 }
 0x234   :  { %4090 = vmatprep.subr.bf16.mxu1 %v4089_v11 }
 0x237   :  { %4092 = vmatpush3.bf16.msra.mxu1 %v4089_v11 }
 0x238   :  { %4094 = vmatprep.subr.bf16.mxu1 %v4093_v14 }
 0x23a   :  { %3842 = vmatmul.mubr.msk.f32.vlgmr.msra.gmra.mrb[6].mxu1 %vm475_vm1, %v748_v9 }
 0x23b   :  { %4096 = vmatpush3.bf16.msra.mxu1 %v4093_v14 }
 0x23c   :  { %4098 = vmatprep.subr.bf16.mxu1 %v4097_v17 }
 0x23f   :  { %4100 = vmatpush3.bf16.msra.mxu1 %v4097_v17 }
 0x240   :  { %4102 = vmatprep.subr.bf16.mxu1 %v4101_v50 }
 0x305   :  { %v3832_v19 = vpop.f32.mrb[4].mxu1 }
 0x306   :  { %v840_v20 = vadd.f32 %v3832_v19, %v3522_v18  ;;  %v834_v21 = vpop.f32.mrb[5].mxu1 }
 0x307   :  { %v835_v22 = vadd.f32 %v3522_v18, %v834_v21 }
 0x308   :  { %v3526_v23 = vmul.f32 -1.442695, %v840_v20 }
 0x309   :  { %v3525_v24 = vmul.f32 -1.442695, %v835_v22 }
 0x30a   :  { %4229 = vpow2.f32 %v3526_v23 }
 0x30b   :  { %4231 = vpow2.f32 %v3525_v24 }
 0x30d   :  { %v3843_v25 = vpop.f32.mrb[6].mxu1 }
 0x30e   :  { %v934_v26 = vpop.f32.mrb[7].mxu1  ;;  %v940_v32 = vadd.f32 %v3843_v25, %v3532_v31 }
 0x30f   :  { %v935_v33 = vadd.f32 %v3532_v31, %v934_v26 }
 0x310   :  { %v944_v34 = vmax.f32 %v940_v32, 0.0 }
 0x311   :  { %v943_v36 = vmax.f32 %v935_v33, 0.0 }
 0x314   :  { %v4230_v27 = vpop.eup %4229 }
 0x315   :  { %v4232_v28 = vpop.eup %4231  ;;  %v850_v29 = vadd.f32 1.0, %v4230_v27 }
 0x316   :  { %v849_v30 = vadd.f32 1.0, %v4232_v28 }
 0x317   :  { %4233 = vrcp.f32 %v850_v29 }
 0x318   :  { %4235 = vrcp.f32 %v849_v30 }
 0x321   :  { %v4234_v35 = vpop.eup %4233 }
 0x322   :  { %v4236_v49 = vpop.eup %4235  ;;  %v946_v37 = vmul.f32 %v4234_v35, %v944_v34  ;;  %v948_v38 = vsub.f32 1.0, %v4234_v35 }
 0x323   :  { %v945_v40 = vmul.f32 %v4236_v49, %v943_v36  ;;  %v947_v41 = vsub.f32 1.0, %v4236_v49 }
 0x324   :  { %v950_v42 = vmul.f32 %v948_v38, %v748_v9 }
 0x325   :  { %v949_v43 = vmul.f32 %v947_v41, %v747_v10 }
 0x326   :  { %v952_v44 = vadd.f32 %v950_v42, %v946_v37 }
 0x327   :  { %v951_v45 = vadd.f32 %v949_v43, %v945_v40 }
 0x329   :  { %3852 = vmatprep.mubr.msk.f32.mxu1 %vm475_vm1, %v951_v45 }
 0x32a   :  { %3853 = vmatmul.mubr.msk.f32.vlgmr.msra.gmra.mrb[8].mxu1 %vm475_vm1, %v952_v44 }
 0x32b   :  { %4104 = vmatpush3.bf16.msra.mxu1 %v4101_v50 }
 0x32c   :  { %4105 = vmatprep.subr.bf16.mxu1 %v4405_v53 }
 0x3fd   :  { %v3854_v60 = vpop.f32.mrb[8].mxu1 }
 0x3fe   :  { %v1042_v61 = vadd.f32 %v3854_v60, %v3535_v59  ;;  %v1036_v62 = vpop.f32.mrb[9].mxu1 }
 0x3ff   :  { %v1037_v63 = vadd.f32 %v3535_v59, %v1036_v62 }
 0x400   :  { %1047 = vst.msk [vmem:[#allocation2 + $0x8] sm:$0xff] %vm1045_vm7, %v1042_v61 }
 0x401   :  { %1046 = vst.msk [vmem:[#allocation2] sm:$0xff] %vm1045_vm7, %v1037_v63  ;;  %3859 = vmatprep.mubr.msk.f32.mxu1 %vm1045_vm7, %v1037_v63 }
 0x402   :  { %3860 = vmatmul.mubr.msk.f32.vlgmr.msra.gmra.mrb[10].mxu1 %vm1045_vm7, %v1042_v61 }
 0x403   :  { %4107 = vmatpush3.bf16.msra.mxu1 %v4778_v54  ;;  %3870 = vmatprep.mubr.msk.f32.mxu1 %vm4406_vm6, %v4407_v58 }
 0x404   :  { %4108 = vmatprep.subr.bf16.mxu1 %v4405_v53 }
 0x407   :  { %4110 = vmatpush3.bf16.msra.mxu1 %v4789_v57 }
 0x408   :  { %4111 = vmatprep.subr.bf16.mxu1 %v4405_v53 }
 0x40a   :  { %3871 = vmatmul.mubr.f32.vlgmr.msra.gmra.mrb[12].mxu1 %v4407_v58 }
 0x40b   :  { %4113 = vmatpush3.bf16.msra.mxu1 %v4778_v54  ;;  %3881 = vmatprep.mubr.msk.f32.mxu1 %vm4406_vm6, %v4407_v58 }
 0x40c   :  { %4114 = vmatprep.subr.bf16.mxu1 %v4405_v53 }
 0x40f   :  { %4116 = vmatpush3.bf16.msra.mxu1 %v4789_v57 }
 0x410   :  { %4117 = vmatprep.subr.bf16.mxu1 %v4405_v53 }
 0x4d5   :  { %v3861_v1 = vpop.f32.mrb[10].mxu1 }
 0x4d6   :  { %v1149_v2 = vadd.f32 %v3861_v1, %v3538_v0  ;;  %v1143_v3 = vpop.f32.mrb[11].mxu1 }
 0x4d7   :  { %v1144_v4 = vadd.f32 %v3538_v0, %v1143_v3 }
 0x4d8   :  { %1153 = vst [vmem:[#allocation3 + $0x8] sm:$0xff] %v1149_v2 }
 0x4d9   :  { %1152 = vst [vmem:[#allocation3] sm:$0xff] %v1144_v4 }
 0x4dd   :  { %v1230_v6 = vpop.f32.mrb[12].mxu1 }
 0x4de   :  { %v3872_v8 = vpop.f32.mrb[13].mxu1 }
 0x4df   :  { %v1159_v9 = vld [vmem:[#allocation3 + $0xe] sm:$0x3]  ;;  %v1269_v29 = vld [vmem:[#allocation3 + $0xc] sm:$0x3]  ;;  %v1376_v52 = vld [vmem:[#allocation3 + $0xa] sm:$0x3] }
 0x4e0   :  { %v1158_v10 = vld [vmem:[#allocation3] sm:$0x3]  ;;  %v1268_v28 = vld [vmem:[#allocation3 + $0x2] sm:$0x3]  ;;  %v1375_v51 = vld [vmem:[#allocation3 + $0x4] sm:$0x3] }
 0x4e1   :  { %v1160_v11 = vsel %vm4819_vm8, %v1158_v10, %v1159_v9  ;;  %v1270_v30 = vsel %vm4819_vm8, %v1268_v28, %v1269_v29  ;;  %v1377_v55 = vsel %vm4819_vm8, %v1375_v51, %v1376_v52 }
 0x4e2   :  { %v1234_v12 = vadd.f32 %v1230_v6, %v1160_v11 }
 0x4e4   :  { %v3541_v13 = vmul.f32 -1.442695, %v1234_v12 }
 0x4e6   :  { %4237 = vpow2.f32 %v3541_v13  ;;  %v1482_v13 = vld [vmem:[#allocation3 + $0x6] sm:$0x3] }
 0x4e7   :  { %4239 = vtanh.f32 %v1234_v12 }
 0x4f0   :  { %v4238_v14 = vpop.eup %4237 }
 0x4f1   :  { %v1238_v15 = vadd.f32 1.0, %v4238_v14  ;;  %v4240_v16 = vpop.eup %4239  ;;  %v1483_v14 = vld [vmem:[#allocation3 + $0x8] sm:$0x3] }
 0x4f3   :  { %4241 = vrcp.f32 %v1238_v15  ;;  %v1484_v15 = vsel %vm4819_vm8, %v1482_v13, %v1483_v14 }
 0x4fd   :  { %v4242_v17 = vpop.eup %4241 }
 0x4fe   :  { %v1242_v18 = vsel %vm1048_vm9, %v4242_v17, %v4240_v16 }
 0x4ff   :  { %1245 = vrot.lane.b32.xlu0 %v1242_v18, %s4408_s2  ;;  %v1243_v21 = vmul.f32 0.0, %v1242_v18 }
 0x571   :  { %v1246_v19 = vpop.permute.xlu0 %1245 }
 0x572   :  { %v1248_v20 = vmul.f32 %v1246_v19, %v1242_v18 }
 0x574   :  { %1250 = vrot.lane.b32.xlu0 %v1248_v20, %s4408_s2 }
 0x5e6   :  { %v1251_v22 = vpop.permute.xlu0 %1250 }
 0x5e7   :  { %v1253_v23 = vadd.f32 %v1251_v22, %v1243_v21 }
 0x5e9   :  { %4243 = vtanh.f32 %v1253_v23 }
 0x5f3   :  { %v4244_v24 = vpop.eup %4243 }
 0x5f4   :  { %1256 = vrot.lane.b32.xlu1 %v4244_v24, %s4408_s2 }
 0x666   :  { %v1257_v25 = vpop.permute.xlu1 %1256 }
 0x667   :  { %v1259_v26 = vmul.f32 %v1257_v25, %v1242_v18 }
 0x669   :  { %1261 = vrot.lane.b32.xlu1 %v1259_v26, %s4409_s21 }
 0x6db   :  { %v1262_v27 = vpop.permute.xlu1 %1261 }
 0x6dc   :  { %3882 = vmatmul.mubr.msk.f32.vlgmr.msra.gmra.mrb[14].mxu1 %vm475_vm1, %v1262_v27  ;;  %1265 = vst.msk [vmem:[#allocation4] sm:$0x3] %vm1264_vm10, %v1262_v27 }
 0x6dd   :  { %1267 = vst.msk [vmem:[#allocation4 + $0xe] sm:$0x3] %vm1266_vm11, %v1262_v27  ;;  %4119 = vmatpush3.bf16.msra.mxu1 %v4778_v54  ;;  %3892 = vmatprep.mubr.msk.f32.mxu1 %vm4406_vm6, %v4407_v58 }
 0x6de   :  { %4120 = vmatprep.subr.bf16.mxu1 %v4405_v53 }
 0x6e1   :  { %4122 = vmatpush3.bf16.msra.mxu1 %v4789_v57 }
 0x6e2   :  { %4129 = vmatprep.subr.bf16.mxu1 %v4405_v53 }
 0x7af   :  { %v1339_v31 = vpop.f32.mrb[14].mxu1 }
 0x7b0   :  { %v1343_v32 = vadd.f32 %v1339_v31, %v1270_v30  ;;  %v3883_v33 = vpop.f32.mrb[15].mxu1 }
 0x7b2   :  { %v3543_v34 = vmul.f32 -1.442695, %v1343_v32 }
 0x7b4   :  { %4245 = vpow2.f32 %v3543_v34  ;;  %v1589_v34 = vld [vmem:[#allocation3 + $0x8] sm:$0x3] }
 0x7b5   :  { %4247 = vtanh.f32 %v1343_v32 }
 0x7be   :  { %v4246_v35 = vpop.eup %4245 }
 0x7bf   :  { %v1347_v36 = vadd.f32 1.0, %v4246_v35  ;;  %v4248_v49 = vpop.eup %4247  ;;  %v1590_v35 = vld [vmem:[#allocation3 + $0x6] sm:$0x3] }
 0x7c1   :  { %4249 = vrcp.f32 %v1347_v36  ;;  %v1591_v36 = vsel %vm4819_vm8, %v1589_v34, %v1590_v35 }
 0x7cb   :  { %v4250_v37 = vpop.eup %4249 }
 0x7cc   :  { %v1351_v38 = vsel %vm1048_vm9, %v4250_v37, %v4248_v49 }
 0x7cd   :  { %1354 = vrot.lane.b32.xlu0 %v1351_v38, %s4408_s2  ;;  %v1352_v42 = vmul.f32 %v1351_v38, %v1253_v23 }
 0x83f   :  { %v1355_v40 = vpop.permute.xlu0 %1354 }
 0x840   :  { %v1357_v41 = vmul.f32 %v1355_v40, %v1351_v38 }
 0x842   :  { %1359 = vrot.lane.b32.xlu1 %v1357_v41, %s4408_s2 }
 0x8b4   :  { %v1360_v43 = vpop.permute.xlu1 %1359 }
 0x8b5   :  { %v1362_v44 = vadd.f32 %v1360_v43, %v1352_v42 }
 0x8b7   :  { %4251 = vtanh.f32 %v1362_v44 }
 0x8c1   :  { %v4252_v45 = vpop.eup %4251 }
 0x8c2   :  { %1365 = vrot.lane.b32.xlu0 %v4252_v45, %s4408_s2 }
 0x934   :  { %v1366_v47 = vpop.permute.xlu0 %1365 }
 0x935   :  { %v1368_v48 = vmul.f32 %v1366_v47, %v1351_v38 }
 0x937   :  { %1370 = vrot.lane.b32.xlu1 %v1368_v48, %s4409_s21 }
 0x9a9   :  { %v1371_v50 = vpop.permute.xlu1 %1370 }
 0x9aa   :  { %1373 = vst.msk [vmem:[#allocation4 + $0x2] sm:$0x3] %vm1264_vm10, %v1371_v50  ;;  %3893 = vmatmul.mubr.msk.f32.vlgmr.msra.gmra.mrb[16].mxu1 %vm475_vm1, %v1371_v50 }
 0x9ab   :  { %1374 = vst.msk [vmem:[#allocation4 + $0xc] sm:$0x3] %vm1266_vm11, %v1371_v50  ;;  %4131 = vmatpush3.bf16.msra.mxu1 %v4778_v54  ;;  %3914 = vmatprep.mubr.msk.f32.mxu1 %vm4406_vm6, %v4407_v58 }
 0x9ac   :  { %4132 = vmatprep.subr.bf16.mxu1 %v4405_v53 }
 0x9af   :  { %4134 = vmatpush3.bf16.msra.mxu1 %v4789_v57 }
 0x9b0   :  { %4141 = vmatprep.subr.bf16.mxu1 %v4405_v53 }
 0xa7d   :  { %v1446_v56 = vpop.f32.mrb[16].mxu1 }
 0xa7e   :  { %v1450_v59 = vadd.f32 %v1446_v56, %v1377_v55  ;;  %v3894_v60 = vpop.f32.mrb[17].mxu1 }
 0xa80   :  { %v3545_v61 = vmul.f32 -1.442695, %v1450_v59 }
 0xa82   :  { %4253 = vpow2.f32 %v3545_v61  ;;  %v1696_v61 = vld [vmem:[#allocation3 + $0xa] sm:$0x3] }
 0xa83   :  { %4255 = vtanh.f32 %v1450_v59 }
 0xa8c   :  { %v4254_v62 = vpop.eup %4253 }
 0xa8d   :  { %v1454_v63 = vadd.f32 1.0, %v4254_v62  ;;  %v4256_v0 = vpop.eup %4255  ;;  %v1697_v62 = vld [vmem:[#allocation3 + $0x4] sm:$0x3] }
 0xa8f   :  { %4257 = vrcp.f32 %v1454_v63  ;;  %v1698_v63 = vsel %vm4819_vm8, %v1696_v61, %v1697_v62  ;;  %v2019_v62 = vld [vmem:[%s5332_s10] sm:$0xff] }
 0xa99   :  { %v4258_v1 = vpop.eup %4257 }
 0xa9a   :  { %v1458_v2 = vsel %vm1048_vm9, %v4258_v1, %v4256_v0 }
 0xa9b   :  { %1461 = vrot.lane.b32.xlu0 %v1458_v2, %s4408_s2  ;;  %v1459_v5 = vmul.f32 %v1458_v2, %v1362_v44 }
 0xb0d   :  { %v1462_v3 = vpop.permute.xlu0 %1461 }
 0xb0e   :  { %v1464_v4 = vmul.f32 %v1462_v3, %v1458_v2 }
 0xb10   :  { %1466 = vrot.lane.b32.xlu1 %v1464_v4, %s4408_s2 }
 0xb82   :  { %v1467_v6 = vpop.permute.xlu1 %1466 }
 0xb83   :  { %v1469_v8 = vadd.f32 %v1467_v6, %v1459_v5 }
 0xb85   :  { %4259 = vtanh.f32 %v1469_v8 }
 0xb8f   :  { %v4260_v9 = vpop.eup %4259 }
 0xb90   :  { %1472 = vrot.lane.b32.xlu0 %v4260_v9, %s4408_s2 }
 0xc02   :  { %v1473_v10 = vpop.permute.xlu0 %1472 }
 0xc03   :  { %v1475_v11 = vmul.f32 %v1473_v10, %v1458_v2 }
 0xc05   :  { %1477 = vrot.lane.b32.xlu1 %v1475_v11, %s4409_s21 }
 0xc77   :  { %v1478_v12 = vpop.permute.xlu1 %1477 }
 0xc78   :  { %1480 = vst.msk [vmem:[#allocation4 + $0x4] sm:$0x3] %vm1264_vm10, %v1478_v12  ;;  %3904 = vmatmul.mubr.msk.f32.vlgmr.msra.gmra.mrb[32].mxu0 %vm475_vm1, %v1478_v12 }
 0xc79   :  { %1481 = vst.msk [vmem:[#allocation4 + $0xa] sm:$0x3] %vm1266_vm11, %v1478_v12  ;;  %4137 = vmatpush3.bf16.msra.mxu0 %v4778_v54  ;;  %3925 = vmatprep.mubr.msk.f32.mxu0 %vm4406_vm6, %v4407_v58 }
 0xc7a   :  { %4138 = vmatprep.subr.bf16.mxu0 %v4405_v53 }
 0xc7d   :  { %4140 = vmatpush3.bf16.msra.mxu0 %v4789_v57 }
 0xc7e   :  { %4147 = vmatprep.subr.bf16.mxu0 %v4405_v53 }
 0xd4b   :  { %v1553_v16 = vpop.f32.mrb[32].mxu0 }
 0xd4c   :  { %v1557_v17 = vadd.f32 %v1553_v16, %v1484_v15  ;;  %v3905_v18 = vpop.f32.mrb[33].mxu0 }
 0xd4d   :  { %v1804_v18 = vld [vmem:[#allocation3 + $0x2] sm:$0x3] }
 0xd4e   :  { %v3547_v19 = vmul.f32 -1.442695, %v1557_v17 }
 0xd50   :  { %4261 = vpow2.f32 %v3547_v19 }
 0xd51   :  { %4263 = vtanh.f32 %v1557_v17  ;;  %v1803_v17 = vld [vmem:[#allocation3 + $0xc] sm:$0x3] }
 0xd52   :  { %v1805_v19 = vsel %vm4819_vm8, %v1803_v17, %v1804_v18 }
 0xd5a   :  { %v4262_v20 = vpop.eup %4261 }
 0xd5b   :  { %v1561_v21 = vadd.f32 1.0, %v4262_v20  ;;  %v4264_v22 = vpop.eup %4263 }
 0xd5d   :  { %4265 = vrcp.f32 %v1561_v21 }
 0xd67   :  { %v4266_v23 = vpop.eup %4265 }
 0xd68   :  { %v1565_v24 = vsel %vm1048_vm9, %v4266_v23, %v4264_v22 }
 0xd69   :  { %1568 = vrot.lane.b32.xlu0 %v1565_v24, %s4408_s2  ;;  %v1566_v27 = vmul.f32 %v1565_v24, %v1469_v8 }
 0xddb   :  { %v1569_v25 = vpop.permute.xlu0 %1568 }
 0xddc   :  { %v1571_v26 = vmul.f32 %v1569_v25, %v1565_v24 }
 0xdde   :  { %1573 = vrot.lane.b32.xlu1 %v1571_v26, %s4408_s2 }
 0xe50   :  { %v1574_v28 = vpop.permute.xlu1 %1573 }
 0xe51   :  { %v1576_v29 = vadd.f32 %v1574_v28, %v1566_v27 }
 0xe53   :  { %4267 = vtanh.f32 %v1576_v29 }
 0xe5d   :  { %v4268_v30 = vpop.eup %4267 }
 0xe5e   :  { %1579 = vrot.lane.b32.xlu0 %v4268_v30, %s4408_s2 }
 0xed0   :  { %v1580_v31 = vpop.permute.xlu0 %1579 }
 0xed1   :  { %v1582_v32 = vmul.f32 %v1580_v31, %v1565_v24 }
 0xed3   :  { %1584 = vrot.lane.b32.xlu1 %v1582_v32, %s4409_s21 }
 0xf45   :  { %v1585_v33 = vpop.permute.xlu1 %1584 }
 0xf46   :  { %1587 = vst.msk [vmem:[#allocation4 + $0x6] sm:$0x3] %vm1264_vm10, %v1585_v33  ;;  %3915 = vmatmul.mubr.msk.f32.vlgmr.msra.gmra.mrb[18].mxu1 %vm475_vm1, %v1585_v33 }
 0xf47   :  { %1588 = vst.msk [vmem:[#allocation4 + $0x8] sm:$0x3] %vm1266_vm11, %v1585_v33  ;;  %4143 = vmatpush3.bf16.msra.mxu1 %v4778_v54  ;;  %3936 = vmatprep.mubr.msk.f32.mxu1 %vm4406_vm6, %v4407_v58 }
 0xf48   :  { %4144 = vmatprep.subr.bf16.mxu1 %v4405_v53 }
 0xf4b   :  { %4146 = vmatpush3.bf16.msra.mxu1 %v4789_v57 }
0x1019   :  { %v1660_v49 = vpop.f32.mrb[18].mxu1 }
0x101a   :  { %v1664_v37 = vadd.f32 %v1660_v49, %v1591_v36  ;;  %v3916_v38 = vpop.f32.mrb[19].mxu1 }
0x101b   :  { %v1911_v38 = vld [vmem:[#allocation3] sm:$0x3] }
0x101c   :  { %v3549_v40 = vmul.f32 -1.442695, %v1664_v37 }
0x101e   :  { %4269 = vpow2.f32 %v3549_v40 }
0x101f   :  { %4271 = vtanh.f32 %v1664_v37  ;;  %v1910_v37 = vld [vmem:[#allocation3 + $0xe] sm:$0x3] }
0x1020   :  { %v1912_v40 = vsel %vm4819_vm8, %v1910_v37, %v1911_v38 }
0x1028   :  { %v4270_v41 = vpop.eup %4269 }
0x1029   :  { %v1668_v42 = vadd.f32 1.0, %v4270_v41  ;;  %v4272_v43 = vpop.eup %4271 }
0x102b   :  { %4273 = vrcp.f32 %v1668_v42 }
0x1035   :  { %v4274_v44 = vpop.eup %4273 }
0x1036   :  { %v1672_v45 = vsel %vm1048_vm9, %v4274_v44, %v4272_v43 }
0x1037   :  { %1675 = vrot.lane.b32.xlu0 %v1672_v45, %s4408_s2  ;;  %v1673_v50 = vmul.f32 %v1672_v45, %v1576_v29 }
0x10a9   :  { %v1676_v47 = vpop.permute.xlu0 %1675 }
0x10aa   :  { %v1678_v48 = vmul.f32 %v1676_v47, %v1672_v45 }
0x10ac   :  { %1680 = vrot.lane.b32.xlu1 %v1678_v48, %s4408_s2 }
0x111e   :  { %v1681_v51 = vpop.permute.xlu1 %1680 }
0x111f   :  { %v1683_v52 = vadd.f32 %v1681_v51, %v1673_v50 }
0x1121   :  { %4275 = vtanh.f32 %v1683_v52 }
0x112b   :  { %v4276_v55 = vpop.eup %4275 }
0x112c   :  { %1686 = vrot.lane.b32.xlu0 %v4276_v55, %s4408_s2 }
0x119e   :  { %v1687_v56 = vpop.permute.xlu0 %1686 }
0x119f   :  { %v1689_v59 = vmul.f32 %v1687_v56, %v1672_v45 }
0x11a1   :  { %1691 = vrot.lane.b32.xlu1 %v1689_v59, %s4409_s21 }
0x1213   :  { %v1692_v60 = vpop.permute.xlu1 %1691 }
0x1214   :  { %1694 = vst.msk [vmem:[#allocation4 + $0x8] sm:$0x3] %vm1264_vm10, %v1692_v60  ;;  %3926 = vmatmul.mubr.msk.f32.vlgmr.msra.gmra.mrb[34].mxu0 %vm475_vm1, %v1692_v60 }
0x1215   :  { %1695 = vst.msk [vmem:[#allocation4 + $0x6] sm:$0x3] %vm1266_vm11, %v1692_v60  ;;  %4149 = vmatpush3.bf16.msra.mxu0 %v4778_v54  ;;  %3947 = vmatprep.mubr.msk.f32.mxu0 %vm4406_vm6, %v4407_v58 }
0x1216   :  { %4150 = vmatprep.subr.bf16.mxu0 %v4405_v53 }
0x1219   :  { %4152 = vmatpush3.bf16.msra.mxu0 %v4789_v57 }
0x121a   :  { %4161 = vmatprep.subr.bf16.mxu0 %v4405_v53 }
0x12e7   :  { %v1767_v0 = vpop.f32.mrb[34].mxu0 }
0x12e8   :  { %v1771_v1 = vadd.f32 %v1767_v0, %v1698_v63  ;;  %v3927_v2 = vpop.f32.mrb[35].mxu0  ;;  %v2020_v63 = vld [vmem:[%s5332_s10 + $0x8] sm:$0xff]  ;;  %v2021_v0 = vld [vmem:[%s5332_s10 + $0x10] sm:$0xff] }
0x12e9   :  { %v2022_v2 = vld [vmem:[%s5332_s10 + $0x18] sm:$0xff] }
0x12ea   :  { %v3551_v3 = vmul.f32 -1.442695, %v1771_v1 }
0x12ec   :  { %4277 = vpow2.f32 %v3551_v3  ;;  %v4157_v3 = vpack.c.bf16 %v2022_v2, %v2021_v0 }
0x12ed   :  { %4279 = vtanh.f32 %v1771_v1  ;;  %v4153_v1 = vpack.c.bf16 %v2020_v63, %v2019_v62 }
0x12ef   :  { %4154 = vmatprep.subr.bf16.mxu1 %v4153_v1 }
0x12f6   :  { %v4278_v54 = vpop.eup %4277 }
0x12f7   :  { %v1775_v4 = vadd.f32 1.0, %v4278_v54  ;;  %v4280_v5 = vpop.eup %4279  ;;  %v3560_v54 = vld [vmem:[%s5333_s11 + $0x20] sm:$0xff] }
0x12f9   :  { %4281 = vrcp.f32 %v1775_v4  ;;  %v3561_v4 = vld [vmem:[%s5333_s11 + $0x28] sm:$0xff] }
0x1303   :  { %v4282_v6 = vpop.eup %4281 }
0x1304   :  { %v1779_v57 = vsel %vm1048_vm9, %v4282_v6, %v4280_v5  ;;  %v3562_v5 = vld [vmem:[%s5333_s11 + $0x30] sm:$0xff] }
0x1305   :  { %1782 = vrot.lane.b32.xlu0 %v1779_v57, %s4408_s2  ;;  %v1780_v10 = vmul.f32 %v1779_v57, %v1683_v52 }
0x1377   :  { %v1783_v8 = vpop.permute.xlu0 %1782 }
0x1378   :  { %v1785_v9 = vmul.f32 %v1783_v8, %v1779_v57  ;;  %v3563_v8 = vld [vmem:[%s5333_s11 + $0x38] sm:$0xff] }
0x137a   :  { %1787 = vrot.lane.b32.xlu1 %v1785_v9, %s4408_s2 }
0x13ec   :  { %v1788_v11 = vpop.permute.xlu1 %1787 }
0x13ed   :  { %v1790_v12 = vadd.f32 %v1788_v11, %v1780_v10  ;;  %v4967_v10 = vpack.c.bf16 %v3563_v8, %v3562_v5 }
0x13ef   :  { %4283 = vtanh.f32 %v1790_v12 }
0x13f9   :  { %v4284_v13 = vpop.eup %4283 }
0x13fa   :  { %1793 = vrot.lane.b32.xlu0 %v4284_v13, %s4408_s2 }
0x146c   :  { %v1794_v14 = vpop.permute.xlu0 %1793 }
0x146d   :  { %v1796_v15 = vmul.f32 %v1794_v14, %v1779_v57  ;;  %v4961_v57 = vpack.c.bf16 %v3561_v4, %v3560_v54 }
0x146f   :  { %1798 = vrot.lane.b32.xlu1 %v1796_v15, %s4409_s21 }
0x14e1   :  { %v1799_v16 = vpop.permute.xlu1 %1798 }
0x14e2   :  { %1801 = vst.msk [vmem:[#allocation4 + $0xa] sm:$0x3] %vm1264_vm10, %v1799_v16  ;;  %3937 = vmatmul.mubr.msk.f32.vlgmr.msra.gmra.mrb[20].mxu1 %vm475_vm1, %v1799_v16 }
0x14e3   :  { %1802 = vst.msk [vmem:[#allocation4 + $0x4] sm:$0x3] %vm1266_vm11, %v1799_v16  ;;  %4156 = vmatpush3.bf16.msra.mxu1 %v4153_v1  ;;  %v3557_v16 = vld [vmem:[%s5334_s12 + $0x1] ss:$0 sm:$0xff]  ;;  %s4410_s12 = smov 16  }
0x14e4   :  { %4158 = vmatprep.subr.bf16.mxu1 %v4157_v3 }
0x14e7   :  { %4160 = vmatpush3.bf16.msra.mxu1 %v4157_v3 }
0x14e8   :  { %4167 = vmatprep.subr.bf16.mxu1 %v4405_v53 }
0x14ea   :  { %v2859_v46 = vld [vmem:[#allocation4 + $0x4] sm:$0x3] }
0x15b5   :  { %v1874_v20 = vpop.f32.mrb[20].mxu1 }
0x15b6   :  { %v1878_v21 = vadd.f32 %v1874_v20, %v1805_v19  ;;  %v3938_v22 = vpop.f32.mrb[21].mxu1 }
0x15b8   :  { %v3553_v23 = vmul.f32 -1.442695, %v1878_v21 }
0x15ba   :  { %4285 = vpow2.f32 %v3553_v23 }
0x15bb   :  { %4287 = vtanh.f32 %v1878_v21 }
0x15c4   :  { %v4286_v24 = vpop.eup %4285 }
0x15c5   :  { %v1882_v25 = vadd.f32 1.0, %v4286_v24  ;;  %v4288_v26 = vpop.eup %4287 }
0x15c7   :  { %4289 = vrcp.f32 %v1882_v25 }
0x15d1   :  { %v4290_v27 = vpop.eup %4289 }
0x15d2   :  { %v1886_v28 = vsel %vm1048_vm9, %v4290_v27, %v4288_v26 }
0x15d3   :  { %1889 = vrot.lane.b32.xlu0 %v1886_v28, %s4408_s2  ;;  %v1887_v31 = vmul.f32 %v1886_v28, %v1790_v12 }
0x1645   :  { %v1890_v29 = vpop.permute.xlu0 %1889 }
0x1646   :  { %v1892_v30 = vmul.f32 %v1890_v29, %v1886_v28 }
0x1648   :  { %1894 = vrot.lane.b32.xlu1 %v1892_v30, %s4408_s2 }
0x16ba   :  { %v1895_v32 = vpop.permute.xlu1 %1894 }
0x16bb   :  { %v1897_v33 = vadd.f32 %v1895_v32, %v1887_v31 }
0x16bd   :  { %4291 = vtanh.f32 %v1897_v33 }
0x16c7   :  { %v4292_v34 = vpop.eup %4291 }
0x16c8   :  { %1900 = vrot.lane.b32.xlu0 %v4292_v34, %s4408_s2 }
0x173a   :  { %v1901_v35 = vpop.permute.xlu0 %1900 }
0x173b   :  { %v1903_v36 = vmul.f32 %v1901_v35, %v1886_v28 }
0x173d   :  { %1905 = vrot.lane.b32.xlu1 %v1903_v36, %s4409_s21 }
0x17af   :  { %v1906_v49 = vpop.permute.xlu1 %1905 }
0x17b0   :  { %1908 = vst.msk [vmem:[#allocation4 + $0xc] sm:$0x3] %vm1264_vm10, %v1906_v49  ;;  %3948 = vmatmul.mubr.msk.f32.vlgmr.msra.gmra.mrb[36].mxu0 %vm475_vm1, %v1906_v49 }
0x17b1   :  { %1909 = vst.msk [vmem:[#allocation4 + $0x2] sm:$0x3] %vm1266_vm11, %v1906_v49  ;;  %3969 = vmatprep.mubr.msk.f32.mxu0 %vm4406_vm6, %v4407_v58  ;;  %4163 = vmatpush3.bf16.msra.mxu0 %v4961_v57 }
0x17b2   :  { %4164 = vmatprep.subr.bf16.mxu0 %v4405_v53 }
0x17b5   :  { %4166 = vmatpush3.bf16.msra.mxu0 %v4967_v10 }
0x17b6   :  { %4173 = vmatprep.subr.bf16.mxu0 %v4405_v53 }
0x17b8   :  { %3970 = vmatmul.mubr.f32.vlgmr.msra.gmra.mrb[38].mxu0 %v4407_v58 }
0x17b9   :  { %4175 = vmatpush3.bf16.msra.mxu0 %v4961_v57  ;;  %3991 = vmatprep.mubr.msk.f32.mxu0 %vm4406_vm6, %v4407_v58 }
0x17ba   :  { %4176 = vmatprep.subr.bf16.mxu0 %v4405_v53 }
0x17bd   :  { %4178 = vmatpush3.bf16.msra.mxu0 %v4967_v10 }
0x17be   :  { %4185 = vmatprep.subr.bf16.mxu0 %v4405_v53 }
0x1883   :  { %v1981_v41 = vpop.f32.mrb[36].mxu0 }
0x1884   :  { %v1985_v42 = vadd.f32 %v1981_v41, %v1912_v40  ;;  %v3949_v43 = vpop.f32.mrb[37].mxu0 }
0x1886   :  { %v3555_v44 = vmul.f32 -1.442695, %v1985_v42 }
0x1888   :  { %4293 = vpow2.f32 %v3555_v44 }
0x1889   :  { %4295 = vtanh.f32 %v1985_v42 }
0x188b   :  { %v2188_v14 = vpop.f32.mrb[38].mxu0 }
0x188c   :  { %v3971_v15 = vpop.f32.mrb[39].mxu0 }
0x1892   :  { %v4294_v45 = vpop.eup %4293 }
0x1893   :  { %v1989_v47 = vadd.f32 1.0, %v4294_v45  ;;  %v4296_v48 = vpop.eup %4295 }
0x1895   :  { %4297 = vrcp.f32 %v1989_v47 }
0x189f   :  { %v4298_v50 = vpop.eup %4297 }
0x18a0   :  { %v1993_v51 = vsel %vm1048_vm9, %v4298_v50, %v4296_v48 }
0x18a1   :  { %1996 = vrot.lane.b32.xlu0 %v1993_v51, %s4408_s2  ;;  %v1994_v56 = vmul.f32 %v1993_v51, %v1897_v33 }
0x1913   :  { %v1997_v52 = vpop.permute.xlu0 %1996 }
0x1914   :  { %v1999_v55 = vmul.f32 %v1997_v52, %v1993_v51 }
0x1916   :  { %2001 = vrot.lane.b32.xlu1 %v1999_v55, %s4408_s2 }
0x1988   :  { %v2002_v59 = vpop.permute.xlu1 %2001 }
0x1989   :  { %v2004_v60 = vadd.f32 %v2002_v59, %v1994_v56 }
0x198b   :  { %4299 = vtanh.f32 %v2004_v60 }
0x1995   :  { %v4300_v61 = vpop.eup %4299 }
0x1996   :  { %2007 = vrot.lane.b32.xlu0 %v4300_v61, %s4408_s2 }
0x1a08   :  { %v2008_v6 = vpop.permute.xlu0 %2007 }
0x1a09   :  { %v2010_v9 = vmul.f32 %v2008_v6, %v1993_v51 }
0x1a0b   :  { %2012 = vrot.lane.b32.xlu1 %v2010_v9, %s4409_s21 }
0x1a7d   :  { %v2013_v11 = vpop.permute.xlu1 %2012 }
0x1a7e   :  { %2015 = vst.msk [vmem:[#allocation4 + $0xe] sm:$0x3] %vm1264_vm10, %v2013_v11 }
0x1a7f   :  { %2016 = vst.msk [vmem:[#allocation4] sm:$0x3] %vm1266_vm11, %v2013_v11 }
0x1a85   :  { %v2018_v13 = vld [vmem:[#allocation4 + $0x8] sm:$0xff] }
0x1a86   :  { %v2017_v12 = vld [vmem:[#allocation4] sm:$0xff]  ;;  %v2229_v7 = vld [vmem:[#allocation4 + $0xe] sm:$0x3] }
0x1a87   :  { %3958 = vmatprep.mubr.msk.f32.mxu1 %vm475_vm1, %v2017_v12 }
0x1a88   :  { %3959 = vmatmul.mubr.msk.f32.vlgmr.msra.gmra.mrb[22].mxu1 %vm475_vm1, %v2018_v13 }
0x1a89   :  { %4169 = vmatpush3.bf16.msra.mxu1 %v4961_v57  ;;  %3980 = vmatprep.mubr.msk.f32.mxu1 %vm4406_vm6, %v4407_v58 }
0x1a8a   :  { %4170 = vmatprep.subr.bf16.mxu1 %v4405_v53 }
0x1a8d   :  { %4172 = vmatpush3.bf16.msra.mxu1 %v4967_v10 }
0x1a8e   :  { %4179 = vmatprep.subr.bf16.mxu1 %v4405_v53 }
0x1b5b   :  { %v3960_v17 = vpop.f32.mrb[22].mxu1 }
0x1b5c   :  { %v2109_v18 = vadd.f32 %v3960_v17, %v3557_v16  ;;  %v2103_v19 = vpop.f32.mrb[23].mxu1 }
0x1b5d   :  { %v2104_v20 = vadd.f32 %v3557_v16, %v2103_v19 }
0x1b5e   :  { %2113 = vst [vmem:[#allocation3 + $0x8] sm:$0xff] %v2109_v18 }
0x1b5f   :  { %2112 = vst [vmem:[#allocation3] sm:$0xff] %v2104_v20 }
0x1b65   :  { %v2120_v21 = vld [vmem:[#allocation3 + $0xe] sm:$0x3]  ;;  %v2241_v41 = vld [vmem:[#allocation3 + $0xc] sm:$0x3]  ;;  %v2367_v54 = vld [vmem:[#allocation3 + $0xa] sm:$0x3] }
0x1b66   :  { %v2119_v22 = vld [vmem:[#allocation3] sm:$0x3]  ;;  %v2240_v40 = vld [vmem:[#allocation3 + $0x2] sm:$0x3]  ;;  %v2366_v3 = vld [vmem:[#allocation3 + $0x4] sm:$0x3] }
0x1b67   :  { %v2121_v23 = vsel %vm4819_vm8, %v2119_v22, %v2120_v21  ;;  %v2242_v42 = vsel %vm4819_vm8, %v2240_v40, %v2241_v41  ;;  %v2368_v4 = vsel %vm4819_vm8, %v2366_v3, %v2367_v54 }
0x1b68   :  { %v2192_v24 = vadd.f32 %v2188_v14, %v2121_v23 }
0x1b6a   :  { %v3564_v25 = vmul.f32 -1.442695, %v2192_v24 }
0x1b6c   :  { %4301 = vpow2.f32 %v3564_v25  ;;  %v2492_v25 = vld [vmem:[#allocation3 + $0x6] sm:$0x3] }
0x1b6d   :  { %4303 = vtanh.f32 %v2192_v24 }
0x1b76   :  { %v4302_v26 = vpop.eup %4301 }
0x1b77   :  { %v2196_v27 = vadd.f32 1.0, %v4302_v26  ;;  %v4304_v28 = vpop.eup %4303  ;;  %v2493_v26 = vld [vmem:[#allocation3 + $0x8] sm:$0x3] }
0x1b79   :  { %4305 = vrcp.f32 %v2196_v27  ;;  %v2494_v27 = vsel %vm4819_vm8, %v2492_v25, %v2493_v26 }
0x1b83   :  { %v4306_v29 = vpop.eup %4305 }
0x1b84   :  { %v2200_v30 = vsel %vm1048_vm9, %v4306_v29, %v4304_v28 }
0x1b85   :  { %2203 = vrot.lane.b32.xlu0 %v2200_v30, %s4408_s2  ;;  %v2201_v33 = vmul.f32 0.0, %v2200_v30 }
0x1bf7   :  { %v2204_v31 = vpop.permute.xlu0 %2203 }
0x1bf8   :  { %v2206_v32 = vmul.f32 %v2204_v31, %v2200_v30 }
0x1bfa   :  { %2208 = vrot.lane.b32.xlu1 %v2206_v32, %s4408_s2 }
0x1c6c   :  { %v2209_v34 = vpop.permute.xlu1 %2208 }
0x1c6d   :  { %v2211_v35 = vadd.f32 %v2209_v34, %v2201_v33 }
0x1c6f   :  { %4307 = vtanh.f32 %v2211_v35 }
0x1c79   :  { %v4308_v36 = vpop.eup %4307 }
0x1c7a   :  { %2214 = vrot.lane.b32.xlu0 %v4308_v36, %s4408_s2 }
0x1cec   :  { %v2215_v49 = vpop.permute.xlu0 %2214 }
0x1ced   :  { %v5000_v37 = vmul.f32 %v2215_v49, %v2200_v30 }
0x1cef   :  { %2244 = vrot.lane.b32.xlu1 %v5000_v37, %s4409_s21 }
0x1d61   :  { %v2245_v38 = vpop.permute.xlu1 %2244 }
0x1d62   :  { %3981 = vmatmul.mubr.msk.f32.vlgmr.msra.gmra.mrb[24].mxu1 %vm475_vm1, %v2245_v38 }
0x1d63   :  { %4181 = vmatpush3.bf16.msra.mxu1 %v4961_v57  ;;  %4002 = vmatprep.mubr.msk.f32.mxu1 %vm4406_vm6, %v4407_v58 }
0x1d64   :  { %4182 = vmatprep.subr.bf16.mxu1 %v4405_v53 }
0x1d67   :  { %4184 = vmatpush3.bf16.msra.mxu1 %v4967_v10 }
0x1d68   :  { %4191 = vmatprep.subr.bf16.mxu1 %v4405_v53 }
0x1e35   :  { %v2314_v43 = vpop.f32.mrb[24].mxu1 }
0x1e36   :  { %v2318_v44 = vadd.f32 %v2314_v43, %v2242_v42  ;;  %v3982_v45 = vpop.f32.mrb[25].mxu1 }
0x1e38   :  { %v3566_v47 = vmul.f32 -1.442695, %v2318_v44 }
0x1e3a   :  { %4309 = vpow2.f32 %v3566_v47 }
0x1e3b   :  { %4311 = vtanh.f32 %v2318_v44 }
0x1e44   :  { %v4310_v48 = vpop.eup %4309 }
0x1e45   :  { %v2322_v50 = vadd.f32 1.0, %v4310_v48  ;;  %v4312_v51 = vpop.eup %4311  ;;  %v2618_v48 = vld [vmem:[#allocation3 + $0x8] sm:$0x3] }
0x1e47   :  { %4313 = vrcp.f32 %v2322_v50  ;;  %v2619_v50 = vld [vmem:[#allocation3 + $0x6] sm:$0x3] }
0x1e51   :  { %v4314_v52 = vpop.eup %4313 }
0x1e52   :  { %v2326_v55 = vsel %vm1048_vm9, %v4314_v52, %v4312_v51  ;;  %v2620_v51 = vsel %vm4819_vm8, %v2618_v48, %v2619_v50 }
0x1e53   :  { %2329 = vrot.lane.b32.xlu0 %v2326_v55, %s4408_s2  ;;  %v2327_v60 = vmul.f32 %v2326_v55, %v2211_v35 }
0x1ec5   :  { %v2330_v56 = vpop.permute.xlu0 %2329 }
0x1ec6   :  { %v2332_v59 = vmul.f32 %v2330_v56, %v2326_v55 }
0x1ec8   :  { %2334 = vrot.lane.b32.xlu1 %v2332_v59, %s4408_s2 }
0x1f3a   :  { %v2335_v61 = vpop.permute.xlu1 %2334 }
0x1f3b   :  { %v2337_v62 = vadd.f32 %v2335_v61, %v2327_v60 }
0x1f3d   :  { %4315 = vtanh.f32 %v2337_v62 }
0x1f47   :  { %v4316_v63 = vpop.eup %4315 }
0x1f48   :  { %2340 = vrot.lane.b32.xlu0 %v4316_v63, %s4408_s2 }
0x1fba   :  { %v2341_v0 = vpop.permute.xlu0 %2340 }
0x1fbb   :  { %v5018_v1 = vmul.f32 %v2341_v0, %v2326_v55 }
0x1fbd   :  { %2370 = vrot.lane.b32.xlu1 %v5018_v1, %s4409_s21 }
0x202f   :  { %v2371_v2 = vpop.permute.xlu1 %2370 }
0x2030   :  { %3992 = vmatmul.mubr.msk.f32.vlgmr.msra.gmra.mrb[40].mxu0 %vm475_vm1, %v2371_v2 }
0x2031   :  { %4187 = vmatpush3.bf16.msra.mxu0 %v4961_v57  ;;  %4013 = vmatprep.mubr.msk.f32.mxu0 %vm4406_vm6, %v4407_v58 }
0x2032   :  { %4188 = vmatprep.subr.bf16.mxu0 %v4405_v53 }
0x2035   :  { %4190 = vmatpush3.bf16.msra.mxu0 %v4967_v10 }
0x2036   :  { %4197 = vmatprep.subr.bf16.mxu0 %v4405_v53 }
0x2103   :  { %v2440_v5 = vpop.f32.mrb[40].mxu0 }
0x2104   :  { %v2444_v6 = vadd.f32 %v2440_v5, %v2368_v4  ;;  %v3993_v8 = vpop.f32.mrb[41].mxu0 }
0x2106   :  { %v3568_v9 = vmul.f32 -1.442695, %v2444_v6 }
0x2108   :  { %4317 = vpow2.f32 %v3568_v9 }
0x2109   :  { %4319 = vtanh.f32 %v2444_v6 }
0x2112   :  { %v4318_v11 = vpop.eup %4317 }
0x2113   :  { %v2448_v12 = vadd.f32 1.0, %v4318_v11  ;;  %v4320_v13 = vpop.eup %4319 }
0x2115   :  { %4321 = vrcp.f32 %v2448_v12  ;;  %v2744_v12 = vld [vmem:[#allocation3 + $0xa] sm:$0x3] }
0x211f   :  { %v4322_v14 = vpop.eup %4321 }
0x2120   :  { %v2452_v15 = vsel %vm1048_vm9, %v4322_v14, %v4320_v13  ;;  %v2745_v13 = vld [vmem:[#allocation3 + $0x4] sm:$0x3] }
0x2121   :  { %2455 = vrot.lane.b32.xlu0 %v2452_v15, %s4408_s2  ;;  %v2453_v18 = vmul.f32 %v2452_v15, %v2337_v62  ;;  %v2746_v14 = vsel %vm4819_vm8, %v2744_v12, %v2745_v13  ;;  %v2607_v12 = vld [vmem:[#allocation4 + $0x8] sm:$0x3]  ;;  %v2733_v13 = vld [vmem:[#allocation4 + $0x6] sm:$0x3] }
0x2193   :  { %v2456_v16 = vpop.permute.xlu0 %2455 }
0x2194   :  { %v2458_v17 = vmul.f32 %v2456_v16, %v2452_v15 }
0x2196   :  { %2460 = vrot.lane.b32.xlu1 %v2458_v17, %s4408_s2 }
0x2208   :  { %v2461_v19 = vpop.permute.xlu1 %2460 }
0x2209   :  { %v2463_v20 = vadd.f32 %v2461_v19, %v2453_v18 }
0x220b   :  { %4323 = vtanh.f32 %v2463_v20 }
0x2215   :  { %v4324_v21 = vpop.eup %4323 }
0x2216   :  { %2466 = vrot.lane.b32.xlu0 %v4324_v21, %s4408_s2 }
0x2288   :  { %v2467_v22 = vpop.permute.xlu0 %2466 }
0x2289   :  { %v5036_v23 = vmul.f32 %v2467_v22, %v2452_v15 }
0x228b   :  { %2496 = vrot.lane.b32.xlu1 %v5036_v23, %s4409_s21 }
0x22fd   :  { %v2497_v24 = vpop.permute.xlu1 %2496 }
0x22fe   :  { %4003 = vmatmul.mubr.msk.f32.vlgmr.msra.gmra.mrb[26].mxu1 %vm475_vm1, %v2497_v24 }
0x22ff   :  { %4193 = vmatpush3.bf16.msra.mxu1 %v4961_v57  ;;  %4024 = vmatprep.mubr.msk.f32.mxu1 %vm4406_vm6, %v4407_v58 }
0x2300   :  { %4194 = vmatprep.subr.bf16.mxu1 %v4405_v53 }
0x2303   :  { %4196 = vmatpush3.bf16.msra.mxu1 %v4967_v10 }
0x2304   :  { %4203 = vmatprep.subr.bf16.mxu1 %v4405_v53 }
0x23d1   :  { %v2566_v28 = vpop.f32.mrb[26].mxu1 }
0x23d2   :  { %v2570_v29 = vadd.f32 %v2566_v28, %v2494_v27  ;;  %v4004_v30 = vpop.f32.mrb[27].mxu1 }
0x23d3   :  { %v2870_v30 = vld [vmem:[#allocation3 + $0xc] sm:$0x3] }
0x23d4   :  { %v3570_v31 = vmul.f32 -1.442695, %v2570_v29 }
0x23d6   :  { %4325 = vpow2.f32 %v3570_v31  ;;  %v2871_v31 = vld [vmem:[#allocation3 + $0x2] sm:$0x3] }
0x23d7   :  { %4327 = vtanh.f32 %v2570_v29 }
0x23e0   :  { %v4326_v32 = vpop.eup %4325 }
0x23e1   :  { %v2574_v33 = vadd.f32 1.0, %v4326_v32  ;;  %v4328_v34 = vpop.eup %4327  ;;  %v2872_v32 = vsel %vm4819_vm8, %v2870_v30, %v2871_v31 }
0x23e3   :  { %4329 = vrcp.f32 %v2574_v33 }
0x23ed   :  { %v4330_v35 = vpop.eup %4329 }
0x23ee   :  { %v2578_v36 = vsel %vm1048_vm9, %v4330_v35, %v4328_v34 }
0x23ef   :  { %2581 = vrot.lane.b32.xlu0 %v2578_v36, %s4408_s2  ;;  %v2579_v40 = vmul.f32 %v2578_v36, %v2463_v20 }
0x2461   :  { %v2582_v49 = vpop.permute.xlu0 %2581 }
0x2462   :  { %v2584_v38 = vmul.f32 %v2582_v49, %v2578_v36 }
0x2464   :  { %2586 = vrot.lane.b32.xlu1 %v2584_v38, %s4408_s2 }
0x24d6   :  { %v2587_v41 = vpop.permute.xlu1 %2586 }
0x24d7   :  { %v2589_v42 = vadd.f32 %v2587_v41, %v2579_v40 }
0x24d9   :  { %4331 = vtanh.f32 %v2589_v42 }
0x24e3   :  { %v4332_v43 = vpop.eup %4331 }
0x24e4   :  { %2592 = vrot.lane.b32.xlu0 %v4332_v43, %s4408_s2 }
0x2556   :  { %v2593_v44 = vpop.permute.xlu0 %2592 }
0x2557   :  { %v5054_v45 = vmul.f32 %v2593_v44, %v2578_v36 }
0x2559   :  { %2622 = vrot.lane.b32.xlu1 %v5054_v45, %s4409_s21 }
0x25cb   :  { %v2623_v47 = vpop.permute.xlu1 %2622 }
0x25cc   :  { %4014 = vmatmul.mubr.msk.f32.vlgmr.msra.gmra.mrb[42].mxu0 %vm475_vm1, %v2623_v47 }
0x25cd   :  { %4199 = vmatpush3.bf16.msra.mxu0 %v4961_v57  ;;  %4035 = vmatprep.mubr.msk.f32.mxu0 %vm4406_vm6, %v4407_v58 }
0x25ce   :  { %4200 = vmatprep.subr.bf16.mxu0 %v4405_v53 }
0x25d1   :  { %4202 = vmatpush3.bf16.msra.mxu0 %v4967_v10 }
0x269f   :  { %v2692_v52 = vpop.f32.mrb[42].mxu0 }
0x26a0   :  { %v2696_v55 = vadd.f32 %v2692_v52, %v2620_v51  ;;  %v4015_v56 = vpop.f32.mrb[43].mxu0 }
0x26a2   :  { %v3572_v59 = vmul.f32 -1.442695, %v2696_v55 }
0x26a4   :  { %4333 = vpow2.f32 %v3572_v59  ;;  %v2996_v59 = vld [vmem:[#allocation3 + $0xe] sm:$0x3] }
0x26a5   :  { %4335 = vtanh.f32 %v2696_v55 }
0x26ae   :  { %v4334_v60 = vpop.eup %4333 }
0x26af   :  { %v2700_v61 = vadd.f32 1.0, %v4334_v60  ;;  %v4336_v62 = vpop.eup %4335  ;;  %v2997_v60 = vld [vmem:[#allocation3] sm:$0x3] }
0x26b1   :  { %4337 = vrcp.f32 %v2700_v61  ;;  %v2998_v61 = vsel %vm4819_vm8, %v2996_v59, %v2997_v60  ;;  %v3213_v60 = vld [vmem:[#allocation2 + $0x4] sm:$0x3] }
0x26bb   :  { %v4338_v63 = vpop.eup %4337 }
0x26bc   :  { %v2704_v0 = vsel %vm1048_vm9, %v4338_v63, %v4336_v62 }
0x26bd   :  { %2707 = vrot.lane.b32.xlu0 %v2704_v0, %s4408_s2  ;;  %v2705_v54 = vmul.f32 %v2704_v0, %v2589_v42 }
0x272f   :  { %v2708_v2 = vpop.permute.xlu0 %2707 }
0x2730   :  { %v2710_v3 = vmul.f32 %v2708_v2, %v2704_v0 }
0x2732   :  { %2712 = vrot.lane.b32.xlu1 %v2710_v3, %s4408_s2 }
0x27a4   :  { %v2713_v4 = vpop.permute.xlu1 %2712 }
0x27a5   :  { %v2715_v5 = vadd.f32 %v2713_v4, %v2705_v54 }
0x27a7   :  { %4339 = vtanh.f32 %v2715_v5 }
0x27b1   :  { %v4340_v6 = vpop.eup %4339 }
0x27b2   :  { %2718 = vrot.lane.b32.xlu0 %v4340_v6, %s4408_s2 }
0x2824   :  { %v2719_v8 = vpop.permute.xlu0 %2718 }
0x2825   :  { %v5071_v9 = vmul.f32 %v2719_v8, %v2704_v0  ;;  %v2355_v8 = vld [vmem:[#allocation4 + $0xc] sm:$0x3] }
0x2827   :  { %2748 = vrot.lane.b32.xlu1 %v5071_v9, %s4409_s21 }
0x2899   :  { %v2749_v11 = vpop.permute.xlu1 %2748 }
0x289a   :  { %4025 = vmatmul.mubr.msk.f32.vlgmr.msra.gmra.mrb[28].mxu1 %vm475_vm1, %v2749_v11  ;;  %v2481_v11 = vld [vmem:[#allocation4 + $0xa] sm:$0x3] }
0x289b   :  { %4205 = vmatpush3.bf16.msra.mxu1 %v4961_v57  ;;  %4046 = vmatprep.mubr.msk.f32.mxu1 %vm4406_vm6, %v4407_v58 }
0x289c   :  { %4206 = vmatprep.subr.bf16.mxu1 %v4405_v53 }
0x289f   :  { %4208 = vmatpush3.bf16.msra.mxu1 %v4967_v10 }
0x296d   :  { %v2818_v15 = vpop.f32.mrb[28].mxu1 }
0x296e   :  { %v2822_v16 = vadd.f32 %v2818_v15, %v2746_v14  ;;  %v4026_v17 = vpop.f32.mrb[29].mxu1  ;;  %v2985_v14 = vld [vmem:[#allocation4 + $0x2] sm:$0x3] }
0x296f   :  { %v2218_v17 = vld [vmem:[#allocation4] sm:$0x3] }
0x2970   :  { %v3574_v18 = vmul.f32 -1.442695, %v2822_v16 }
0x2972   :  { %4341 = vpow2.f32 %v3574_v18  ;;  %v2344_v18 = vld [vmem:[#allocation4 + $0x2] sm:$0x3] }
0x2973   :  { %4343 = vtanh.f32 %v2822_v16 }
0x297c   :  { %v4342_v19 = vpop.eup %4341 }
0x297d   :  { %v2826_v20 = vadd.f32 1.0, %v4342_v19  ;;  %v4344_v57 = vpop.eup %4343  ;;  %v2470_v19 = vld [vmem:[#allocation4 + $0x4] sm:$0x3] }
0x297f   :  { %4345 = vrcp.f32 %v2826_v20  ;;  %v2596_v20 = vld [vmem:[#allocation4 + $0x6] sm:$0x3] }
0x2989   :  { %v4346_v58 = vpop.eup %4345 }
0x298a   :  { %v2830_v53 = vsel %vm1048_vm9, %v4346_v58, %v4344_v57  ;;  %v2722_v57 = vld [vmem:[#allocation4 + $0x8] sm:$0x3]  ;;  %v2848_v58 = vld [vmem:[#allocation4 + $0xa] sm:$0x3] }
0x298b   :  { %2833 = vrot.lane.b32.xlu0 %v2830_v53, %s4408_s2  ;;  %v2831_v22 = vmul.f32 %v2830_v53, %v2715_v5 }
0x29fd   :  { %v2834_v10 = vpop.permute.xlu0 %2833 }
0x29fe   :  { %v2836_v21 = vmul.f32 %v2834_v10, %v2830_v53  ;;  %v3100_v10 = vld [vmem:[#allocation4 + $0xe] sm:$0x3] }
0x2a00   :  { %2838 = vrot.lane.b32.xlu1 %v2836_v21, %s4408_s2 }
0x2a72   :  { %v2839_v24 = vpop.permute.xlu1 %2838 }
0x2a73   :  { %v2841_v25 = vadd.f32 %v2839_v24, %v2831_v22 }
0x2a75   :  { %4347 = vtanh.f32 %v2841_v25 }
0x2a7f   :  { %v4348_v26 = vpop.eup %4347 }
0x2a80   :  { %2844 = vrot.lane.b32.xlu0 %v4348_v26, %s4408_s2 }
0x2af2   :  { %v2845_v27 = vpop.permute.xlu0 %2844 }
0x2af3   :  { %v5088_v28 = vmul.f32 %v2845_v27, %v2830_v53  ;;  %v2974_v53 = vld [vmem:[#allocation4 + $0xc] sm:$0x3] }
0x2af5   :  { %2874 = vrot.lane.b32.xlu1 %v5088_v28, %s4409_s21 }
0x2b67   :  { %v2875_v29 = vpop.permute.xlu1 %2874 }
0x2b68   :  { %4036 = vmatmul.mubr.msk.f32.vlgmr.msra.gmra.mrb[44].mxu0 %vm475_vm1, %v2875_v29 }
0x2c3b   :  { %v2944_v33 = vpop.f32.mrb[44].mxu0 }
0x2c3c   :  { %v2948_v34 = vadd.f32 %v2944_v33, %v2872_v32  ;;  %v4037_v35 = vpop.f32.mrb[45].mxu0 }
0x2c3e   :  { %v3576_v36 = vmul.f32 -1.442695, %v2948_v34 }
0x2c40   :  { %4349 = vpow2.f32 %v3576_v36 }
0x2c41   :  { %4351 = vtanh.f32 %v2948_v34 }
0x2c4a   :  { %v4350_v49 = vpop.eup %4349 }
0x2c4b   :  { %v2952_v38 = vadd.f32 1.0, %v4350_v49  ;;  %v4352_v40 = vpop.eup %4351 }
0x2c4d   :  { %4353 = vrcp.f32 %v2952_v38  ;;  %v3111_v38 = vld [vmem:[#allocation4] sm:$0x3] }
0x2c57   :  { %v4354_v41 = vpop.eup %4353 }
0x2c58   :  { %v2956_v42 = vsel %vm1048_vm9, %v4354_v41, %v4352_v40 }
0x2c59   :  { %2959 = vrot.lane.b32.xlu0 %v2956_v42, %s4408_s2  ;;  %v2957_v47 = vmul.f32 %v2956_v42, %v2841_v25 }
0x2ccb   :  { %v2960_v43 = vpop.permute.xlu0 %2959 }
0x2ccc   :  { %v2962_v44 = vmul.f32 %v2960_v43, %v2956_v42 }
0x2cce   :  { %2964 = vrot.lane.b32.xlu1 %v2962_v44, %s4408_s2 }
0x2d40   :  { %v2965_v48 = vpop.permute.xlu1 %2964 }
0x2d41   :  { %v2967_v50 = vadd.f32 %v2965_v48, %v2957_v47 }
0x2d43   :  { %4355 = vtanh.f32 %v2967_v50 }
0x2d4d   :  { %v4356_v51 = vpop.eup %4355 }
0x2d4e   :  { %2970 = vrot.lane.b32.xlu0 %v4356_v51, %s4408_s2 }
0x2dc0   :  { %v2971_v52 = vpop.permute.xlu0 %2970 }
0x2dc1   :  { %v5100_v55 = vmul.f32 %v2971_v52, %v2956_v42 }
0x2dc3   :  { %3000 = vrot.lane.b32.xlu1 %v5100_v55, %s4409_s21 }
0x2e35   :  { %v3001_v56 = vpop.permute.xlu1 %3000 }
0x2e36   :  { %4047 = vmatmul.mubr.msk.f32.vlgmr.msra.gmra.mrb[30].mxu1 %vm475_vm1, %v3001_v56 }
0x2f09   :  { %v3070_v62 = vpop.f32.mrb[30].mxu1 }
0x2f0a   :  { %v3074_v63 = vadd.f32 %v3070_v62, %v2998_v61  ;;  %v4048_v0 = vpop.f32.mrb[31].mxu1 }
0x2f0c   :  { %v3578_v2 = vmul.f32 -1.442695, %v3074_v63 }
0x2f0e   :  { %4357 = vpow2.f32 %v3578_v2 }
0x2f0f   :  { %4359 = vtanh.f32 %v3074_v63  ;;  %v5166_v63 = vld [vmem:[#allocation2 + $0x2] sm:$0x3] }
0x2f18   :  { %v4358_v3 = vpop.eup %4357 }
0x2f19   :  { %v3078_v54 = vadd.f32 1.0, %v4358_v3  ;;  %v4360_v4 = vpop.eup %4359 }
0x2f1b   :  { %4361 = vrcp.f32 %v3078_v54 }
0x2f25   :  { %v4362_v5 = vpop.eup %4361 }
0x2f26   :  { %v5109_v6 = vsel %vm1048_vm9, %v4362_v5, %v4360_v4 }
0x2f27   :  { %3085 = vrot.lane.b32.xlu0 %v5109_v6, %s4408_s2  ;;  %v3083_v21 = vmul.f32 %v5109_v6, %v2967_v50 }
0x2f2b   :  { %2231 = vrot.lane.b32.xlu0 %v2229_v7, %s4409_s21 }
0x2f2f   :  { %2357 = vrot.lane.b32.xlu0 %v2355_v8, %s4409_s21 }
0x2f33   :  { %2483 = vrot.lane.b32.xlu0 %v2481_v11, %s4409_s21 }
0x2f37   :  { %2609 = vrot.lane.b32.xlu0 %v2607_v12, %s4409_s21  ;;  %v5181_v12 = vld [vmem:[#allocation2 + $0x8] sm:$0x3] }
0x2f3b   :  { %2735 = vrot.lane.b32.xlu0 %v2733_v13, %s4409_s21 }
0x2f3f   :  { %2861 = vrot.lane.b32.xlu0 %v2859_v46, %s4409_s21 }
0x2f43   :  { %2987 = vrot.lane.b32.xlu0 %v2985_v14, %s4409_s21  ;;  %v5190_v14 = vld [vmem:[#allocation2 + $0xc] sm:$0x3] }
0x2f99   :  { %v3086_v15 = vpop.permute.xlu0 %3085 }
0x2f9a   :  { %v3088_v16 = vmul.f32 %v3086_v15, %v5109_v6 }
0x2f9c   :  { %3090 = vrot.lane.b32.xlu1 %v3088_v16, %s4408_s2  ;;  %v5195_v16 = vld [vmem:[#allocation2 + $0xe] sm:$0x3] }
0x2f9d   :  { %v2232_v26 = vpop.permute.xlu0 %2231 }
0x2f9e   :  { %v2234_v40 = vadd.f32 %v2232_v26, %v5000_v37 }
0x2fa0   :  { %2220 = vrot.lane.b32.xlu1 %v2218_v17, %s4409_s21 }
0x2fa1   :  { %v2358_v31 = vpop.permute.xlu0 %2357 }
0x2fa2   :  { %v2360_v44 = vadd.f32 %v2358_v31, %v5018_v1  ;;  %v3149_v31 = vshrl.u32 %v421_v39, 7 }
0x2fa4   :  { %2346 = vrot.lane.b32.xlu1 %v2344_v18, %s4409_s21 }
0x2fa5   :  { %v2484_v36 = vpop.permute.xlu0 %2483 }
0x2fa6   :  { %v2486_v50 = vadd.f32 %v2484_v36, %v5036_v23 }
0x2fa8   :  { %2472 = vrot.lane.b32.xlu1 %v2470_v19, %s4409_s21 }
0x2fa9   :  { %v2610_v43 = vpop.permute.xlu0 %2609 }
0x2faa   :  { %v2612_v56 = vadd.f32 %v2610_v43, %v5054_v45 }
0x2fac   :  { %2598 = vrot.lane.b32.xlu1 %v2596_v20, %s4409_s21 }
0x2fad   :  { %v2736_v51 = vpop.permute.xlu0 %2735 }
0x2fb0   :  { %2724 = vrot.lane.b32.xlu1 %v2722_v57, %s4409_s21 }
0x2fb1   :  { %v2862_v59 = vpop.permute.xlu0 %2861 }
0x2fb2   :  { %v2864_v61 = vadd.f32 %v2862_v59, %v5088_v28 }
0x2fb4   :  { %2850 = vrot.lane.b32.xlu1 %v2848_v58, %s4409_s21 }
0x2fb5   :  { %v2988_v62 = vpop.permute.xlu0 %2987 }
0x2fb8   :  { %2976 = vrot.lane.b32.xlu1 %v2974_v53, %s4409_s21 }
0x2fbc   :  { %3102 = vrot.lane.b32.xlu1 %v3100_v10, %s4409_s21 }
0x300e   :  { %v3091_v22 = vpop.permute.xlu1 %3090 }
0x300f   :  { %v3093_v24 = vadd.f32 %v3091_v22, %v3083_v21  ;;  %v4411_v21 = vmov 1966171168  }
0x3010   :  { %v3146_v22 = vunpack.c.l.s4 %v4411_v21  ;;  %v3134_v21 = vld [vmem:[#allocation4] sm:$0x3] }
0x3011   :  { %4363 = vtanh.f32 %v3093_v24  ;;  %v5209_v24 = vstv %s3122_s3 }
0x3012   :  { %v2221_v25 = vpop.permute.xlu1 %2220 }
0x3013   :  { %v2223_v27 = vadd.f32 %v2221_v25, %v5000_v37  ;;  %v3220_v25 = vld [vmem:[#allocation4 + $0x4] sm:$0x3] }
0x3015   :  { %2225 = vrot.lane.b32.xlu1 %v2223_v27, %s4409_s21 }
0x3016   :  { %v2347_v29 = vpop.permute.xlu1 %2346 }
0x3017   :  { %v2349_v30 = vadd.f32 %v2347_v29, %v5018_v1  ;;  %v5155_v1 = vld [vmem:[#allocation2] sm:$0x3]  ;;  %v5213_v29 = vstv %s3579_s16 }
0x3019   :  { %2351 = vrot.lane.b32.xlu1 %v2349_v30, %s4409_s21  ;;  %v3147_v30 = vunpack.c.0.s8 %v3146_v22 }
0x301a   :  { %v2473_v32 = vpop.permute.xlu1 %2472 }
0x301b   :  { %v4364_v33 = vpop.eup %4363  ;;  %v2475_v34 = vadd.f32 %v2473_v32, %v5036_v23  ;;  %v2738_v23 = vadd.f32 %v2736_v51, %v5071_v9  ;;  %v3221_v32 = vmul.f32 %v3220_v25, %v5213_v29  ;;  %v5226_v39 = vsub.s32 %v3147_v30, %v3149_v31  ;;  %v3425_v30 = vld [vmem:[#allocation4 + $0xe] sm:$0x3] }
0x301c   :  { %3096 = vrot.lane.b32.xlu0 %v4364_v33, %s4408_s2  ;;  %v3179_v33 = vld [vmem:[#allocation4 + $0x2] sm:$0x3] }
0x301d   :  { %2477 = vrot.lane.b32.xlu1 %v2475_v34, %s4409_s21 }
0x301e   :  { %v2599_v35 = vpop.permute.xlu1 %2598 }
0x301f   :  { %v2601_v49 = vadd.f32 %v2599_v35, %v5054_v45  ;;  %v2990_v45 = vadd.f32 %v2988_v62, %v5100_v55  ;;  %v5217_v35 = vstv %s3580_s9 }
0x3020   :  { %3113 = vrot.lane.b32.xlu0 %v3111_v38, %s4409_s21 }
0x3021   :  { %2603 = vrot.lane.b32.xlu1 %v2601_v49, %s4409_s21 }
0x3022   :  { %v2725_v41 = vpop.permute.xlu1 %2724 }
0x3023   :  { %v2727_v42 = vadd.f32 %v2725_v41, %v5071_v9  ;;  %v5170_v9 = vld [vmem:[#allocation2 + $0x6] sm:$0x3]  ;;  %v5222_v41 = vstv %s3581_s17 }
0x3024   :  { %2236 = vrot.lane.b32.xlu0 %v2234_v40, %s4409_s21 }
0x3025   :  { %2729 = vrot.lane.b32.xlu1 %v2727_v42, %s4409_s21  ;;  %v3180_v42 = vmul.f32 %v3179_v33, %v5213_v29 }
0x3026   :  { %v2851_v47 = vpop.permute.xlu1 %2850 }
0x3027   :  { %v2853_v48 = vadd.f32 %v2851_v47, %v5088_v28  ;;  %v3261_v47 = vld [vmem:[#allocation4 + $0x6] sm:$0x3] }
0x3028   :  { %2362 = vrot.lane.b32.xlu0 %v2360_v44, %s4409_s21 }
0x3029   :  { %2855 = vrot.lane.b32.xlu1 %v2853_v48, %s4409_s21 }
0x302a   :  { %v2977_v37 = vpop.permute.xlu1 %2976 }
0x302b   :  { %v2979_v52 = vadd.f32 %v2977_v37, %v5100_v55 }
0x302c   :  { %2488 = vrot.lane.b32.xlu0 %v2486_v50, %s4409_s21 }
0x302d   :  { %2981 = vrot.lane.b32.xlu1 %v2979_v52, %s4409_s21 }
0x302e   :  { %v3103_v0 = vpop.permute.xlu1 %3102 }
0x3030   :  { %2614 = vrot.lane.b32.xlu0 %v2612_v56, %s4409_s21 }
0x3031   :  { %3128 = vrot.lane.b32.xlu1 %v5155_v1, %s4410_s12 }
0x3034   :  { %2740 = vrot.lane.b32.xlu0 %v2738_v23, %s4409_s21  ;;  %v3262_v23 = vmul.f32 %v3261_v47, %v5213_v29 }
0x3035   :  { %3215 = vrot.lane.b32.xlu1 %v3213_v60, %s4410_s12 }
0x3038   :  { %2866 = vrot.lane.b32.xlu0 %v2864_v61, %s4409_s21 }
0x303c   :  { %2992 = vrot.lane.b32.xlu0 %v2990_v45, %s4409_s21 }
0x3040   :  { %3174 = vrot.lane.b32.xlu0 %v5166_v63, %s4410_s12 }
0x3044   :  { %3256 = vrot.lane.b32.xlu0 %v5170_v9, %s4410_s12 }
0x3087   :  { %v2226_v2 = vpop.permute.xlu1 %2225 }
0x3088   :  { %2228 = vst.msk [vmem:[#allocation5] sm:$0x3] %vm1264_vm10, %v2226_v2 }
0x308b   :  { %v2352_v28 = vpop.permute.xlu1 %2351 }
0x308c   :  { %2354 = vst.msk [vmem:[#allocation5 + $0x2] sm:$0x3] %vm1264_vm10, %v2352_v28 }
0x308e   :  { %v3097_v55 = vpop.permute.xlu0 %3096 }
0x308f   :  { %v3099_v3 = vmul.f32 %v3097_v55, %v5109_v6  ;;  %v2478_v54 = vpop.permute.xlu1 %2477  ;;  %v5186_v6 = vld [vmem:[#allocation2 + $0xa] sm:$0x3] }
0x3090   :  { %2480 = vst.msk [vmem:[#allocation5 + $0x4] sm:$0x3] %vm1264_vm10, %v2478_v54 }
0x3091   :  { %v3105_v4 = vadd.f32 %v3103_v0, %v3099_v3 }
0x3092   :  { %v3114_v5 = vpop.permute.xlu0 %3113 }
0x3093   :  { %v3116_v7 = vadd.f32 %v3114_v5, %v3099_v3  ;;  %v2604_v8 = vpop.permute.xlu1 %2603  ;;  %3107 = vrot.lane.b32.xlu1 %v3105_v4, %s4409_s21 }
0x3094   :  { %2606 = vst.msk [vmem:[#allocation5 + $0x6] sm:$0x3] %vm1264_vm10, %v2604_v8 }
0x3095   :  { %3118 = vrot.lane.b32.xlu0 %v3116_v7, %s4409_s21 }
0x3096   :  { %v2237_v11 = vpop.permute.xlu0 %2236 }
0x3097   :  { %2239 = vst.msk [vmem:[#allocation5 + $0xe] sm:$0x3] %vm1266_vm11, %v2237_v11  ;;  %v2730_v13 = vpop.permute.xlu1 %2729  ;;  %3297 = vrot.lane.b32.xlu1 %v5181_v12, %s4410_s12 }
0x3099   :  { %3338 = vrot.lane.b32.xlu0 %v5186_v6, %s4410_s12 }
0x309a   :  { %v2363_v46 = vpop.permute.xlu0 %2362 }
0x309b   :  { %2365 = vst.msk [vmem:[#allocation5 + $0xc] sm:$0x3] %vm1266_vm11, %v2363_v46  ;;  %v2856_v15 = vpop.permute.xlu1 %2855  ;;  %3379 = vrot.lane.b32.xlu1 %v5190_v14, %s4410_s12 }
0x309d   :  { %3420 = vrot.lane.b32.xlu0 %v5195_v16, %s4410_s12 }
0x309e   :  { %v2489_v17 = vpop.permute.xlu0 %2488 }
0x309f   :  { %2491 = vst.msk [vmem:[#allocation5 + $0xa] sm:$0x3] %vm1266_vm11, %v2489_v17  ;;  %v2982_v18 = vpop.permute.xlu1 %2981 }
0x30a0   :  { %2858 = vst.msk [vmem:[#allocation5 + $0xa] sm:$0x3] %vm1264_vm10, %v2856_v15  ;;  %2984 = vst.msk [vmem:[#allocation5 + $0xc] sm:$0x3] %vm1264_vm10, %v2982_v18  ;;  %v3302_v18 = vld [vmem:[#allocation4 + $0x8] sm:$0x3] }
0x30a1   :  { %v3303_v22 = vmul.f32 %v3302_v18, %v5213_v29 }
0x30a2   :  { %v2615_v19 = vpop.permute.xlu0 %2614 }
0x30a3   :  { %2617 = vst.msk [vmem:[#allocation5 + $0x8] sm:$0x3] %vm1266_vm11, %v2615_v19  ;;  %v5203_v20 = vpop.permute.xlu1 %3128 }
0x30a4   :  { %2732 = vst.msk [vmem:[#allocation5 + $0x8] sm:$0x3] %vm1264_vm10, %v2730_v13  ;;  %v3131_v19 = vsel %vm1045_vm7, %v5155_v1, %v5203_v20 }
0x30a5   :  { %v3133_v31 = vmul.f32 %v5209_v24, %v3131_v19 }
0x30a6   :  { %v2741_v57 = vpop.permute.xlu0 %2740 }
0x30a7   :  { %2743 = vst.msk [vmem:[#allocation5 + $0x6] sm:$0x3] %vm1266_vm11, %v2741_v57  ;;  %v3216_v58 = vpop.permute.xlu1 %3215 }
0x30a8   :  { %v3218_v10 = vsel %vm1045_vm7, %v3213_v60, %v3216_v58 }
0x30a9   :  { %v3219_v27 = vmul.f32 %v3218_v10, %v5209_v24  ;;  %v3343_v10 = vld [vmem:[#allocation4 + $0xa] sm:$0x3] }
0x30aa   :  { %v2867_v53 = vpop.permute.xlu0 %2866 }
0x30ab   :  { %2869 = vst.msk [vmem:[#allocation5 + $0x4] sm:$0x3] %vm1266_vm11, %v2867_v53  ;;  %v3222_v49 = vadd.f32 %v3221_v32, %v3219_v27  ;;  %v3305_v58 = vld [vmem:[#allocation5 + $0x8] sm:$0x3]  ;;  %v3384_v27 = vld [vmem:[#allocation4 + $0xc] sm:$0x3] }
0x30ac   :  { %v3346_v32 = vld [vmem:[#allocation5 + $0xa] sm:$0x3]  ;;  %v3306_v20 = vmul.f32 %v3305_v58, %v5217_v35 }
0x30ad   :  { %v3347_v47 = vmul.f32 %v3346_v32, %v5217_v35 }
0x30ae   :  { %v2993_v26 = vpop.permute.xlu0 %2992  ;;  %v3264_v56 = vld [vmem:[#allocation5 + $0x6] sm:$0x3] }
0x30af   :  { %2995 = vst.msk [vmem:[#allocation5 + $0x2] sm:$0x3] %vm1266_vm11, %v2993_v26  ;;  %v3265_v45 = vmul.f32 %v3264_v56, %v5217_v35 }
0x30b2   :  { %v3223_v34 = vld [vmem:[#allocation5 + $0x4] sm:$0x3]  ;;  %v3175_v36 = vpop.permute.xlu0 %3174 }
0x30b3   :  { %v3224_v38 = vmul.f32 %v3223_v34, %v5217_v35  ;;  %v3177_v40 = vsel %vm1045_vm7, %v5166_v63, %v3175_v36  ;;  %v3387_v36 = vld [vmem:[#allocation5 + $0xc] sm:$0x3] }
0x30b4   :  { %v3178_v43 = vmul.f32 %v3177_v40, %v5209_v24  ;;  %v3385_v40 = vmul.f32 %v3384_v27, %v5213_v29  ;;  %v3388_v56 = vmul.f32 %v3387_v36, %v5217_v35 }
0x30b5   :  { %v3225_v44 = vadd.f32 %v3224_v38, %v3222_v49  ;;  %v3136_v38 = vmul.f32 %v5213_v29, %v3134_v21 }
0x30b6   :  { %v3182_v48 = vld [vmem:[#allocation5 + $0x2] sm:$0x3]  ;;  %v3181_v50 = vadd.f32 %v3180_v42, %v3178_v43  ;;  %v3257_v37 = vpop.permute.xlu0 %3256  ;;  %v3426_v43 = vmul.f32 %v3425_v30, %v5213_v29 }
0x30b7   :  { %v3183_v51 = vmul.f32 %v3182_v48, %v5217_v35  ;;  %v3226_v52 = vmul.f32 %v3225_v44, %v5222_v41  ;;  %v3259_v59 = vsel %vm1045_vm7, %v5170_v9, %v3257_v37 }
0x30b8   :  { %v3260_v60 = vmul.f32 %v3259_v59, %v5209_v24 }
0x30b9   :  { %v3184_v61 = vadd.f32 %v3183_v51, %v3181_v50  ;;  %v3234_v62 = vrot.slane %v3226_v52, %v5226_v39  ;;  %v3137_v51 = vadd.f32 %v3136_v38, %v3133_v31 }
0x30ba   :  { %v3263_v63 = vadd.f32 %v3262_v23, %v3260_v60 }
0x30bb   :  { %v3185_v0 = vmul.f32 %v3184_v61, %v5222_v41  ;;  %v3235_v2 = vcombine.high %v3234_v62, %v3234_v62  ;;  %v3242_v28 = vrot.slane %v3234_v62, %v5226_v39 }
0x30bc   :  { %v3266_v55 = vadd.f32 %v3265_v45, %v3263_v63 }
0x30bd   :  { %v3193_v3 = vrot.slane %v3185_v0, %v5226_v39  ;;  %v3249_v9 = vrot.slane %v3235_v2, %v5226_v39  ;;  %3252 = vst.msk [vmem:[#allocation9 + $0x2] sm:$0x1] %vm3169_vm12, %v3242_v28 }
0x30be   :  { %v3267_v54 = vmul.f32 %v3266_v55, %v5222_v41 }
0x30bf   :  { %v3194_v4 = vcombine.high %v3193_v3, %v3193_v3  ;;  %v3201_v5 = vrot.slane %v3193_v3, %v5226_v39  ;;  %3253 = vst.msk [vmem:[#allocation9 + $0xa] sm:$0x1] %vm3169_vm12, %v3249_v9 }
0x30c0   :  { %v3275_v7 = vrot.slane %v3267_v54, %v5226_v39 }
0x30c1   :  { %v3208_v8 = vrot.slane %v3194_v4, %v5226_v39  ;;  %3211 = vst.msk [vmem:[#allocation9 + $0x1] sm:$0x1] %vm3169_vm12, %v3201_v5 }
0x30c2   :  { %v3276_v11 = vcombine.high %v3275_v7, %v3275_v7  ;;  %v3283_v13 = vrot.slane %v3275_v7, %v5226_v39 }
0x30c3   :  { %3212 = vst.msk [vmem:[#allocation9 + $0x9] sm:$0x1] %vm3169_vm12, %v3208_v8 }
0x30c4   :  { %v3290_v46 = vrot.slane %v3276_v11, %v5226_v39  ;;  %3293 = vst.msk [vmem:[#allocation9 + $0x3] sm:$0x1] %vm3169_vm12, %v3283_v13 }
0x30c6   :  { %3294 = vst.msk [vmem:[#allocation9 + $0xb] sm:$0x1] %vm3169_vm12, %v3290_v46 }
0x3105   :  { %v3108_v15 = vpop.permute.xlu1 %3107 }
0x3106   :  { %3110 = vst.msk [vmem:[#allocation5 + $0xe] sm:$0x3] %vm1264_vm10, %v3108_v15 }
0x3107   :  { %v3119_v17 = vpop.permute.xlu0 %3118 }
0x3108   :  { %3121 = vst.msk [vmem:[#allocation5] sm:$0x3] %vm1266_vm11, %v3119_v17 }
0x3109   :  { %v3298_v57 = vpop.permute.xlu1 %3297 }
0x310a   :  { %v3300_v53 = vsel %vm1045_vm7, %v5181_v12, %v3298_v57  ;;  %v3344_v12 = vmul.f32 %v3343_v10, %v5213_v29 }
0x310b   :  { %v3301_v25 = vmul.f32 %v3300_v53, %v5209_v24  ;;  %v3339_v26 = vpop.permute.xlu0 %3338 }
0x310c   :  { %v3341_v1 = vsel %vm1045_vm7, %v5186_v6, %v3339_v26 }
0x310d   :  { %v3304_v33 = vadd.f32 %v3303_v22, %v3301_v25  ;;  %v3342_v34 = vmul.f32 %v3341_v1, %v5209_v24  ;;  %v3380_v49 = vpop.permute.xlu1 %3379  ;;  %v3428_v61 = vld [vmem:[#allocation5 + $0xe] sm:$0x3] }
0x310e   :  { %v3382_v42 = vsel %vm1045_vm7, %v5190_v14, %v3380_v49  ;;  %v3429_v55 = vmul.f32 %v3428_v61, %v5217_v35 }
0x310f   :  { %v3138_v44 = vld [vmem:[#allocation5] sm:$0x3]  ;;  %v3307_v6 = vadd.f32 %v3306_v20, %v3304_v33  ;;  %v3345_v48 = vadd.f32 %v3344_v12, %v3342_v34  ;;  %v3383_v50 = vmul.f32 %v3382_v42, %v5209_v24  ;;  %v3421_v37 = vpop.permute.xlu0 %3420 }
0x3110   :  { %v3140_v52 = vmul.f32 %v5217_v35, %v3138_v44  ;;  %v3423_v59 = vsel %vm1045_vm7, %v5195_v16, %v3421_v37 }
0x3111   :  { %v3308_v14 = vmul.f32 %v3307_v6, %v5222_v41  ;;  %v3348_v23 = vadd.f32 %v3347_v47, %v3345_v48  ;;  %v3386_v29 = vadd.f32 %v3385_v40, %v3383_v50  ;;  %v3424_v60 = vmul.f32 %v3423_v59, %v5209_v24 }
0x3112   :  { %v3141_v62 = vadd.f32 %v3140_v52, %v3137_v51 }
0x3113   :  { %v3316_v45 = vrot.slane %v3308_v14, %v5226_v39  ;;  %v3349_v63 = vmul.f32 %v3348_v23, %v5222_v41  ;;  %v3389_v0 = vadd.f32 %v3388_v56, %v3386_v29  ;;  %v3427_v2 = vadd.f32 %v3426_v43, %v3424_v60 }
0x3114   :  { %v3143_v28 = vmul.f32 %v5222_v41, %v3141_v62 }
0x3115   :  { %v3317_v3 = vcombine.high %v3316_v45, %v3316_v45  ;;  %v3324_v16 = vrot.slane %v3316_v45, %v5226_v39  ;;  %v3357_v9 = vrot.slane %v3349_v63, %v5226_v39  ;;  %v3390_v54 = vmul.f32 %v3389_v0, %v5222_v41 }
0x3116   :  { %v3151_v24 = vrot.slane %v3143_v28, %v5226_v39  ;;  %v3430_v4 = vadd.f32 %v3429_v55, %v3427_v2 }
0x3117   :  { %v3331_v5 = vrot.slane %v3317_v3, %v5226_v39  ;;  %3334 = vst.msk [vmem:[#allocation9 + $0x4] sm:$0x1] %vm3169_vm12, %v3324_v16  ;;  %v3358_v7 = vcombine.high %v3357_v9, %v3357_v9  ;;  %v3365_v8 = vrot.slane %v3357_v9, %v5226_v39  ;;  %v3398_v11 = vrot.slane %v3390_v54, %v5226_v39 }
0x3118   :  { %v3152_v35 = vcombine.high %v3151_v24, %v3151_v24  ;;  %v3159_v13 = vrot.slane %v3151_v24, %v5226_v39  ;;  %v3431_v46 = vmul.f32 %v3430_v4, %v5222_v41 }
0x3119   :  { %3335 = vst.msk [vmem:[#allocation9 + $0xc] sm:$0x1] %vm3169_vm12, %v3331_v5  ;;  %v3372_v15 = vrot.slane %v3358_v7, %v5226_v39  ;;  %3375 = vst.msk [vmem:[#allocation9 + $0x5] sm:$0x1] %vm3169_vm12, %v3365_v8  ;;  %v3399_v17 = vcombine.high %v3398_v11, %v3398_v11  ;;  %v3406_v18 = vrot.slane %v3398_v11, %v5226_v39 }
0x311a   :  { %v3166_v19 = vrot.slane %v3152_v35, %v5226_v39  ;;  %3170 = vst.msk [vmem:[#allocation9] sm:$0x1] %vm3169_vm12, %v3159_v13  ;;  %v3439_v57 = vrot.slane %v3431_v46, %v5226_v39 }
0x311b   :  { %3376 = vst.msk [vmem:[#allocation9 + $0xd] sm:$0x1] %vm3169_vm12, %v3372_v15  ;;  %v3413_v58 = vrot.slane %v3399_v17, %v5226_v39  ;;  %3416 = vst.msk [vmem:[#allocation9 + $0x6] sm:$0x1] %vm3169_vm12, %v3406_v18 }
0x311c   :  { %3171 = vst.msk [vmem:[#allocation9 + $0x8] sm:$0x1] %vm3169_vm12, %v3166_v19  ;;  %v3440_v41 = vcombine.high %v3439_v57, %v3439_v57  ;;  %v3447_v53 = vrot.slane %v3439_v57, %v5226_v39 }
0x311d   :  { %3417 = vst.msk [vmem:[#allocation9 + $0xe] sm:$0x1] %vm3169_vm12, %v3413_v58 }
0x311e   :  { %v3454_v10 = vrot.slane %v3440_v41, %v5226_v39  ;;  %3457 = vst.msk [vmem:[#allocation9 + $0x7] sm:$0x1] %vm3169_vm12, %v3447_v53 }
0x3120   :  { %3458 = vst.msk [vmem:[#allocation9 + $0xf] sm:$0x1] %vm3169_vm12, %v3454_v10 }
0x3121   :  { %4388 = shalt.err (!%p4385_p9)
}
0x3122   :  { %s4389_s2 = scalar_lea.hbm %s5336_s14, 256 }
0x3123   :  { %p4390_p10 = scmp.ne.s32.totalorder %s5336_s14, %s4389_s2  ;;  %p4393_p11 = scmp.lt.u32.totalorder %s4389_s2, %s5336_s14 }
0x3125   :  { %p4395_p12 = pnand %p4393_p11, %p4390_p10 }
0x3127   :  { %4398 = shalt.err (!%p4395_p12)
}
0x3128   :  { %s4413_s23 = smov 128   ;;  %s4414_s24 = smov 8  }
0x3129   :  { %3470 = dma.vmem_to_hbm [thread:$0]  %s3465_s1, 256, %s5336_s14, [#allocation7], %s4413_s23, %s4413_s23, %s4414_s24  }
0x312a   :  { %4401 = dma.done.wait [#allocation7], 256  }
0x312b   :  { %4402 = vsyncadd [#allocation7], 4294967040 }
0x312c   :  { %3474 = vsyncpa [#allocation7], 1 }
0x312d   :  { %3475 = vsyncpa [#allocation8], 1 }

</bundles_post_ra>
